<compile_context>
chip_gen: v7x
topology: tpu7x:2x2x1
jax: 0.10.0
libtpu: 0.0.40
codegen_flags: <defaults>
</compile_context>

<pallas_src>
import functools

import jax
import jax.numpy as jnp
import numpy as np
from jax.experimental import pallas as pl
from jax.experimental.pallas import tpu as pltpu

LANE = 128
NEG_INF = -1e30  # padded logit columns -> exp() == 0


def bilstm_kernel(x_ref, wih_ref, b_ref, whh_ref, wout_ref, bout_ref,
                  out_ref, pre_ref, h_ref, *, T, Bp, Hp):
    """Fused BiLSTM recurrence + output projection + softmax.

    Gate/slot layout (each slot is Hp = 128 lanes, zero-padded above real H):
      slot 0..2 : fwd  i, f, o  (sigmoid)     slot 6 : fwd g (tanh)
      slot 3..5 : bwd  i, f, o  (sigmoid)     slot 7 : bwd g (tanh)

    x_ref   : (T*Bp, E)      embedded input, time-major, batch padded to Bp
    wih_ref : (E, 8*Hp)      input weights, BN folded, slot layout above
    b_ref   : (1, 8*Hp)      combined biases, BN folded
    whh_ref : (2*Hp, 8*Hp)   block-diagonal recurrent weights (rows: [hf | hb])
    wout_ref: (2*Hp, Cp)     output weights (rows: [hf | hb]), zero-padded
    bout_ref: (1, Cp)        output bias; padded columns hold -1e30
    out_ref : (T*Bp, Cp)     softmax probabilities (lane-dense)
    pre_ref : (T*Bp, 8*Hp)   scratch: hoisted input projection
    h_ref   : (T*Bp, 2*Hp)   scratch: per-step hidden states [hf | hb]
    """
    # --- Hoisted input projection: all timesteps & both directions at once. ---
    pre_ref[...] = (jnp.dot(x_ref[...], wih_ref[...],
                            preferred_element_type=jnp.float32) + b_ref[...])

    whh = whh_ref[...]

    # --- Fused fwd/bwd recurrence: one block-diagonal dot + elementwise. ---
    def step(t, carry):
        h_cat, cf, cb = carry
        rf = pl.multiple_of(t * Bp, Bp)             # fwd reads/writes time t
        rb = pl.multiple_of((T - 1 - t) * Bp, Bp)   # bwd reads/writes time T-1-t

        # Single recurrent MXU pass for both directions.
        g = jnp.dot(h_cat, whh, preferred_element_type=jnp.float32)   # (Bp, 8Hp)

        # Lane-tile-aligned pre-activation slices taken at the ref.
        sf = jax.nn.sigmoid(pre_ref[pl.ds(rf, Bp), pl.ds(0, 3 * Hp)]
                            + g[:, 0:3 * Hp])                 # fwd i|f|o
        sb = jax.nn.sigmoid(pre_ref[pl.ds(rb, Bp), pl.ds(3 * Hp, 3 * Hp)]
                            + g[:, 3 * Hp:6 * Hp])            # bwd i|f|o
        gf = jnp.tanh(pre_ref[pl.ds(rf, Bp), pl.ds(6 * Hp, Hp)]
                      + g[:, 6 * Hp:7 * Hp])                  # fwd candidate
        gb = jnp.tanh(pre_ref[pl.ds(rb, Bp), pl.ds(7 * Hp, Hp)]
                      + g[:, 7 * Hp:8 * Hp])                  # bwd candidate

        cf = sf[:, Hp:2 * Hp] * cf + sf[:, 0:Hp] * gf
        cb = sb[:, Hp:2 * Hp] * cb + sb[:, 0:Hp] * gb
        hf = sf[:, 2 * Hp:3 * Hp] * jnp.tanh(cf)
        hb = sb[:, 2 * Hp:3 * Hp] * jnp.tanh(cb)

        # Full-lane-tile stores (Hp = 128 -> unmasked vst).
        h_ref[pl.ds(rf, Bp), pl.ds(0, Hp)] = hf
        h_ref[pl.ds(rb, Bp), pl.ds(Hp, Hp)] = hb
        return jnp.concatenate([hf, hb], axis=-1), cf, cb

    h0 = jnp.zeros((Bp, 2 * Hp), jnp.float32)
    c0 = jnp.zeros((Bp, Hp), jnp.float32)
    # Full unroll only for short sequences; partial unroll keeps LLO scheduler
    # visibility without code-size / live-range blowup at production T.
    unroll = True if T <= 16 else 8
    jax.lax.fori_loop(0, T, step, (h0, c0, c0), unroll=unroll)

    # --- Batched output stage: one MXU pass + lane-dense softmax over Cp. ---
    logits = (jnp.dot(h_ref[...], wout_ref[...],
                      preferred_element_type=jnp.float32) + bout_ref[...])
    m = jnp.max(logits, axis=-1, keepdims=True)
    e = jnp.exp(logits - m)
    denom = jnp.sum(e, axis=-1, keepdims=True)
    # Approx reciprocal (EUP slot): rows sum to 1 only to ~1e-3 — documented
    # accuracy choice, well within the test tolerance.
    out_ref[...] = e * pl.reciprocal(denom, approx=True)


def _round_up(n, m):
    return ((n + m - 1) // m) * m


def _full_spec(shape):
    nd = len(shape)
    return pl.BlockSpec(shape, lambda i, _nd=nd: (0,) * _nd)


def bilstm_forward(x_ids, params, *, eps=1e-5):
    emb_tbl = params["embedding"]
    E = emb_tbl.shape[1]
    H = params["whh_f"].shape[0]
    C = params["w_out"].shape[1]
    B, T = x_ids.shape

    Bp = max(8, _round_up(B, 8))   # sublane-aligned batch (the only free M axis)
    Hp = _round_up(H, LANE)        # lane-aligned hidden size (gates = full tiles)
    Cp = _round_up(C, LANE)        # lane-dense output

    # Glue: embedding gather + dropout(identity), time-major, batch padded.
    embedded = jnp.take(emb_tbl, x_ids, axis=0).astype(jnp.float32)     # (B, T, E)
    x_tbe = jnp.transpose(embedded, (1, 0, 2))                          # (T, B, E)
    x_pad = jnp.zeros((T, Bp, E), jnp.float32).at[:, :B, :].set(x_tbe)
    x2d = x_pad.reshape(T * Bp, E)                                      # (T*Bp, E)

    # Eval-mode BatchNorm1d (over embedding_dim) folded into input weights.
    scale = params["bn_gamma"] / jnp.sqrt(params["bn_var"] + eps)       # (E,)
    shift = params["bn_beta"] - params["bn_mean"] * scale               # (E,)

    # Slot layout: 0..2 fwd i/f/o, 3..5 bwd i/f/o, 6 fwd g, 7 bwd g.
    # Storage gate order of the params is (i, f, g, o) -> slot mapping below.
    FWD_SLOTS = (0, 1, 6, 2)
    BWD_SLOTS = (3, 4, 7, 5)

    wih_cat = jnp.zeros((E, 8 * Hp), jnp.float32)
    b_cat = jnp.zeros((1, 8 * Hp), jnp.float32)
    whh_cat = jnp.zeros((2 * Hp, 8 * Hp), jnp.float32)

    def place_dir(wih_cat, b_cat, whh_cat, wih, whh, b, slots, row_off):
        wih = wih.astype(jnp.float32)
        whh = whh.astype(jnp.float32)
        b = b.astype(jnp.float32)
        # Fold BN: (x*scale + shift) @ wih + b == x @ (scale[:,None]*wih) + (shift@wih + b)
        wih_fold = scale[:, None] * wih
        b_fold = b + shift[None, :] @ wih
        for k, slot in enumerate(slots):           # storage order i, f, g, o
            gsl = slice(k * H, (k + 1) * H)
            csl = slice(slot * Hp, slot * Hp + H)
            wih_cat = wih_cat.at[:, csl].set(wih_fold[:, gsl])
            b_cat = b_cat.at[:, csl].set(b_fold[:, gsl])
            whh_cat = whh_cat.at[row_off:row_off + H, csl].set(whh[:, gsl])
        return wih_cat, b_cat, whh_cat

    wih_cat, b_cat, whh_cat = place_dir(wih_cat, b_cat, whh_cat,
                                        params["wih_f"], params["whh_f"],
                                        params["b_f"], FWD_SLOTS, 0)
    wih_cat, b_cat, whh_cat = place_dir(wih_cat, b_cat, whh_cat,
                                        params["wih_b"], params["whh_b"],
                                        params["b_b"], BWD_SLOTS, Hp)

    w_out = params["w_out"].astype(jnp.float32)                         # (2H, C)
    b_out = params["b_out"].astype(jnp.float32)                         # (1, C)
    wout_pad = (jnp.zeros((2 * Hp, Cp), jnp.float32)
                .at[0:H, 0:C].set(w_out[:H])
                .at[Hp:Hp + H, 0:C].set(w_out[H:]))
    # Padded logit columns pinned to a huge negative so they add no softmax mass.
    bout_pad = jnp.full((1, Cp), NEG_INF, jnp.float32).at[:, :C].set(b_out)

    kernel = functools.partial(bilstm_kernel, T=T, Bp=Bp, Hp=Hp)
    args = (x2d, wih_cat, b_cat, whh_cat, wout_pad, bout_pad)

    out2d = pl.pallas_call(
        kernel,
        out_shape=jax.ShapeDtypeStruct((T * Bp, Cp), jnp.float32),
        grid=(1,),
        in_specs=[_full_spec(a.shape) for a in args],
        out_specs=pl.BlockSpec((T * Bp, Cp), lambda i: (0, 0)),
        scratch_shapes=[pltpu.VMEM((T * Bp, 8 * Hp), jnp.float32),   # gate pre-activations
                        pltpu.VMEM((T * Bp, 2 * Hp), jnp.float32)],  # hidden states [hf | hb]
        compiler_params=pltpu.CompilerParams(
            dimension_semantics=("arbitrary",)),
    )(*args)

    # Padded batch rows / padded classes are dropped here (never written back).
    out = out2d.reshape(T, Bp, Cp)[:, :B, :C]                           # (T, B, C)
    return jnp.transpose(out, (1, 0, 2))                                # (B, T, C)


def init_params(key, num_words, E, H, C):
    ks = jax.random.split(key, 13)
    u = lambda k, shape, lo, hi: jax.random.uniform(k, shape, jnp.float32, lo, hi)
    s = 0.1
    return dict(
        embedding=u(ks[0], (num_words, E), -s, s),
        bn_gamma=u(ks[1], (E,), 0.5, 1.5),
        bn_beta=u(ks[2], (E,), -0.1, 0.1),
        bn_mean=u(ks[3], (E,), -0.1, 0.1),
        bn_var=u(ks[4], (E,), 0.5, 1.5),
        # LSTM weights stored pre-transposed: (in, 4H) / (H, 4H), gate order i,f,g,o
        wih_f=u(ks[5], (E, 4 * H), -s, s),
        whh_f=u(ks[6], (H, 4 * H), -s, s),
        b_f=u(ks[7], (1, 4 * H), -s, s),        # bias_ih + bias_hh combined
        wih_b=u(ks[8], (E, 4 * H), -s, s),
        whh_b=u(ks[9], (H, 4 * H), -s, s),
        b_b=u(ks[10], (1, 4 * H), -s, s),
        w_out=u(ks[11], (2 * H, C), -s, s),     # Linear weight, pre-transposed
        b_out=u(ks[12], (1, C), -s, s),
    )


def bilstm_reference(x_ids, params, *, eps=1e-5):
    """Pure-JAX reference mirroring the PyTorch forward (inference mode)."""
    H = params["whh_f"].shape[0]
    B = x_ids.shape[0]
    embedded = jnp.take(params["embedding"], x_ids, axis=0)             # (B, T, E)
    scale = params["bn_gamma"] / jnp.sqrt(params["bn_var"] + eps)
    shift = params["bn_beta"] - params["bn_mean"] * scale
    xn = embedded * scale + shift
    xs = jnp.transpose(xn, (1, 0, 2))                                   # (T, B, E)

    def run(xseq, wih, whh, b):
        def step(carry, xt):
            h, c = carry
            g = xt @ wih + h @ whh + b
            i = jax.nn.sigmoid(g[:, :H])
            f = jax.nn.sigmoid(g[:, H:2 * H])
            gg = jnp.tanh(g[:, 2 * H:3 * H])
            o = jax.nn.sigmoid(g[:, 3 * H:])
            c = f * c + i * gg
            h = o * jnp.tanh(c)
            return (h, c), h
        init = (jnp.zeros((B, H), jnp.float32), jnp.zeros((B, H), jnp.float32))
        _, hs = jax.lax.scan(step, init, xseq)
        return hs                                                       # (T, B, H)

    hf = run(xs, params["wih_f"], params["whh_f"], params["b_f"])
    hb = run(xs[::-1], params["wih_b"], params["whh_b"], params["b_b"])[::-1]
    out = jnp.concatenate([hf, hb], axis=-1)                            # (T, B, 2H)
    logits = out @ params["w_out"] + params["b_out"]
    probs = jax.nn.softmax(logits, axis=-1)
    return jnp.transpose(probs, (1, 0, 2))                              # (B, T, C)


if __name__ == "__main__":
    num_words, E, H, C = 1000, 32, 32, 5       # small, consistent with the module
    B, T = 2, 8

    key = jax.random.PRNGKey(0)
    pkey, xkey = jax.random.split(key)
    params = init_params(pkey, num_words, E, H, C)
    x_ids = jax.random.randint(xkey, (B, T), 0, num_words, dtype=jnp.int32)

    probs = jax.jit(bilstm_forward)(x_ids, params)
    probs = jax.block_until_ready(probs)

    ref = bilstm_reference(x_ids, params)
    np.testing.assert_allclose(np.asarray(probs), np.asarray(ref), atol=5e-3, rtol=0)
    assert probs.shape == (B, T, C)
    assert np.allclose(np.asarray(probs).sum(-1), 1.0, atol=5e-3)

    print("KERNEL_OK")
</pallas_src>

<mosaic_0001>
module attributes {stable_mosaic.version = 11 : i64} {
  func.func @bilstm_kernel(%arg0: i32, %arg1: memref<64x32xf32, #tpu.memory_space<vmem>>, %arg2: memref<32x1024xf32, #tpu.memory_space<vmem>>, %arg3: memref<1x1024xf32, #tpu.memory_space<vmem>>, %arg4: memref<256x1024xf32, #tpu.memory_space<vmem>>, %arg5: memref<256x128xf32, #tpu.memory_space<vmem>>, %arg6: memref<1x128xf32, #tpu.memory_space<vmem>>, %arg7: memref<64x128xf32, #tpu.memory_space<vmem>>, %arg8: memref<64x1024xf32, #tpu.memory_space<vmem>>, %arg9: memref<64x256xf32, #tpu.memory_space<vmem>>) attributes {dimension_semantics = [#tpu.dimension_semantics<arbitrary>], iteration_bounds = array<i64: 1>, scalar_prefetch = 0 : i64, scratch_operands = 2 : i64, tpu.core_type = #tpu.core_type<tc>, window_params = [{pipeline_mode = #tpu.pipeline_mode<synchronous>, transform_indices = @transform_0, window_bounds = array<i64: 64, 32>}, {pipeline_mode = #tpu.pipeline_mode<synchronous>, transform_indices = @transform_1, window_bounds = array<i64: 32, 1024>}, {pipeline_mode = #tpu.pipeline_mode<synchronous>, transform_indices = @transform_2, window_bounds = array<i64: 1, 1024>}, {pipeline_mode = #tpu.pipeline_mode<synchronous>, transform_indices = @transform_3, window_bounds = array<i64: 256, 1024>}, {pipeline_mode = #tpu.pipeline_mode<synchronous>, transform_indices = @transform_4, window_bounds = array<i64: 256, 128>}, {pipeline_mode = #tpu.pipeline_mode<synchronous>, transform_indices = @transform_5, window_bounds = array<i64: 1, 128>}, {pipeline_mode = #tpu.pipeline_mode<synchronous>, transform_indices = @transform_6, window_bounds = array<i64: 64, 128>}]} {
    %c0 = arith.constant 0 : index
    %c0_0 = arith.constant 0 : index
    %0 = vector.load %arg1[%c0, %c0_0] : memref<64x32xf32, #tpu.memory_space<vmem>>, vector<64x32xf32>
    %c0_1 = arith.constant 0 : index
    %c0_2 = arith.constant 0 : index
    %1 = vector.load %arg2[%c0_1, %c0_2] : memref<32x1024xf32, #tpu.memory_space<vmem>>, vector<32x1024xf32>
    %cst = arith.constant dense<0.000000e+00> : vector<64x1024xf32>
    %2 = tpu.matmul %0, %1, %cst {dimension_numbers = #tpu.dot_dimension_numbers<[1], [0], [0], [1], [0, 0, 1, 1], [], []>} : vector<64x32xf32>, vector<32x1024xf32>, vector<64x1024xf32> -> vector<64x1024xf32>
    %c0_3 = arith.constant 0 : index
    %c0_4 = arith.constant 0 : index
    %3 = vector.load %arg3[%c0_3, %c0_4] : memref<1x1024xf32, #tpu.memory_space<vmem>>, vector<1x1024xf32>
    %4 = vector.broadcast %3 : vector<1x1024xf32> to vector<64x1024xf32>
    %5 = arith.addf %2, %4 : vector<64x1024xf32>
    %c0_5 = arith.constant 0 : index
    %c0_6 = arith.constant 0 : index
    %6 = vector.load %arg8[%c0_5, %c0_6] : memref<64x1024xf32, #tpu.memory_space<vmem>>, vector<64x1024xf32>
    tpu.vector_store %arg8[%c0_5, %c0_6], %5 {strides = array<i32>} : memref<64x1024xf32, #tpu.memory_space<vmem>>, vector<64x1024xf32>,
    %c0_7 = arith.constant 0 : index
    %c0_8 = arith.constant 0 : index
    %7 = vector.load %arg4[%c0_7, %c0_8] : memref<256x1024xf32, #tpu.memory_space<vmem>>, vector<256x1024xf32>
    %cst_9 = arith.constant 0.000000e+00 : f32
    %8 = vector.broadcast %cst_9 : f32 to vector<8x256xf32>
    %cst_10 = arith.constant 0.000000e+00 : f32
    %9 = vector.broadcast %cst_10 : f32 to vector<8x128xf32>
    %c0_i32 = arith.constant 0 : i32
    %c8_i32 = arith.constant 8 : i32
    %10 = arith.muli %c0_i32, %c8_i32 : i32
    %11 = tpu.assume_multiple %10, 8 : i32
    %c7_i32 = arith.constant 7 : i32
    %12 = arith.subi %c7_i32, %c0_i32 : i32
    %c8_i32_11 = arith.constant 8 : i32
    %13 = arith.muli %12, %c8_i32_11 : i32
    %14 = tpu.assume_multiple %13, 8 : i32
    %cst_12 = arith.constant dense<0.000000e+00> : vector<8x1024xf32>
    %15 = tpu.matmul %8, %7, %cst_12 {dimension_numbers = #tpu.dot_dimension_numbers<[1], [0], [0], [1], [0, 0, 1, 1], [], []>} : vector<8x256xf32>, vector<256x1024xf32>, vector<8x1024xf32> -> vector<8x1024xf32>
    %16 = arith.index_cast %11 : i32 to index
    %c0_13 = arith.constant 0 : index
    %17 = vector.load %arg8[%16, %c0_13] : memref<64x1024xf32, #tpu.memory_space<vmem>>, vector<8x384xf32>
    %18 = vector.extract_strided_slice %15 {offsets = [0, 0], sizes = [8, 384], strides = [1, 1]} : vector<8x1024xf32> to vector<8x384xf32>
    %19 = arith.addf %17, %18 : vector<8x384xf32>
    %20 = arith.negf %19 : vector<8x384xf32>
    %21 = math.exp %20 : vector<8x384xf32>
    %cst_14 = arith.constant 1.000000e+00 : f32
    %22 = vector.broadcast %cst_14 : f32 to vector<8x384xf32>
    %23 = arith.addf %22, %21 : vector<8x384xf32>
    %24 = arith.divf %22, %23 : vector<8x384xf32>
    %25 = arith.index_cast %14 : i32 to index
    %c384 = arith.constant 384 : index
    %26 = vector.load %arg8[%25, %c384] : memref<64x1024xf32, #tpu.memory_space<vmem>>, vector<8x384xf32>
    %27 = vector.extract_strided_slice %15 {offsets = [0, 384], sizes = [8, 384], strides = [1, 1]} : vector<8x1024xf32> to vector<8x384xf32>
    %28 = arith.addf %26, %27 : vector<8x384xf32>
    %29 = arith.negf %28 : vector<8x384xf32>
    %30 = math.exp %29 : vector<8x384xf32>
    %cst_15 = arith.constant 1.000000e+00 : f32
    %31 = vector.broadcast %cst_15 : f32 to vector<8x384xf32>
    %32 = arith.addf %31, %30 : vector<8x384xf32>
    %33 = arith.divf %31, %32 : vector<8x384xf32>
    %34 = arith.index_cast %11 : i32 to index
    %c768 = arith.constant 768 : index
    %35 = vector.load %arg8[%34, %c768] : memref<64x1024xf32, #tpu.memory_space<vmem>>, vector<8x128xf32>
    %36 = vector.extract_strided_slice %15 {offsets = [0, 768], sizes = [8, 128], strides = [1, 1]} : vector<8x1024xf32> to vector<8x128xf32>
    %37 = arith.addf %35, %36 : vector<8x128xf32>
    %38 = math.tanh %37 : vector<8x128xf32>
    %39 = arith.index_cast %14 : i32 to index
    %c896 = arith.constant 896 : index
    %40 = vector.load %arg8[%39, %c896] : memref<64x1024xf32, #tpu.memory_space<vmem>>, vector<8x128xf32>
    %41 = vector.extract_strided_slice %15 {offsets = [0, 896], sizes = [8, 128], strides = [1, 1]} : vector<8x1024xf32> to vector<8x128xf32>
    %42 = arith.addf %40, %41 : vector<8x128xf32>
    %43 = math.tanh %42 : vector<8x128xf32>
    %44 = vector.extract_strided_slice %24 {offsets = [0, 128], sizes = [8, 128], strides = [1, 1]} : vector<8x384xf32> to vector<8x128xf32>
    %45 = arith.mulf %44, %9 : vector<8x128xf32>
    %46 = vector.extract_strided_slice %24 {offsets = [0, 0], sizes = [8, 128], strides = [1, 1]} : vector<8x384xf32> to vector<8x128xf32>
    %47 = arith.mulf %46, %38 : vector<8x128xf32>
    %48 = arith.addf %45, %47 : vector<8x128xf32>
    %49 = vector.extract_strided_slice %33 {offsets = [0, 128], sizes = [8, 128], strides = [1, 1]} : vector<8x384xf32> to vector<8x128xf32>
    %50 = arith.mulf %49, %9 : vector<8x128xf32>
    %51 = vector.extract_strided_slice %33 {offsets = [0, 0], sizes = [8, 128], strides = [1, 1]} : vector<8x384xf32> to vector<8x128xf32>
    %52 = arith.mulf %51, %43 : vector<8x128xf32>
    %53 = arith.addf %50, %52 : vector<8x128xf32>
    %54 = vector.extract_strided_slice %24 {offsets = [0, 256], sizes = [8, 128], strides = [1, 1]} : vector<8x384xf32> to vector<8x128xf32>
    %55 = math.tanh %48 : vector<8x128xf32>
    %56 = arith.mulf %54, %55 : vector<8x128xf32>
    %57 = vector.extract_strided_slice %33 {offsets = [0, 256], sizes = [8, 128], strides = [1, 1]} : vector<8x384xf32> to vector<8x128xf32>
    %58 = math.tanh %53 : vector<8x128xf32>
    %59 = arith.mulf %57, %58 : vector<8x128xf32>
    %60 = arith.index_cast %11 : i32 to index
    %c0_16 = arith.constant 0 : index
    %61 = vector.load %arg9[%60, %c0_16] : memref<64x256xf32, #tpu.memory_space<vmem>>, vector<8x128xf32>
    tpu.vector_store %arg9[%60, %c0_16], %56 {strides = array<i32>} : memref<64x256xf32, #tpu.memory_space<vmem>>, vector<8x128xf32>,
    %62 = arith.index_cast %14 : i32 to index
    %c128 = arith.constant 128 : index
    %63 = vector.load %arg9[%62, %c128] : memref<64x256xf32, #tpu.memory_space<vmem>>, vector<8x128xf32>
    tpu.vector_store %arg9[%62, %c128], %59 {strides = array<i32>} : memref<64x256xf32, #tpu.memory_space<vmem>>, vector<8x128xf32>,
    %64 = tpu.concatenate %56, %59 in 1 : vector<8x128xf32>, vector<8x128xf32> -> vector<8x256xf32>
    %c1_i32 = arith.constant 1 : i32
    %c8_i32_17 = arith.constant 8 : i32
    %65 = arith.muli %c1_i32, %c8_i32_17 : i32
    %66 = tpu.assume_multiple %65, 8 : i32
    %c7_i32_18 = arith.constant 7 : i32
    %67 = arith.subi %c7_i32_18, %c1_i32 : i32
    %c8_i32_19 = arith.constant 8 : i32
    %68 = arith.muli %67, %c8_i32_19 : i32
    %69 = tpu.assume_multiple %68, 8 : i32
    %cst_20 = arith.constant dense<0.000000e+00> : vector<8x1024xf32>
    %70 = tpu.matmul %64, %7, %cst_20 {dimension_numbers = #tpu.dot_dimension_numbers<[1], [0], [0], [1], [0, 0, 1, 1], [], []>} : vector<8x256xf32>, vector<256x1024xf32>, vector<8x1024xf32> -> vector<8x1024xf32>
    %71 = arith.index_cast %66 : i32 to index
    %c0_21 = arith.constant 0 : index
    %72 = vector.load %arg8[%71, %c0_21] : memref<64x1024xf32, #tpu.memory_space<vmem>>, vector<8x384xf32>
    %73 = vector.extract_strided_slice %70 {offsets = [0, 0], sizes = [8, 384], strides = [1, 1]} : vector<8x1024xf32> to vector<8x384xf32>
    %74 = arith.addf %72, %73 : vector<8x384xf32>
    %75 = arith.negf %74 : vector<8x384xf32>
    %76 = math.exp %75 : vector<8x384xf32>
    %cst_22 = arith.constant 1.000000e+00 : f32
    %77 = vector.broadcast %cst_22 : f32 to vector<8x384xf32>
    %78 = arith.addf %77, %76 : vector<8x384xf32>
    %79 = arith.divf %77, %78 : vector<8x384xf32>
    %80 = arith.index_cast %69 : i32 to index
    %c384_23 = arith.constant 384 : index
    %81 = vector.load %arg8[%80, %c384_23] : memref<64x1024xf32, #tpu.memory_space<vmem>>, vector<8x384xf32>
    %82 = vector.extract_strided_slice %70 {offsets = [0, 384], sizes = [8, 384], strides = [1, 1]} : vector<8x1024xf32> to vector<8x384xf32>
    %83 = arith.addf %81, %82 : vector<8x384xf32>
    %84 = arith.negf %83 : vector<8x384xf32>
    %85 = math.exp %84 : vector<8x384xf32>
    %cst_24 = arith.constant 1.000000e+00 : f32
    %86 = vector.broadcast %cst_24 : f32 to vector<8x384xf32>
    %87 = arith.addf %86, %85 : vector<8x384xf32>
    %88 = arith.divf %86, %87 : vector<8x384xf32>
    %89 = arith.index_cast %66 : i32 to index
    %c768_25 = arith.constant 768 : index
    %90 = vector.load %arg8[%89, %c768_25] : memref<64x1024xf32, #tpu.memory_space<vmem>>, vector<8x128xf32>
    %91 = vector.extract_strided_slice %70 {offsets = [0, 768], sizes = [8, 128], strides = [1, 1]} : vector<8x1024xf32> to vector<8x128xf32>
    %92 = arith.addf %90, %91 : vector<8x128xf32>
    %93 = math.tanh %92 : vector<8x128xf32>
    %94 = arith.index_cast %69 : i32 to index
    %c896_26 = arith.constant 896 : index
    %95 = vector.load %arg8[%94, %c896_26] : memref<64x1024xf32, #tpu.memory_space<vmem>>, vector<8x128xf32>
    %96 = vector.extract_strided_slice %70 {offsets = [0, 896], sizes = [8, 128], strides = [1, 1]} : vector<8x1024xf32> to vector<8x128xf32>
    %97 = arith.addf %95, %96 : vector<8x128xf32>
    %98 = math.tanh %97 : vector<8x128xf32>
    %99 = vector.extract_strided_slice %79 {offsets = [0, 128], sizes = [8, 128], strides = [1, 1]} : vector<8x384xf32> to vector<8x128xf32>
    %100 = arith.mulf %99, %48 : vector<8x128xf32>
    %101 = vector.extract_strided_slice %79 {offsets = [0, 0], sizes = [8, 128], strides = [1, 1]} : vector<8x384xf32> to vector<8x128xf32>
    %102 = arith.mulf %101, %93 : vector<8x128xf32>
    %103 = arith.addf %100, %102 : vector<8x128xf32>
    %104 = vector.extract_strided_slice %88 {offsets = [0, 128], sizes = [8, 128], strides = [1, 1]} : vector<8x384xf32> to vector<8x128xf32>
    %105 = arith.mulf %104, %53 : vector<8x128xf32>
    %106 = vector.extract_strided_slice %88 {offsets = [0, 0], sizes = [8, 128], strides = [1, 1]} : vector<8x384xf32> to vector<8x128xf32>
    %107 = arith.mulf %106, %98 : vector<8x128xf32>
    %108 = arith.addf %105, %107 : vector<8x128xf32>
    %109 = vector.extract_strided_slice %79 {offsets = [0, 256], sizes = [8, 128], strides = [1, 1]} : vector<8x384xf32> to vector<8x128xf32>
    %110 = math.tanh %103 : vector<8x128xf32>
    %111 = arith.mulf %109, %110 : vector<8x128xf32>
    %112 = vector.extract_strided_slice %88 {offsets = [0, 256], sizes = [8, 128], strides = [1, 1]} : vector<8x384xf32> to vector<8x128xf32>
    %113 = math.tanh %108 : vector<8x128xf32>
    %114 = arith.mulf %112, %113 : vector<8x128xf32>
    %115 = arith.index_cast %66 : i32 to index
    %c0_27 = arith.constant 0 : index
    %116 = vector.load %arg9[%115, %c0_27] : memref<64x256xf32, #tpu.memory_space<vmem>>, vector<8x128xf32>
    tpu.vector_store %arg9[%115, %c0_27], %111 {strides = array<i32>} : memref<64x256xf32, #tpu.memory_space<vmem>>, vector<8x128xf32>,
    %117 = arith.index_cast %69 : i32 to index
    %c128_28 = arith.constant 128 : index
    %118 = vector.load %arg9[%117, %c128_28] : memref<64x256xf32, #tpu.memory_space<vmem>>, vector<8x128xf32>
    tpu.vector_store %arg9[%117, %c128_28], %114 {strides = array<i32>} : memref<64x256xf32, #tpu.memory_space<vmem>>, vector<8x128xf32>,
    %119 = tpu.concatenate %111, %114 in 1 : vector<8x128xf32>, vector<8x128xf32> -> vector<8x256xf32>
    %c2_i32 = arith.constant 2 : i32
    %c8_i32_29 = arith.constant 8 : i32
    %120 = arith.muli %c2_i32, %c8_i32_29 : i32
    %121 = tpu.assume_multiple %120, 8 : i32
    %c7_i32_30 = arith.constant 7 : i32
    %122 = arith.subi %c7_i32_30, %c2_i32 : i32
    %c8_i32_31 = arith.constant 8 : i32
    %123 = arith.muli %122, %c8_i32_31 : i32
    %124 = tpu.assume_multiple %123, 8 : i32
    %cst_32 = arith.constant dense<0.000000e+00> : vector<8x1024xf32>
    %125 = tpu.matmul %119, %7, %cst_32 {dimension_numbers = #tpu.dot_dimension_numbers<[1], [0], [0], [1], [0, 0, 1, 1], [], []>} : vector<8x256xf32>, vector<256x1024xf32>, vector<8x1024xf32> -> vector<8x1024xf32>
    %126 = arith.index_cast %121 : i32 to index
    %c0_33 = arith.constant 0 : index
    %127 = vector.load %arg8[%126, %c0_33] : memref<64x1024xf32, #tpu.memory_space<vmem>>, vector<8x384xf32>
    %128 = vector.extract_strided_slice %125 {offsets = [0, 0], sizes = [8, 384], strides = [1, 1]} : vector<8x1024xf32> to vector<8x384xf32>
    %129 = arith.addf %127, %128 : vector<8x384xf32>
    %130 = arith.negf %129 : vector<8x384xf32>
    %131 = math.exp %130 : vector<8x384xf32>
    %cst_34 = arith.constant 1.000000e+00 : f32
    %132 = vector.broadcast %cst_34 : f32 to vector<8x384xf32>
    %133 = arith.addf %132, %131 : vector<8x384xf32>
    %134 = arith.divf %132, %133 : vector<8x384xf32>
    %135 = arith.index_cast %124 : i32 to index
    %c384_35 = arith.constant 384 : index
    %136 = vector.load %arg8[%135, %c384_35] : memref<64x1024xf32, #tpu.memory_space<vmem>>, vector<8x384xf32>
    %137 = vector.extract_strided_slice %125 {offsets = [0, 384], sizes = [8, 384], strides = [1, 1]} : vector<8x1024xf32> to vector<8x384xf32>
    %138 = arith.addf %136, %137 : vector<8x384xf32>
    %139 = arith.negf %138 : vector<8x384xf32>
    %140 = math.exp %139 : vector<8x384xf32>
    %cst_36 = arith.constant 1.000000e+00 : f32
    %141 = vector.broadcast %cst_36 : f32 to vector<8x384xf32>
    %142 = arith.addf %141, %140 : vector<8x384xf32>
    %143 = arith.divf %141, %142 : vector<8x384xf32>
    %144 = arith.index_cast %121 : i32 to index
    %c768_37 = arith.constant 768 : index
    %145 = vector.load %arg8[%144, %c768_37] : memref<64x1024xf32, #tpu.memory_space<vmem>>, vector<8x128xf32>
    %146 = vector.extract_strided_slice %125 {offsets = [0, 768], sizes = [8, 128], strides = [1, 1]} : vector<8x1024xf32> to vector<8x128xf32>
    %147 = arith.addf %145, %146 : vector<8x128xf32>
    %148 = math.tanh %147 : vector<8x128xf32>
    %149 = arith.index_cast %124 : i32 to index
    %c896_38 = arith.constant 896 : index
    %150 = vector.load %arg8[%149, %c896_38] : memref<64x1024xf32, #tpu.memory_space<vmem>>, vector<8x128xf32>
    %151 = vector.extract_strided_slice %125 {offsets = [0, 896], sizes = [8, 128], strides = [1, 1]} : vector<8x1024xf32> to vector<8x128xf32>
    %152 = arith.addf %150, %151 : vector<8x128xf32>
    %153 = math.tanh %152 : vector<8x128xf32>
    %154 = vector.extract_strided_slice %134 {offsets = [0, 128], sizes = [8, 128], strides = [1, 1]} : vector<8x384xf32> to vector<8x128xf32>
    %155 = arith.mulf %154, %103 : vector<8x128xf32>
    %156 = vector.extract_strided_slice %134 {offsets = [0, 0], sizes = [8, 128], strides = [1, 1]} : vector<8x384xf32> to vector<8x128xf32>
    %157 = arith.mulf %156, %148 : vector<8x128xf32>
    %158 = arith.addf %155, %157 : vector<8x128xf32>
    %159 = vector.extract_strided_slice %143 {offsets = [0, 128], sizes = [8, 128], strides = [1, 1]} : vector<8x384xf32> to vector<8x128xf32>
    %160 = arith.mulf %159, %108 : vector<8x128xf32>
    %161 = vector.extract_strided_slice %143 {offsets = [0, 0], sizes = [8, 128], strides = [1, 1]} : vector<8x384xf32> to vector<8x128xf32>
    %162 = arith.mulf %161, %153 : vector<8x128xf32>
    %163 = arith.addf %160, %162 : vector<8x128xf32>
    %164 = vector.extract_strided_slice %134 {offsets = [0, 256], sizes = [8, 128], strides = [1, 1]} : vector<8x384xf32> to vector<8x128xf32>
    %165 = math.tanh %158 : vector<8x128xf32>
    %166 = arith.mulf %164, %165 : vector<8x128xf32>
    %167 = vector.extract_strided_slice %143 {offsets = [0, 256], sizes = [8, 128], strides = [1, 1]} : vector<8x384xf32> to vector<8x128xf32>
    %168 = math.tanh %163 : vector<8x128xf32>
    %169 = arith.mulf %167, %168 : vector<8x128xf32>
    %170 = arith.index_cast %121 : i32 to index
    %c0_39 = arith.constant 0 : index
    %171 = vector.load %arg9[%170, %c0_39] : memref<64x256xf32, #tpu.memory_space<vmem>>, vector<8x128xf32>
    tpu.vector_store %arg9[%170, %c0_39], %166 {strides = array<i32>} : memref<64x256xf32, #tpu.memory_space<vmem>>, vector<8x128xf32>,
    %172 = arith.index_cast %124 : i32 to index
    %c128_40 = arith.constant 128 : index
    %173 = vector.load %arg9[%172, %c128_40] : memref<64x256xf32, #tpu.memory_space<vmem>>, vector<8x128xf32>
    tpu.vector_store %arg9[%172, %c128_40], %169 {strides = array<i32>} : memref<64x256xf32, #tpu.memory_space<vmem>>, vector<8x128xf32>,
    %174 = tpu.concatenate %166, %169 in 1 : vector<8x128xf32>, vector<8x128xf32> -> vector<8x256xf32>
    %c3_i32 = arith.constant 3 : i32
    %c8_i32_41 = arith.constant 8 : i32
    %175 = arith.muli %c3_i32, %c8_i32_41 : i32
    %176 = tpu.assume_multiple %175, 8 : i32
    %c7_i32_42 = arith.constant 7 : i32
    %177 = arith.subi %c7_i32_42, %c3_i32 : i32
    %c8_i32_43 = arith.constant 8 : i32
    %178 = arith.muli %177, %c8_i32_43 : i32
    %179 = tpu.assume_multiple %178, 8 : i32
    %cst_44 = arith.constant dense<0.000000e+00> : vector<8x1024xf32>
    %180 = tpu.matmul %174, %7, %cst_44 {dimension_numbers = #tpu.dot_dimension_numbers<[1], [0], [0], [1], [0, 0, 1, 1], [], []>} : vector<8x256xf32>, vector<256x1024xf32>, vector<8x1024xf32> -> vector<8x1024xf32>
    %181 = arith.index_cast %176 : i32 to index
    %c0_45 = arith.constant 0 : index
    %182 = vector.load %arg8[%181, %c0_45] : memref<64x1024xf32, #tpu.memory_space<vmem>>, vector<8x384xf32>
    %183 = vector.extract_strided_slice %180 {offsets = [0, 0], sizes = [8, 384], strides = [1, 1]} : vector<8x1024xf32> to vector<8x384xf32>
    %184 = arith.addf %182, %183 : vector<8x384xf32>
    %185 = arith.negf %184 : vector<8x384xf32>
    %186 = math.exp %185 : vector<8x384xf32>
    %cst_46 = arith.constant 1.000000e+00 : f32
    %187 = vector.broadcast %cst_46 : f32 to vector<8x384xf32>
    %188 = arith.addf %187, %186 : vector<8x384xf32>
    %189 = arith.divf %187, %188 : vector<8x384xf32>
    %190 = arith.index_cast %179 : i32 to index
    %c384_47 = arith.constant 384 : index
    %191 = vector.load %arg8[%190, %c384_47] : memref<64x1024xf32, #tpu.memory_space<vmem>>, vector<8x384xf32>
    %192 = vector.extract_strided_slice %180 {offsets = [0, 384], sizes = [8, 384], strides = [1, 1]} : vector<8x1024xf32> to vector<8x384xf32>
    %193 = arith.addf %191, %192 : vector<8x384xf32>
    %194 = arith.negf %193 : vector<8x384xf32>
    %195 = math.exp %194 : vector<8x384xf32>
    %cst_48 = arith.constant 1.000000e+00 : f32
    %196 = vector.broadcast %cst_48 : f32 to vector<8x384xf32>
    %197 = arith.addf %196, %195 : vector<8x384xf32>
    %198 = arith.divf %196, %197 : vector<8x384xf32>
    %199 = arith.index_cast %176 : i32 to index
    %c768_49 = arith.constant 768 : index
    %200 = vector.load %arg8[%199, %c768_49] : memref<64x1024xf32, #tpu.memory_space<vmem>>, vector<8x128xf32>
    %201 = vector.extract_strided_slice %180 {offsets = [0, 768], sizes = [8, 128], strides = [1, 1]} : vector<8x1024xf32> to vector<8x128xf32>
    %202 = arith.addf %200, %201 : vector<8x128xf32>
    %203 = math.tanh %202 : vector<8x128xf32>
    %204 = arith.index_cast %179 : i32 to index
    %c896_50 = arith.constant 896 : index
    %205 = vector.load %arg8[%204, %c896_50] : memref<64x1024xf32, #tpu.memory_space<vmem>>, vector<8x128xf32>
    %206 = vector.extract_strided_slice %180 {offsets = [0, 896], sizes = [8, 128], strides = [1, 1]} : vector<8x1024xf32> to vector<8x128xf32>
    %207 = arith.addf %205, %206 : vector<8x128xf32>
    %208 = math.tanh %207 : vector<8x128xf32>
    %209 = vector.extract_strided_slice %189 {offsets = [0, 128], sizes = [8, 128], strides = [1, 1]} : vector<8x384xf32> to vector<8x128xf32>
    %210 = arith.mulf %209, %158 : vector<8x128xf32>
    %211 = vector.extract_strided_slice %189 {offsets = [0, 0], sizes = [8, 128], strides = [1, 1]} : vector<8x384xf32> to vector<8x128xf32>
    %212 = arith.mulf %211, %203 : vector<8x128xf32>
    %213 = arith.addf %210, %212 : vector<8x128xf32>
    %214 = vector.extract_strided_slice %198 {offsets = [0, 128], sizes = [8, 128], strides = [1, 1]} : vector<8x384xf32> to vector<8x128xf32>
    %215 = arith.mulf %214, %163 : vector<8x128xf32>
    %216 = vector.extract_strided_slice %198 {offsets = [0, 0], sizes = [8, 128], strides = [1, 1]} : vector<8x384xf32> to vector<8x128xf32>
    %217 = arith.mulf %216, %208 : vector<8x128xf32>
    %218 = arith.addf %215, %217 : vector<8x128xf32>
    %219 = vector.extract_strided_slice %189 {offsets = [0, 256], sizes = [8, 128], strides = [1, 1]} : vector<8x384xf32> to vector<8x128xf32>
    %220 = math.tanh %213 : vector<8x128xf32>
    %221 = arith.mulf %219, %220 : vector<8x128xf32>
    %222 = vector.extract_strided_slice %198 {offsets = [0, 256], sizes = [8, 128], strides = [1, 1]} : vector<8x384xf32> to vector<8x128xf32>
    %223 = math.tanh %218 : vector<8x128xf32>
    %224 = arith.mulf %222, %223 : vector<8x128xf32>
    %225 = arith.index_cast %176 : i32 to index
    %c0_51 = arith.constant 0 : index
    %226 = vector.load %arg9[%225, %c0_51] : memref<64x256xf32, #tpu.memory_space<vmem>>, vector<8x128xf32>
    tpu.vector_store %arg9[%225, %c0_51], %221 {strides = array<i32>} : memref<64x256xf32, #tpu.memory_space<vmem>>, vector<8x128xf32>,
    %227 = arith.index_cast %179 : i32 to index
    %c128_52 = arith.constant 128 : index
    %228 = vector.load %arg9[%227, %c128_52] : memref<64x256xf32, #tpu.memory_space<vmem>>, vector<8x128xf32>
    tpu.vector_store %arg9[%227, %c128_52], %224 {strides = array<i32>} : memref<64x256xf32, #tpu.memory_space<vmem>>, vector<8x128xf32>,
    %229 = tpu.concatenate %221, %224 in 1 : vector<8x128xf32>, vector<8x128xf32> -> vector<8x256xf32>
    %c4_i32 = arith.constant 4 : i32
    %c8_i32_53 = arith.constant 8 : i32
    %230 = arith.muli %c4_i32, %c8_i32_53 : i32
    %231 = tpu.assume_multiple %230, 8 : i32
    %c7_i32_54 = arith.constant 7 : i32
    %232 = arith.subi %c7_i32_54, %c4_i32 : i32
    %c8_i32_55 = arith.constant 8 : i32
    %233 = arith.muli %232, %c8_i32_55 : i32
    %234 = tpu.assume_multiple %233, 8 : i32
    %cst_56 = arith.constant dense<0.000000e+00> : vector<8x1024xf32>
    %235 = tpu.matmul %229, %7, %cst_56 {dimension_numbers = #tpu.dot_dimension_numbers<[1], [0], [0], [1], [0, 0, 1, 1], [], []>} : vector<8x256xf32>, vector<256x1024xf32>, vector<8x1024xf32> -> vector<8x1024xf32>
    %236 = arith.index_cast %231 : i32 to index
    %c0_57 = arith.constant 0 : index
    %237 = vector.load %arg8[%236, %c0_57] : memref<64x1024xf32, #tpu.memory_space<vmem>>, vector<8x384xf32>
    %238 = vector.extract_strided_slice %235 {offsets = [0, 0], sizes = [8, 384], strides = [1, 1]} : vector<8x1024xf32> to vector<8x384xf32>
    %239 = arith.addf %237, %238 : vector<8x384xf32>
    %240 = arith.negf %239 : vector<8x384xf32>
    %241 = math.exp %240 : vector<8x384xf32>
    %cst_58 = arith.constant 1.000000e+00 : f32
    %242 = vector.broadcast %cst_58 : f32 to vector<8x384xf32>
    %243 = arith.addf %242, %241 : vector<8x384xf32>
    %244 = arith.divf %242, %243 : vector<8x384xf32>
    %245 = arith.index_cast %234 : i32 to index
    %c384_59 = arith.constant 384 : index
    %246 = vector.load %arg8[%245, %c384_59] : memref<64x1024xf32, #tpu.memory_space<vmem>>, vector<8x384xf32>
    %247 = vector.extract_strided_slice %235 {offsets = [0, 384], sizes = [8, 384], strides = [1, 1]} : vector<8x1024xf32> to vector<8x384xf32>
    %248 = arith.addf %246, %247 : vector<8x384xf32>
    %249 = arith.negf %248 : vector<8x384xf32>
    %250 = math.exp %249 : vector<8x384xf32>
    %cst_60 = arith.constant 1.000000e+00 : f32
    %251 = vector.broadcast %cst_60 : f32 to vector<8x384xf32>
    %252 = arith.addf %251, %250 : vector<8x384xf32>
    %253 = arith.divf %251, %252 : vector<8x384xf32>
    %254 = arith.index_cast %231 : i32 to index
    %c768_61 = arith.constant 768 : index
    %255 = vector.load %arg8[%254, %c768_61] : memref<64x1024xf32, #tpu.memory_space<vmem>>, vector<8x128xf32>
    %256 = vector.extract_strided_slice %235 {offsets = [0, 768], sizes = [8, 128], strides = [1, 1]} : vector<8x1024xf32> to vector<8x128xf32>
    %257 = arith.addf %255, %256 : vector<8x128xf32>
    %258 = math.tanh %257 : vector<8x128xf32>
    %259 = arith.index_cast %234 : i32 to index
    %c896_62 = arith.constant 896 : index
    %260 = vector.load %arg8[%259, %c896_62] : memref<64x1024xf32, #tpu.memory_space<vmem>>, vector<8x128xf32>
    %261 = vector.extract_strided_slice %235 {offsets = [0, 896], sizes = [8, 128], strides = [1, 1]} : vector<8x1024xf32> to vector<8x128xf32>
    %262 = arith.addf %260, %261 : vector<8x128xf32>
    %263 = math.tanh %262 : vector<8x128xf32>
    %264 = vector.extract_strided_slice %244 {offsets = [0, 128], sizes = [8, 128], strides = [1, 1]} : vector<8x384xf32> to vector<8x128xf32>
    %265 = arith.mulf %264, %213 : vector<8x128xf32>
    %266 = vector.extract_strided_slice %244 {offsets = [0, 0], sizes = [8, 128], strides = [1, 1]} : vector<8x384xf32> to vector<8x128xf32>
    %267 = arith.mulf %266, %258 : vector<8x128xf32>
    %268 = arith.addf %265, %267 : vector<8x128xf32>
    %269 = vector.extract_strided_slice %253 {offsets = [0, 128], sizes = [8, 128], strides = [1, 1]} : vector<8x384xf32> to vector<8x128xf32>
    %270 = arith.mulf %269, %218 : vector<8x128xf32>
    %271 = vector.extract_strided_slice %253 {offsets = [0, 0], sizes = [8, 128], strides = [1, 1]} : vector<8x384xf32> to vector<8x128xf32>
    %272 = arith.mulf %271, %263 : vector<8x128xf32>
    %273 = arith.addf %270, %272 : vector<8x128xf32>
    %274 = vector.extract_strided_slice %244 {offsets = [0, 256], sizes = [8, 128], strides = [1, 1]} : vector<8x384xf32> to vector<8x128xf32>
    %275 = math.tanh %268 : vector<8x128xf32>
    %276 = arith.mulf %274, %275 : vector<8x128xf32>
    %277 = vector.extract_strided_slice %253 {offsets = [0, 256], sizes = [8, 128], strides = [1, 1]} : vector<8x384xf32> to vector<8x128xf32>
    %278 = math.tanh %273 : vector<8x128xf32>
    %279 = arith.mulf %277, %278 : vector<8x128xf32>
    %280 = arith.index_cast %231 : i32 to index
    %c0_63 = arith.constant 0 : index
    %281 = vector.load %arg9[%280, %c0_63] : memref<64x256xf32, #tpu.memory_space<vmem>>, vector<8x128xf32>
    tpu.vector_store %arg9[%280, %c0_63], %276 {strides = array<i32>} : memref<64x256xf32, #tpu.memory_space<vmem>>, vector<8x128xf32>,
    %282 = arith.index_cast %234 : i32 to index
    %c128_64 = arith.constant 128 : index
    %283 = vector.load %arg9[%282, %c128_64] : memref<64x256xf32, #tpu.memory_space<vmem>>, vector<8x128xf32>
    tpu.vector_store %arg9[%282, %c128_64], %279 {strides = array<i32>} : memref<64x256xf32, #tpu.memory_space<vmem>>, vector<8x128xf32>,
    %284 = tpu.concatenate %276, %279 in 1 : vector<8x128xf32>, vector<8x128xf32> -> vector<8x256xf32>
    %c5_i32 = arith.constant 5 : i32
    %c8_i32_65 = arith.constant 8 : i32
    %285 = arith.muli %c5_i32, %c8_i32_65 : i32
    %286 = tpu.assume_multiple %285, 8 : i32
    %c7_i32_66 = arith.constant 7 : i32
    %287 = arith.subi %c7_i32_66, %c5_i32 : i32
    %c8_i32_67 = arith.constant 8 : i32
    %288 = arith.muli %287, %c8_i32_67 : i32
    %289 = tpu.assume_multiple %288, 8 : i32
    %cst_68 = arith.constant dense<0.000000e+00> : vector<8x1024xf32>
    %290 = tpu.matmul %284, %7, %cst_68 {dimension_numbers = #tpu.dot_dimension_numbers<[1], [0], [0], [1], [0, 0, 1, 1], [], []>} : vector<8x256xf32>, vector<256x1024xf32>, vector<8x1024xf32> -> vector<8x1024xf32>
    %291 = arith.index_cast %286 : i32 to index
    %c0_69 = arith.constant 0 : index
    %292 = vector.load %arg8[%291, %c0_69] : memref<64x1024xf32, #tpu.memory_space<vmem>>, vector<8x384xf32>
    %293 = vector.extract_strided_slice %290 {offsets = [0, 0], sizes = [8, 384], strides = [1, 1]} : vector<8x1024xf32> to vector<8x384xf32>
    %294 = arith.addf %292, %293 : vector<8x384xf32>
    %295 = arith.negf %294 : vector<8x384xf32>
    %296 = math.exp %295 : vector<8x384xf32>
    %cst_70 = arith.constant 1.000000e+00 : f32
    %297 = vector.broadcast %cst_70 : f32 to vector<8x384xf32>
    %298 = arith.addf %297, %296 : vector<8x384xf32>
    %299 = arith.divf %297, %298 : vector<8x384xf32>
    %300 = arith.index_cast %289 : i32 to index
    %c384_71 = arith.constant 384 : index
    %301 = vector.load %arg8[%300, %c384_71] : memref<64x1024xf32, #tpu.memory_space<vmem>>, vector<8x384xf32>
    %302 = vector.extract_strided_slice %290 {offsets = [0, 384], sizes = [8, 384], strides = [1, 1]} : vector<8x1024xf32> to vector<8x384xf32>
    %303 = arith.addf %301, %302 : vector<8x384xf32>
    %304 = arith.negf %303 : vector<8x384xf32>
    %305 = math.exp %304 : vector<8x384xf32>
    %cst_72 = arith.constant 1.000000e+00 : f32
    %306 = vector.broadcast %cst_72 : f32 to vector<8x384xf32>
    %307 = arith.addf %306, %305 : vector<8x384xf32>
    %308 = arith.divf %306, %307 : vector<8x384xf32>
    %309 = arith.index_cast %286 : i32 to index
    %c768_73 = arith.constant 768 : index
    %310 = vector.load %arg8[%309, %c768_73] : memref<64x1024xf32, #tpu.memory_space<vmem>>, vector<8x128xf32>
    %311 = vector.extract_strided_slice %290 {offsets = [0, 768], sizes = [8, 128], strides = [1, 1]} : vector<8x1024xf32> to vector<8x128xf32>
    %312 = arith.addf %310, %311 : vector<8x128xf32>
    %313 = math.tanh %312 : vector<8x128xf32>
    %314 = arith.index_cast %289 : i32 to index
    %c896_74 = arith.constant 896 : index
    %315 = vector.load %arg8[%314, %c896_74] : memref<64x1024xf32, #tpu.memory_space<vmem>>, vector<8x128xf32>
    %316 = vector.extract_strided_slice %290 {offsets = [0, 896], sizes = [8, 128], strides = [1, 1]} : vector<8x1024xf32> to vector<8x128xf32>
    %317 = arith.addf %315, %316 : vector<8x128xf32>
    %318 = math.tanh %317 : vector<8x128xf32>
    %319 = vector.extract_strided_slice %299 {offsets = [0, 128], sizes = [8, 128], strides = [1, 1]} : vector<8x384xf32> to vector<8x128xf32>
    %320 = arith.mulf %319, %268 : vector<8x128xf32>
    %321 = vector.extract_strided_slice %299 {offsets = [0, 0], sizes = [8, 128], strides = [1, 1]} : vector<8x384xf32> to vector<8x128xf32>
    %322 = arith.mulf %321, %313 : vector<8x128xf32>
    %323 = arith.addf %320, %322 : vector<8x128xf32>
    %324 = vector.extract_strided_slice %308 {offsets = [0, 128], sizes = [8, 128], strides = [1, 1]} : vector<8x384xf32> to vector<8x128xf32>
    %325 = arith.mulf %324, %273 : vector<8x128xf32>
    %326 = vector.extract_strided_slice %308 {offsets = [0, 0], sizes = [8, 128], strides = [1, 1]} : vector<8x384xf32> to vector<8x128xf32>
    %327 = arith.mulf %326, %318 : vector<8x128xf32>
    %328 = arith.addf %325, %327 : vector<8x128xf32>
    %329 = vector.extract_strided_slice %299 {offsets = [0, 256], sizes = [8, 128], strides = [1, 1]} : vector<8x384xf32> to vector<8x128xf32>
    %330 = math.tanh %323 : vector<8x128xf32>
    %331 = arith.mulf %329, %330 : vector<8x128xf32>
    %332 = vector.extract_strided_slice %308 {offsets = [0, 256], sizes = [8, 128], strides = [1, 1]} : vector<8x384xf32> to vector<8x128xf32>
    %333 = math.tanh %328 : vector<8x128xf32>
    %334 = arith.mulf %332, %333 : vector<8x128xf32>
    %335 = arith.index_cast %286 : i32 to index
    %c0_75 = arith.constant 0 : index
    %336 = vector.load %arg9[%335, %c0_75] : memref<64x256xf32, #tpu.memory_space<vmem>>, vector<8x128xf32>
    tpu.vector_store %arg9[%335, %c0_75], %331 {strides = array<i32>} : memref<64x256xf32, #tpu.memory_space<vmem>>, vector<8x128xf32>,
    %337 = arith.index_cast %289 : i32 to index
    %c128_76 = arith.constant 128 : index
    %338 = vector.load %arg9[%337, %c128_76] : memref<64x256xf32, #tpu.memory_space<vmem>>, vector<8x128xf32>
    tpu.vector_store %arg9[%337, %c128_76], %334 {strides = array<i32>} : memref<64x256xf32, #tpu.memory_space<vmem>>, vector<8x128xf32>,
    %339 = tpu.concatenate %331, %334 in 1 : vector<8x128xf32>, vector<8x128xf32> -> vector<8x256xf32>
    %c6_i32 = arith.constant 6 : i32
    %c8_i32_77 = arith.constant 8 : i32
    %340 = arith.muli %c6_i32, %c8_i32_77 : i32
    %341 = tpu.assume_multiple %340, 8 : i32
    %c7_i32_78 = arith.constant 7 : i32
    %342 = arith.subi %c7_i32_78, %c6_i32 : i32
    %c8_i32_79 = arith.constant 8 : i32
    %343 = arith.muli %342, %c8_i32_79 : i32
    %344 = tpu.assume_multiple %343, 8 : i32
    %cst_80 = arith.constant dense<0.000000e+00> : vector<8x1024xf32>
    %345 = tpu.matmul %339, %7, %cst_80 {dimension_numbers = #tpu.dot_dimension_numbers<[1], [0], [0], [1], [0, 0, 1, 1], [], []>} : vector<8x256xf32>, vector<256x1024xf32>, vector<8x1024xf32> -> vector<8x1024xf32>
    %346 = arith.index_cast %341 : i32 to index
    %c0_81 = arith.constant 0 : index
    %347 = vector.load %arg8[%346, %c0_81] : memref<64x1024xf32, #tpu.memory_space<vmem>>, vector<8x384xf32>
    %348 = vector.extract_strided_slice %345 {offsets = [0, 0], sizes = [8, 384], strides = [1, 1]} : vector<8x1024xf32> to vector<8x384xf32>
    %349 = arith.addf %347, %348 : vector<8x384xf32>
    %350 = arith.negf %349 : vector<8x384xf32>
    %351 = math.exp %350 : vector<8x384xf32>
    %cst_82 = arith.constant 1.000000e+00 : f32
    %352 = vector.broadcast %cst_82 : f32 to vector<8x384xf32>
    %353 = arith.addf %352, %351 : vector<8x384xf32>
    %354 = arith.divf %352, %353 : vector<8x384xf32>
    %355 = arith.index_cast %344 : i32 to index
    %c384_83 = arith.constant 384 : index
    %356 = vector.load %arg8[%355, %c384_83] : memref<64x1024xf32, #tpu.memory_space<vmem>>, vector<8x384xf32>
    %357 = vector.extract_strided_slice %345 {offsets = [0, 384], sizes = [8, 384], strides = [1, 1]} : vector<8x1024xf32> to vector<8x384xf32>
    %358 = arith.addf %356, %357 : vector<8x384xf32>
    %359 = arith.negf %358 : vector<8x384xf32>
    %360 = math.exp %359 : vector<8x384xf32>
    %cst_84 = arith.constant 1.000000e+00 : f32
    %361 = vector.broadcast %cst_84 : f32 to vector<8x384xf32>
    %362 = arith.addf %361, %360 : vector<8x384xf32>
    %363 = arith.divf %361, %362 : vector<8x384xf32>
    %364 = arith.index_cast %341 : i32 to index
    %c768_85 = arith.constant 768 : index
    %365 = vector.load %arg8[%364, %c768_85] : memref<64x1024xf32, #tpu.memory_space<vmem>>, vector<8x128xf32>
    %366 = vector.extract_strided_slice %345 {offsets = [0, 768], sizes = [8, 128], strides = [1, 1]} : vector<8x1024xf32> to vector<8x128xf32>
    %367 = arith.addf %365, %366 : vector<8x128xf32>
    %368 = math.tanh %367 : vector<8x128xf32>
    %369 = arith.index_cast %344 : i32 to index
    %c896_86 = arith.constant 896 : index
    %370 = vector.load %arg8[%369, %c896_86] : memref<64x1024xf32, #tpu.memory_space<vmem>>, vector<8x128xf32>
    %371 = vector.extract_strided_slice %345 {offsets = [0, 896], sizes = [8, 128], strides = [1, 1]} : vector<8x1024xf32> to vector<8x128xf32>
    %372 = arith.addf %370, %371 : vector<8x128xf32>
    %373 = math.tanh %372 : vector<8x128xf32>
    %374 = vector.extract_strided_slice %354 {offsets = [0, 128], sizes = [8, 128], strides = [1, 1]} : vector<8x384xf32> to vector<8x128xf32>
    %375 = arith.mulf %374, %323 : vector<8x128xf32>
    %376 = vector.extract_strided_slice %354 {offsets = [0, 0], sizes = [8, 128], strides = [1, 1]} : vector<8x384xf32> to vector<8x128xf32>
    %377 = arith.mulf %376, %368 : vector<8x128xf32>
    %378 = arith.addf %375, %377 : vector<8x128xf32>
    %379 = vector.extract_strided_slice %363 {offsets = [0, 128], sizes = [8, 128], strides = [1, 1]} : vector<8x384xf32> to vector<8x128xf32>
    %380 = arith.mulf %379, %328 : vector<8x128xf32>
    %381 = vector.extract_strided_slice %363 {offsets = [0, 0], sizes = [8, 128], strides = [1, 1]} : vector<8x384xf32> to vector<8x128xf32>
    %382 = arith.mulf %381, %373 : vector<8x128xf32>
    %383 = arith.addf %380, %382 : vector<8x128xf32>
    %384 = vector.extract_strided_slice %354 {offsets = [0, 256], sizes = [8, 128], strides = [1, 1]} : vector<8x384xf32> to vector<8x128xf32>
    %385 = math.tanh %378 : vector<8x128xf32>
    %386 = arith.mulf %384, %385 : vector<8x128xf32>
    %387 = vector.extract_strided_slice %363 {offsets = [0, 256], sizes = [8, 128], strides = [1, 1]} : vector<8x384xf32> to vector<8x128xf32>
    %388 = math.tanh %383 : vector<8x128xf32>
    %389 = arith.mulf %387, %388 : vector<8x128xf32>
    %390 = arith.index_cast %341 : i32 to index
    %c0_87 = arith.constant 0 : index
    %391 = vector.load %arg9[%390, %c0_87] : memref<64x256xf32, #tpu.memory_space<vmem>>, vector<8x128xf32>
    tpu.vector_store %arg9[%390, %c0_87], %386 {strides = array<i32>} : memref<64x256xf32, #tpu.memory_space<vmem>>, vector<8x128xf32>,
    %392 = arith.index_cast %344 : i32 to index
    %c128_88 = arith.constant 128 : index
    %393 = vector.load %arg9[%392, %c128_88] : memref<64x256xf32, #tpu.memory_space<vmem>>, vector<8x128xf32>
    tpu.vector_store %arg9[%392, %c128_88], %389 {strides = array<i32>} : memref<64x256xf32, #tpu.memory_space<vmem>>, vector<8x128xf32>,
    %394 = tpu.concatenate %386, %389 in 1 : vector<8x128xf32>, vector<8x128xf32> -> vector<8x256xf32>
    %c7_i32_89 = arith.constant 7 : i32
    %c8_i32_90 = arith.constant 8 : i32
    %395 = arith.muli %c7_i32_89, %c8_i32_90 : i32
    %396 = tpu.assume_multiple %395, 8 : i32
    %c7_i32_91 = arith.constant 7 : i32
    %397 = arith.subi %c7_i32_91, %c7_i32_89 : i32
    %c8_i32_92 = arith.constant 8 : i32
    %398 = arith.muli %397, %c8_i32_92 : i32
    %399 = tpu.assume_multiple %398, 8 : i32
    %cst_93 = arith.constant dense<0.000000e+00> : vector<8x1024xf32>
    %400 = tpu.matmul %394, %7, %cst_93 {dimension_numbers = #tpu.dot_dimension_numbers<[1], [0], [0], [1], [0, 0, 1, 1], [], []>} : vector<8x256xf32>, vector<256x1024xf32>, vector<8x1024xf32> -> vector<8x1024xf32>
    %401 = arith.index_cast %396 : i32 to index
    %c0_94 = arith.constant 0 : index
    %402 = vector.load %arg8[%401, %c0_94] : memref<64x1024xf32, #tpu.memory_space<vmem>>, vector<8x384xf32>
    %403 = vector.extract_strided_slice %400 {offsets = [0, 0], sizes = [8, 384], strides = [1, 1]} : vector<8x1024xf32> to vector<8x384xf32>
    %404 = arith.addf %402, %403 : vector<8x384xf32>
    %405 = arith.negf %404 : vector<8x384xf32>
    %406 = math.exp %405 : vector<8x384xf32>
    %cst_95 = arith.constant 1.000000e+00 : f32
    %407 = vector.broadcast %cst_95 : f32 to vector<8x384xf32>
    %408 = arith.addf %407, %406 : vector<8x384xf32>
    %409 = arith.divf %407, %408 : vector<8x384xf32>
    %410 = arith.index_cast %399 : i32 to index
    %c384_96 = arith.constant 384 : index
    %411 = vector.load %arg8[%410, %c384_96] : memref<64x1024xf32, #tpu.memory_space<vmem>>, vector<8x384xf32>
    %412 = vector.extract_strided_slice %400 {offsets = [0, 384], sizes = [8, 384], strides = [1, 1]} : vector<8x1024xf32> to vector<8x384xf32>
    %413 = arith.addf %411, %412 : vector<8x384xf32>
    %414 = arith.negf %413 : vector<8x384xf32>
    %415 = math.exp %414 : vector<8x384xf32>
    %cst_97 = arith.constant 1.000000e+00 : f32
    %416 = vector.broadcast %cst_97 : f32 to vector<8x384xf32>
    %417 = arith.addf %416, %415 : vector<8x384xf32>
    %418 = arith.divf %416, %417 : vector<8x384xf32>
    %419 = arith.index_cast %396 : i32 to index
    %c768_98 = arith.constant 768 : index
    %420 = vector.load %arg8[%419, %c768_98] : memref<64x1024xf32, #tpu.memory_space<vmem>>, vector<8x128xf32>
    %421 = vector.extract_strided_slice %400 {offsets = [0, 768], sizes = [8, 128], strides = [1, 1]} : vector<8x1024xf32> to vector<8x128xf32>
    %422 = arith.addf %420, %421 : vector<8x128xf32>
    %423 = math.tanh %422 : vector<8x128xf32>
    %424 = arith.index_cast %399 : i32 to index
    %c896_99 = arith.constant 896 : index
    %425 = vector.load %arg8[%424, %c896_99] : memref<64x1024xf32, #tpu.memory_space<vmem>>, vector<8x128xf32>
    %426 = vector.extract_strided_slice %400 {offsets = [0, 896], sizes = [8, 128], strides = [1, 1]} : vector<8x1024xf32> to vector<8x128xf32>
    %427 = arith.addf %425, %426 : vector<8x128xf32>
    %428 = math.tanh %427 : vector<8x128xf32>
    %429 = vector.extract_strided_slice %409 {offsets = [0, 128], sizes = [8, 128], strides = [1, 1]} : vector<8x384xf32> to vector<8x128xf32>
    %430 = arith.mulf %429, %378 : vector<8x128xf32>
    %431 = vector.extract_strided_slice %409 {offsets = [0, 0], sizes = [8, 128], strides = [1, 1]} : vector<8x384xf32> to vector<8x128xf32>
    %432 = arith.mulf %431, %423 : vector<8x128xf32>
    %433 = arith.addf %430, %432 : vector<8x128xf32>
    %434 = vector.extract_strided_slice %418 {offsets = [0, 128], sizes = [8, 128], strides = [1, 1]} : vector<8x384xf32> to vector<8x128xf32>
    %435 = arith.mulf %434, %383 : vector<8x128xf32>
    %436 = vector.extract_strided_slice %418 {offsets = [0, 0], sizes = [8, 128], strides = [1, 1]} : vector<8x384xf32> to vector<8x128xf32>
    %437 = arith.mulf %436, %428 : vector<8x128xf32>
    %438 = arith.addf %435, %437 : vector<8x128xf32>
    %439 = vector.extract_strided_slice %409 {offsets = [0, 256], sizes = [8, 128], strides = [1, 1]} : vector<8x384xf32> to vector<8x128xf32>
    %440 = math.tanh %433 : vector<8x128xf32>
    %441 = arith.mulf %439, %440 : vector<8x128xf32>
    %442 = vector.extract_strided_slice %418 {offsets = [0, 256], sizes = [8, 128], strides = [1, 1]} : vector<8x384xf32> to vector<8x128xf32>
    %443 = math.tanh %438 : vector<8x128xf32>
    %444 = arith.mulf %442, %443 : vector<8x128xf32>
    %445 = arith.index_cast %396 : i32 to index
    %c0_100 = arith.constant 0 : index
    %446 = vector.load %arg9[%445, %c0_100] : memref<64x256xf32, #tpu.memory_space<vmem>>, vector<8x128xf32>
    tpu.vector_store %arg9[%445, %c0_100], %441 {strides = array<i32>} : memref<64x256xf32, #tpu.memory_space<vmem>>, vector<8x128xf32>,
    %447 = arith.index_cast %399 : i32 to index
    %c128_101 = arith.constant 128 : index
    %448 = vector.load %arg9[%447, %c128_101] : memref<64x256xf32, #tpu.memory_space<vmem>>, vector<8x128xf32>
    tpu.vector_store %arg9[%447, %c128_101], %444 {strides = array<i32>} : memref<64x256xf32, #tpu.memory_space<vmem>>, vector<8x128xf32>,
    %449 = tpu.concatenate %441, %444 in 1 : vector<8x128xf32>, vector<8x128xf32> -> vector<8x256xf32>
    %c8_i32_102 = arith.constant 8 : i32
    %c0_103 = arith.constant 0 : index
    %c0_104 = arith.constant 0 : index
    %450 = vector.load %arg9[%c0_103, %c0_104] : memref<64x256xf32, #tpu.memory_space<vmem>>, vector<64x256xf32>
    %c0_105 = arith.constant 0 : index
    %c0_106 = arith.constant 0 : index
    %451 = vector.load %arg5[%c0_105, %c0_106] : memref<256x128xf32, #tpu.memory_space<vmem>>, vector<256x128xf32>
    %cst_107 = arith.constant dense<0.000000e+00> : vector<64x128xf32>
    %452 = tpu.matmul %450, %451, %cst_107 {dimension_numbers = #tpu.dot_dimension_numbers<[1], [0], [0], [1], [0, 0, 1, 1], [], []>} : vector<64x256xf32>, vector<256x128xf32>, vector<64x128xf32> -> vector<64x128xf32>
    %c0_108 = arith.constant 0 : index
    %c0_109 = arith.constant 0 : index
    %453 = vector.load %arg6[%c0_108, %c0_109] : memref<1x128xf32, #tpu.memory_space<vmem>>, vector<1x128xf32>
    %454 = vector.broadcast %453 : vector<1x128xf32> to vector<64x128xf32>
    %455 = arith.addf %452, %454 : vector<64x128xf32>
    %cst_110 = arith.constant dense<0xFF800000> : vector<64xf32>
    %456 = vector.multi_reduction <maximumf>, %455, %cst_110 [1] : vector<64x128xf32> to vector<64xf32>
    %457 = vector.shape_cast %456 : vector<64xf32> to vector<64x1xf32>
    %458 = vector.broadcast %457 : vector<64x1xf32> to vector<64x128xf32>
    %459 = arith.subf %455, %458 : vector<64x128xf32>
    %460 = math.exp %459 : vector<64x128xf32>
    %cst_111 = arith.constant dense<0.000000e+00> : vector<64xf32>
    %461 = vector.multi_reduction <add>, %460, %cst_111 [1] : vector<64x128xf32> to vector<64xf32>
    %462 = vector.shape_cast %461 : vector<64xf32> to vector<64x1xf32>
    %463 = tpu.reciprocal %462 {approx = true} : vector<64x1xf32> -> vector<64x1xf32>
    %464 = vector.broadcast %463 : vector<64x1xf32> to vector<64x128xf32>
    %465 = arith.mulf %460, %464 : vector<64x128xf32>
    %c0_112 = arith.constant 0 : index
    %c0_113 = arith.constant 0 : index
    %466 = vector.load %arg7[%c0_112, %c0_113] : memref<64x128xf32, #tpu.memory_space<vmem>>, vector<64x128xf32>
    tpu.vector_store %arg7[%c0_112, %c0_113], %465 {strides = array<i32>} : memref<64x128xf32, #tpu.memory_space<vmem>>, vector<64x128xf32>,
    return
  }
  func.func @transform_0(%arg0: i32) -> (i32, i32) {
    %c0_i32 = arith.constant 0 : i32
    %c0_i32_0 = arith.constant 0 : i32
    %c0_i32_1 = arith.constant 0 : i32
    return %c0_i32, %c0_i32_0 : i32, i32
  }
  func.func @transform_1(%arg0: i32) -> (i32, i32) {
    %c0_i32 = arith.constant 0 : i32
    %c0_i32_0 = arith.constant 0 : i32
    %c0_i32_1 = arith.constant 0 : i32
    return %c0_i32, %c0_i32_0 : i32, i32
  }
  func.func @transform_2(%arg0: i32) -> (i32, i32) {
    %c0_i32 = arith.constant 0 : i32
    %c0_i32_0 = arith.constant 0 : i32
    %c0_i32_1 = arith.constant 0 : i32
    return %c0_i32, %c0_i32_0 : i32, i32
  }
  func.func @transform_3(%arg0: i32) -> (i32, i32) {
    %c0_i32 = arith.constant 0 : i32
    %c0_i32_0 = arith.constant 0 : i32
    %c0_i32_1 = arith.constant 0 : i32
    return %c0_i32, %c0_i32_0 : i32, i32
  }
  func.func @transform_4(%arg0: i32) -> (i32, i32) {
    %c0_i32 = arith.constant 0 : i32
    %c0_i32_0 = arith.constant 0 : i32
    %c0_i32_1 = arith.constant 0 : i32
    return %c0_i32, %c0_i32_0 : i32, i32
  }
  func.func @transform_5(%arg0: i32) -> (i32, i32) {
    %c0_i32 = arith.constant 0 : i32
    %c0_i32_0 = arith.constant 0 : i32
    %c0_i32_1 = arith.constant 0 : i32
    return %c0_i32, %c0_i32_0 : i32, i32
  }
  func.func @transform_6(%arg0: i32) -> (i32, i32) {
    %c0_i32 = arith.constant 0 : i32
    %c0_i32_0 = arith.constant 0 : i32
    %c0_i32_1 = arith.constant 0 : i32
    return %c0_i32, %c0_i32_0 : i32, i32
  }
}

</mosaic_0001>

<bundles_post_ra>
// kernel: bilstm_forward.1
= control target key start
LH: loop header
LB: loop body
LE: loop exit
PB: predicated region body
PF: predicated region fallthrough
CT: control target
= control target key end

     0   :  { %v9491_v3 = vmov 0.0   ;;  %vm105_vm0 = vcmask 261120   ;;  %s9452_s1 = inlined_call_operand.vmem [shape: f32[32,1024], index: 1, kind: input, shape index: {}]   ;;  %s9453_s3 = inlined_call_operand.vmem [shape: f32[256,1024], index: 3, kind: input, shape index: {}]   ;;  %s9454_s0 = inlined_call_operand.vmem [shape: f32[64,32], index: 0, kind: input, shape index: {}]   ;;  %s9455_s2 = inlined_call_operand.vmem [shape: f32[1,1024], index: 2, kind: input, shape index: {}]   ;;  %s9456_s4 = inlined_call_operand.vmem [shape: f32[256,128], index: 4, kind: input, shape index: {}]   ;;  %s9457_s5 = inlined_call_operand.vmem [shape: f32[1,128], index: 5, kind: input, shape index: {}]   ;;  %s9458_s6 = inlined_call_operand.vmem [shape: f32[64,128], index: 6, kind: output, shape index: {}]  }
   0x1   :  { %v32_v0 = vld [vmem:[%s9452_s1 + $0x8] sm:$0xff]  ;;  %194 = vmatprep.mubr.f32.mxu1 %v9491_v3  ;;  %420 = vmatprep.mubr.f32.mxu0 %v9491_v3  ;;  %v31_v6 = vld [vmem:[%s9452_s1] sm:$0xff]  ;;  %v34_v24 = vld [vmem:[%s9452_s1 + $0x18] sm:$0xff] }
   0x2   :  { %v40_v1 = vld [vmem:[%s9452_s1 + $0x48] sm:$0xff]  ;;  %v39_v7 = vld [vmem:[%s9452_s1 + $0x40] sm:$0xff]  ;;  %v42_v26 = vld [vmem:[%s9452_s1 + $0x58] sm:$0xff] }
   0x3   :  { %v36_v2 = vld [vmem:[%s9452_s1 + $0x28] sm:$0xff]  ;;  %v4145_v4 = vpack.c.bf16 %v40_v1, %v32_v0  ;;  %v4147_v9 = vpack.c.bf16 %v39_v7, %v31_v6  ;;  %v35_v10 = vld [vmem:[%s9452_s1 + $0x20] sm:$0xff]  ;;  %v4153_v29 = vpack.c.bf16 %v42_v26, %v34_v24  ;;  %v33_v31 = vld [vmem:[%s9452_s1 + $0x10] sm:$0xff] }
   0x4   :  { %v44_v5 = vld [vmem:[%s9452_s1 + $0x68] sm:$0xff]  ;;  %v43_v11 = vld [vmem:[%s9452_s1 + $0x60] sm:$0xff]  ;;  %v41_v32 = vld [vmem:[%s9452_s1 + $0x50] sm:$0xff] }
   0x5   :  { %v4161_v8 = vpack.c.bf16 %v44_v5, %v36_v2  ;;  %v48_v12 = vld [vmem:[%s9452_s1 + $0x88] sm:$0xff]  ;;  %4146 = vmatprep.subr.bf16.mxu1 %v4145_v4  ;;  %v4163_v13 = vpack.c.bf16 %v43_v11, %v35_v10  ;;  %v47_v19 = vld [vmem:[%s9452_s1 + $0x80] sm:$0xff]  ;;  %v4155_v35 = vpack.c.bf16 %v41_v32, %v33_v31  ;;  %v50_v48 = vld [vmem:[%s9452_s1 + $0x98] sm:$0xff] }
   0x6   :  { %v56_v14 = vld [vmem:[%s9452_s1 + $0xc8] sm:$0xff]  ;;  %4148 = vmatpush1.bf16.msra.mxu1 %v4147_v9  ;;  %v55_v20 = vld [vmem:[%s9452_s1 + $0xc0] sm:$0xff]  ;;  %v58_v52 = vld [vmem:[%s9452_s1 + $0xd8] sm:$0xff] }
   0x7   :  { %v52_v15 = vld [vmem:[%s9452_s1 + $0xa8] sm:$0xff]  ;;  %4162 = vmatprep.subr.bf16.mxu0 %v4161_v8  ;;  %v4149_v17 = vpack.c.bf16 %v56_v14, %v48_v12  ;;  %v51_v21 = vld [vmem:[%s9452_s1 + $0xa0] sm:$0xff]  ;;  %v4151_v22 = vpack.c.bf16 %v55_v20, %v47_v19  ;;  %v4157_v54 = vpack.c.bf16 %v58_v52, %v50_v48  ;;  %v49_v55 = vld [vmem:[%s9452_s1 + $0x90] sm:$0xff] }
   0x8   :  { %v60_v16 = vld [vmem:[%s9452_s1 + $0xe8] sm:$0xff]  ;;  %4164 = vmatpush1.bf16.msra.mxu0 %v4163_v13  ;;  %v59_v23 = vld [vmem:[%s9452_s1 + $0xe0] sm:$0xff]  ;;  %v57_v56 = vld [vmem:[%s9452_s1 + $0xd0] sm:$0xff] }
   0x9   :  { %v4165_v18 = vpack.c.bf16 %v60_v16, %v52_v15  ;;  %4150 = vmatprep.subr.bf16.mxu1 %v4149_v17  ;;  %v4167_v25 = vpack.c.bf16 %v59_v23, %v51_v21  ;;  %v647_v27 = vld [vmem:[%s9453_s3 + $0x8] sm:$0xff]  ;;  %v646_v33 = vld [vmem:[%s9453_s3] sm:$0xff]  ;;  %v6797_v57 = vld [vmem:[%s9454_s0 + $0x10] sm:$0xff]  ;;  %v4159_v58 = vpack.c.bf16 %v57_v56, %v49_v55 }
   0xa   :  { %v655_v28 = vld [vmem:[%s9453_s3 + $0x48] sm:$0xff]  ;;  %4152 = vmatpush1.bf16.msra.mxu1 %v4151_v22  ;;  %v6722_v34 = vld [vmem:[%s9454_s0] sm:$0xff]  ;;  %v6826_v1 = vld [vmem:[%s9454_s0 + $0x18] sm:$0xff] }
   0xb   :  { %4166 = vmatprep.subr.bf16.mxu0 %v4165_v18  ;;  %v6708_v30 = vpack.c.bf16 %v655_v28, %v647_v27  ;;  %v654_v36 = vld [vmem:[%s9453_s3 + $0x40] sm:$0xff]  ;;  %v663_v37 = vld [vmem:[%s9453_s3 + $0x88] sm:$0xff]  ;;  %4154 = vmatprep.subr.bf16.mxu1 %v4153_v29  ;;  %v38_v4 = vld [vmem:[%s9452_s1 + $0x38] sm:$0xff] }
   0xc   :  { %4168 = vmatpush1.bf16.msra.mxu0 %v4167_v25  ;;  %v6730_v38 = vpack.c.bf16 %v654_v36, %v646_v33  ;;  %v671_v39 = vld [vmem:[%s9453_s3 + $0xc8] sm:$0xff]  ;;  %v662_v41 = vld [vmem:[%s9453_s3 + $0x80] sm:$0xff]  ;;  %v46_v5 = vld [vmem:[%s9452_s1 + $0x78] sm:$0xff] }
   0xd   :  { %9709 = vst [vmem:[#allocation4_spill] sm:$0xff] %v6708_v30  ;;  %4178 = vmatprep.subr.bf16.mxu0 %v6708_v30  ;;  %v6736_v40 = vpack.c.bf16 %v671_v39, %v663_v37  ;;  %v670_v42 = vld [vmem:[%s9453_s3 + $0xc0] sm:$0xff]  ;;  %4008 = vmatmul.mubr.msk.f32.vlgmr.msra.gmra.mrb[0].mxu1 %vm105_vm0, %v6722_v34  ;;  %v679_v43 = vld [vmem:[%s9453_s3 + $0x108] sm:$0xff]  ;;  %v4169_v9 = vpack.c.bf16 %v46_v5, %v38_v4  ;;  %v6919_v26 = vld [vmem:[%s9454_s0 + $0x30] sm:$0xff] }
   0xe   :  { %9710 = vst [vmem:[#allocation5_spill] sm:$0xff] %v6730_v38  ;;  %v687_v44 = vld [vmem:[%s9453_s3 + $0x148] sm:$0xff]  ;;  %4156 = vmatpush1.bf16.msra.mxu1 %v4155_v35  ;;  %200 = vmatprep.mubr.f32.mxu1 %v9491_v3  ;;  %v6761_v46 = vpack.c.bf16 %v670_v42, %v662_v41  ;;  %v678_v47 = vld [vmem:[%s9453_s3 + $0x100] sm:$0xff]  ;;  %v6948_v35 = vld [vmem:[%s9454_s0 + $0x38] sm:$0xff] }
   0xf   :  { %9711 = vst [vmem:[#allocation6_spill] sm:$0xff] %v6736_v40  ;;  %4024 = vmatmul.mubr.msk.f32.vlgmr.msra.gmra.mrb[0].mxu0 %vm105_vm0, %v6722_v34  ;;  %v6757_v45 = vld [vmem:[%s9454_s0 + $0x8] sm:$0xff]  ;;  %v6770_v49 = vpack.c.bf16 %v687_v44, %v679_v43  ;;  %v686_v50 = vld [vmem:[%s9453_s3 + $0x140] sm:$0xff]  ;;  %4158 = vmatprep.subr.bf16.mxu1 %v4157_v54  ;;  %v37_v37 = vld [vmem:[%s9452_s1 + $0x30] sm:$0xff] }
  0x10   :  { %4180 = vmatpush1.bf16.msra.mxu0 %v6730_v38  ;;  %9712 = vst [vmem:[#allocation7_spill] sm:$0xff] %v6761_v46  ;;  %v695_v51 = vld [vmem:[%s9453_s3 + $0x188] sm:$0xff]  ;;  %426 = vmatprep.mubr.f32.mxu0 %v9491_v3  ;;  %v6802_v59 = vpack.c.bf16 %v686_v50, %v678_v47  ;;  %v694_v61 = vld [vmem:[%s9453_s3 + $0x180] sm:$0xff]  ;;  %v45_v39 = vld [vmem:[%s9452_s1 + $0x70] sm:$0xff] }
  0x11   :  { %4182 = vmatprep.subr.bf16.mxu0 %v6736_v40  ;;  %9713 = vst [vmem:[#allocation8_spill] sm:$0xff] %v6770_v49  ;;  %4009 = vmatmul.mubr.msk.f32.gmra.mrb[2].mxu1 %vm105_vm0, %v6757_v45  ;;  %v703_v53 = vld [vmem:[%s9453_s3 + $0x1c8] sm:$0xff]  ;;  %v702_v62 = vld [vmem:[%s9453_s3 + $0x1c0] sm:$0xff]  ;;  %v54_v44 = vld [vmem:[%s9452_s1 + $0xb8] sm:$0xff] }
  0x12   :  { %206 = vmatprep.mubr.f32.mxu1 %v9491_v3  ;;  %9714 = vst [vmem:[#allocation9_spill] sm:$0xff] %v6802_v59  ;;  %v6805_v60 = vpack.c.bf16 %v703_v53, %v695_v51  ;;  %4160 = vmatpush1.bf16.msra.mxu1 %v4159_v58  ;;  %v711_v63 = vld [vmem:[%s9453_s3 + $0x208] sm:$0xff]  ;;  %v6831_v2 = vpack.c.bf16 %v702_v62, %v694_v61  ;;  %v710_v7 = vld [vmem:[%s9453_s3 + $0x200] sm:$0xff]  ;;  %v62_v47 = vld [vmem:[%s9452_s1 + $0xf8] sm:$0xff] }
  0x13   :  { %4025 = vmatmul.mubr.msk.f32.gmra.mrb[2].mxu0 %vm105_vm0, %v6757_v45  ;;  %v719_v0 = vld [vmem:[%s9453_s3 + $0x248] sm:$0xff]  ;;  %v718_v8 = vld [vmem:[%s9453_s3 + $0x240] sm:$0xff]  ;;  %4170 = vmatprep.subr.bf16.mxu1 %v4169_v9  ;;  %v4171_v51 = vpack.c.bf16 %v45_v39, %v37_v37  ;;  %v4173_v54 = vpack.c.bf16 %v62_v47, %v54_v44  ;;  %v53_v55 = vld [vmem:[%s9452_s1 + $0xb0] sm:$0xff] }
  0x14   :  { %4184 = vmatpush1.bf16.msra.mxu0 %v6761_v46  ;;  %9715 = vst [vmem:[#allocation10_spill] sm:$0xff] %v6805_v60  ;;  %432 = vmatprep.mubr.f32.mxu0 %v9491_v3  ;;  %9716 = vst [vmem:[#allocation11_spill] sm:$0xff] %v6831_v2  ;;  %v6841_v6 = vpack.c.bf16 %v719_v0, %v711_v63  ;;  %v727_v10 = vld [vmem:[%s9453_s3 + $0x288] sm:$0xff]  ;;  %v6861_v12 = vld [vmem:[%s9454_s0 + $0x20] sm:$0xff]  ;;  %v6864_v13 = vpack.c.bf16 %v718_v8, %v710_v7 }
  0x15   :  { %4186 = vmatprep.subr.bf16.mxu0 %v6770_v49  ;;  %4010 = vmatmul.mubr.msk.f32.gmra.mrb[4].mxu1 %vm105_vm0, %v6797_v57  ;;  %v735_v11 = vld [vmem:[%s9453_s3 + $0x2c8] sm:$0xff]  ;;  %v726_v15 = vld [vmem:[%s9453_s3 + $0x280] sm:$0xff]  ;;  %v61_v56 = vld [vmem:[%s9452_s1 + $0xf0] sm:$0xff] }
  0x16   :  { %212 = vmatprep.mubr.f32.mxu1 %v9491_v3  ;;  %9717 = vst [vmem:[#allocation12_spill] sm:$0xff] %v6841_v6  ;;  %9718 = vst [vmem:[#allocation13_spill] sm:$0xff] %v6864_v13  ;;  %v6867_v14 = vpack.c.bf16 %v735_v11, %v727_v10  ;;  %v734_v16 = vld [vmem:[%s9453_s3 + $0x2c0] sm:$0xff]  ;;  %v743_v17 = vld [vmem:[%s9453_s3 + $0x308] sm:$0xff]  ;;  %v4175_v5 = vpack.c.bf16 %v61_v56, %v53_v55 }
  0x17   :  { %4026 = vmatmul.mubr.msk.f32.gmra.mrb[4].mxu0 %vm105_vm0, %v6797_v57  ;;  %v751_v18 = vld [vmem:[%s9453_s3 + $0x348] sm:$0xff]  ;;  %v6893_v20 = vpack.c.bf16 %v734_v16, %v726_v15  ;;  %v742_v22 = vld [vmem:[%s9453_s3 + $0x300] sm:$0xff]  ;;  %v649_v62 = vld [vmem:[%s9453_s3 + $0x18] sm:$0xff] }
  0x18   :  { %4188 = vmatpush1.bf16.msra.mxu0 %v6802_v59  ;;  %438 = vmatprep.mubr.f32.mxu0 %v9491_v3  ;;  %9719 = vst [vmem:[#allocation14_spill] sm:$0xff] %v6867_v14  ;;  %v6890_v19 = vld [vmem:[%s9454_s0 + $0x28] sm:$0xff]  ;;  %v6896_v21 = vpack.c.bf16 %v751_v18, %v743_v17  ;;  %v750_v23 = vld [vmem:[%s9453_s3 + $0x340] sm:$0xff]  ;;  %v657_v63 = vld [vmem:[%s9453_s3 + $0x58] sm:$0xff] }
  0x19   :  { %4190 = vmatprep.subr.bf16.mxu0 %v6805_v60  ;;  %4011 = vmatmul.mubr.msk.f32.gmra.mrb[6].mxu1 %vm105_vm0, %v6826_v1  ;;  %9720 = vst [vmem:[#allocation15_spill] sm:$0xff] %v6893_v20  ;;  %v759_v24 = vld [vmem:[%s9453_s3 + $0x388] sm:$0xff]  ;;  %v6922_v27 = vpack.c.bf16 %v750_v23, %v742_v22  ;;  %v758_v29 = vld [vmem:[%s9453_s3 + $0x380] sm:$0xff]  ;;  %v7025_v8 = vpack.c.bf16 %v657_v63, %v649_v62 }
  0x1a   :  { %218 = vmatprep.mubr.f32.mxu1 %v9491_v3  ;;  %9721 = vst [vmem:[#allocation16_spill] sm:$0xff] %v6896_v21  ;;  %v767_v25 = vld [vmem:[%s9453_s3 + $0x3c8] sm:$0xff]  ;;  %v766_v31 = vld [vmem:[%s9453_s3 + $0x3c0] sm:$0xff] }
  0x1b   :  { %4027 = vmatmul.mubr.msk.f32.gmra.mrb[6].mxu0 %vm105_vm0, %v6826_v1  ;;  %9722 = vst [vmem:[#allocation17_spill] sm:$0xff] %v6922_v27  ;;  %v6925_v28 = vpack.c.bf16 %v767_v25, %v759_v24  ;;  %v775_v32 = vld [vmem:[%s9453_s3 + $0x408] sm:$0xff]  ;;  %v6951_v36 = vpack.c.bf16 %v766_v31, %v758_v29  ;;  %v774_v41 = vld [vmem:[%s9453_s3 + $0x400] sm:$0xff]  ;;  %9729 = vst [vmem:[#allocation24_spill] sm:$0xff] %v7025_v8 }
  0x1c   :  { %4192 = vmatpush1.bf16.msra.mxu0 %v6831_v2  ;;  %444 = vmatprep.mubr.f32.mxu0 %v9491_v3  ;;  %v783_v33 = vld [vmem:[%s9453_s3 + $0x448] sm:$0xff]  ;;  %v782_v43 = vld [vmem:[%s9453_s3 + $0x440] sm:$0xff] }
  0x1d   :  { %4194 = vmatprep.subr.bf16.mxu0 %v6841_v6  ;;  %4012 = vmatmul.mubr.msk.f32.gmra.mrb[8].mxu1 %vm105_vm0, %v6861_v12  ;;  %9723 = vst [vmem:[#allocation18_spill] sm:$0xff] %v6925_v28  ;;  %9724 = vst [vmem:[#allocation19_spill] sm:$0xff] %v6951_v36  ;;  %v6963_v42 = vpack.c.bf16 %v783_v33, %v775_v32  ;;  %v791_v48 = vld [vmem:[%s9453_s3 + $0x488] sm:$0xff]  ;;  %v6987_v52 = vpack.c.bf16 %v782_v43, %v774_v41  ;;  %v790_v53 = vld [vmem:[%s9453_s3 + $0x480] sm:$0xff] }
  0x1e   :  { %224 = vmatprep.mubr.f32.mxu1 %v9491_v3  ;;  %v799_v50 = vld [vmem:[%s9453_s3 + $0x4c8] sm:$0xff]  ;;  %v798_v61 = vld [vmem:[%s9453_s3 + $0x4c0] sm:$0xff] }
  0x1f   :  { %4028 = vmatmul.mubr.msk.f32.gmra.mrb[8].mxu0 %vm105_vm0, %v6861_v12  ;;  %9725 = vst [vmem:[#allocation20_spill] sm:$0xff] %v6963_v42  ;;  %9726 = vst [vmem:[#allocation21_spill] sm:$0xff] %v6987_v52  ;;  %v6999_v58 = vpack.c.bf16 %v799_v50, %v791_v48  ;;  %v807_v0 = vld [vmem:[%s9453_s3 + $0x508] sm:$0xff]  ;;  %v7023_v7 = vpack.c.bf16 %v798_v61, %v790_v53  ;;  %v806_v10 = vld [vmem:[%s9453_s3 + $0x500] sm:$0xff] }
  0x20   :  { %4196 = vmatpush1.bf16.msra.mxu0 %v6864_v13  ;;  %450 = vmatprep.mubr.f32.mxu0 %v9491_v3  ;;  %v815_v4 = vld [vmem:[%s9453_s3 + $0x548] sm:$0xff]  ;;  %v814_v11 = vld [vmem:[%s9453_s3 + $0x540] sm:$0xff] }
  0x21   :  { %4198 = vmatprep.subr.bf16.mxu0 %v6867_v14  ;;  %4013 = vmatmul.mubr.msk.f32.gmra.mrb[10].mxu1 %vm105_vm0, %v6890_v19  ;;  %9727 = vst [vmem:[#allocation22_spill] sm:$0xff] %v6999_v58  ;;  %9728 = vst [vmem:[#allocation23_spill] sm:$0xff] %v7023_v7  ;;  %v7028_v9 = vpack.c.bf16 %v815_v4, %v807_v0  ;;  %v823_v15 = vld [vmem:[%s9453_s3 + $0x588] sm:$0xff]  ;;  %v7046_v17 = vpack.c.bf16 %v814_v11, %v806_v10  ;;  %v822_v22 = vld [vmem:[%s9453_s3 + $0x580] sm:$0xff] }
  0x22   :  { %230 = vmatprep.mubr.f32.mxu1 %v9491_v3  ;;  %v831_v16 = vld [vmem:[%s9453_s3 + $0x5c8] sm:$0xff]  ;;  %v830_v23 = vld [vmem:[%s9453_s3 + $0x5c0] sm:$0xff] }
  0x23   :  { %4029 = vmatmul.mubr.msk.f32.gmra.mrb[10].mxu0 %vm105_vm0, %v6890_v19  ;;  %9730 = vst [vmem:[#allocation25_spill] sm:$0xff] %v7028_v9  ;;  %9731 = vst [vmem:[#allocation26_spill] sm:$0xff] %v7046_v17  ;;  %v7050_v18 = vpack.c.bf16 %v831_v16, %v823_v15  ;;  %v839_v24 = vld [vmem:[%s9453_s3 + $0x608] sm:$0xff]  ;;  %v7068_v29 = vpack.c.bf16 %v830_v23, %v822_v22  ;;  %v838_v32 = vld [vmem:[%s9453_s3 + $0x600] sm:$0xff] }
  0x24   :  { %4200 = vmatpush1.bf16.msra.mxu0 %v6893_v20  ;;  %456 = vmatprep.mubr.f32.mxu0 %v9491_v3  ;;  %v847_v25 = vld [vmem:[%s9453_s3 + $0x648] sm:$0xff]  ;;  %v846_v33 = vld [vmem:[%s9453_s3 + $0x640] sm:$0xff]  ;;  %v648_v15 = vld [vmem:[%s9453_s3 + $0x10] sm:$0xff] }
  0x25   :  { %4202 = vmatprep.subr.bf16.mxu0 %v6896_v21  ;;  %4014 = vmatmul.mubr.msk.f32.gmra.mrb[12].mxu1 %vm105_vm0, %v6919_v26  ;;  %9732 = vst [vmem:[#allocation27_spill] sm:$0xff] %v7050_v18  ;;  %9733 = vst [vmem:[#allocation28_spill] sm:$0xff] %v7068_v29  ;;  %v7071_v31 = vpack.c.bf16 %v847_v25, %v839_v24  ;;  %v855_v37 = vld [vmem:[%s9453_s3 + $0x688] sm:$0xff]  ;;  %v7089_v41 = vpack.c.bf16 %v846_v33, %v838_v32  ;;  %v854_v44 = vld [vmem:[%s9453_s3 + $0x680] sm:$0xff] }
  0x26   :  { %236 = vmatprep.mubr.f32.mxu1 %v9491_v3  ;;  %v863_v39 = vld [vmem:[%s9453_s3 + $0x6c8] sm:$0xff]  ;;  %v862_v47 = vld [vmem:[%s9453_s3 + $0x6c0] sm:$0xff]  ;;  %v656_v16 = vld [vmem:[%s9453_s3 + $0x50] sm:$0xff] }
  0x27   :  { %4030 = vmatmul.mubr.msk.f32.gmra.mrb[12].mxu0 %vm105_vm0, %v6919_v26  ;;  %9734 = vst [vmem:[#allocation29_spill] sm:$0xff] %v7071_v31  ;;  %9735 = vst [vmem:[#allocation30_spill] sm:$0xff] %v7089_v41  ;;  %v7092_v43 = vpack.c.bf16 %v863_v39, %v855_v37  ;;  %v871_v48 = vld [vmem:[%s9453_s3 + $0x708] sm:$0xff]  ;;  %v878_v55 = vld [vmem:[%s9453_s3 + $0x740] sm:$0xff]  ;;  %v7184_v39 = vpack.c.bf16 %v656_v16, %v648_v15 }
  0x28   :  { %4204 = vmatpush1.bf16.msra.mxu0 %v6922_v27  ;;  %462 = vmatprep.mubr.f32.mxu0 %v9491_v3  ;;  %v879_v50 = vld [vmem:[%s9453_s3 + $0x748] sm:$0xff]  ;;  %v886_v0 = vld [vmem:[%s9453_s3 + $0x780] sm:$0xff]  ;;  %v665_v25 = vld [vmem:[%s9453_s3 + $0x98] sm:$0xff] }
  0x29   :  { %4206 = vmatprep.subr.bf16.mxu0 %v6925_v28  ;;  %4015 = vmatmul.mubr.msk.f32.gmra.mrb[14].mxu1 %vm105_vm0, %v6948_v35  ;;  %9736 = vst [vmem:[#allocation31_spill] sm:$0xff] %v7092_v43  ;;  %v7113_v53 = vpack.c.bf16 %v879_v50, %v871_v48  ;;  %v887_v56 = vld [vmem:[%s9453_s3 + $0x788] sm:$0xff]  ;;  %v894_v4 = vld [vmem:[%s9453_s3 + $0x7c0] sm:$0xff]  ;;  %v673_v32 = vld [vmem:[%s9453_s3 + $0xd8] sm:$0xff] }
  0x2a   :  { %307 = vmatprep.mubr.f32.mxu1 %v9491_v3  ;;  %v895_v61 = vld [vmem:[%s9453_s3 + $0x7c8] sm:$0xff]  ;;  %v7152_v11 = vpack.c.bf16 %v894_v4, %v886_v0  ;;  %v650_v22 = vld [vmem:[%s9453_s3 + $0x20] sm:$0xff]  ;;  %9743 = vst [vmem:[#allocation38_spill] sm:$0xff] %v7184_v39  ;;  %v664_v48 = vld [vmem:[%s9453_s3 + $0x90] sm:$0xff] }
  0x2b   :  { %4031 = vmatmul.mubr.msk.f32.gmra.mrb[14].mxu0 %vm105_vm0, %v6948_v35  ;;  %9738 = vst [vmem:[#allocation33_spill] sm:$0xff] %v7113_v53  ;;  %v7134_v63 = vpack.c.bf16 %v895_v61, %v887_v56  ;;  %v659_v10 = vld [vmem:[%s9453_s3 + $0x68] sm:$0xff]  ;;  %v658_v24 = vld [vmem:[%s9453_s3 + $0x60] sm:$0xff]  ;;  %v672_v50 = vld [vmem:[%s9453_s3 + $0xd0] sm:$0xff] }
  0x2c   :  { %4208 = vmatpush1.bf16.msra.mxu0 %v6951_v36  ;;  %966 = vmatprep.mubr.f32.mxu0 %v9491_v3  ;;  %9741 = vst [vmem:[#allocation36_spill] sm:$0xff] %v7152_v11  ;;  %v667_v33 = vld [vmem:[%s9453_s3 + $0xa8] sm:$0xff]  ;;  %v674_v56 = vld [vmem:[%s9453_s3 + $0xe0] sm:$0xff]  ;;  %v681_v61 = vld [vmem:[%s9453_s3 + $0x118] sm:$0xff] }
  0x2d   :  { %4210 = vmatprep.subr.bf16.mxu0 %v6963_v42  ;;  %4016 = vmatmul.mubr.msk.f32.vlgmr.msra.gmra.mrb[16].mxu1 %vm105_vm0, %v6722_v34  ;;  %9740 = vst [vmem:[#allocation35_spill] sm:$0xff] %v7134_v63  ;;  %v675_v37 = vld [vmem:[%s9453_s3 + $0xe8] sm:$0xff]  ;;  %v689_v0 = vld [vmem:[%s9453_s3 + $0x158] sm:$0xff]  ;;  %v680_v16 = vld [vmem:[%s9453_s3 + $0x110] sm:$0xff] }
  0x2e   :  { %4172 = vmatpush1.bf16.msra.mxu1 %v4171_v51  ;;  %313 = vmatprep.mubr.f32.mxu1 %v9491_v3  ;;  %v7110_v51 = vpack.c.bf16 %v862_v47, %v854_v44  ;;  %v7187_v44 = vpack.c.bf16 %v658_v24, %v650_v22  ;;  %v7189_v47 = vpack.c.bf16 %v673_v32, %v665_v25  ;;  %v683_v4 = vld [vmem:[%s9453_s3 + $0x128] sm:$0xff]  ;;  %v688_v22 = vld [vmem:[%s9453_s3 + $0x150] sm:$0xff]  ;;  %v682_v24 = vld [vmem:[%s9453_s3 + $0x120] sm:$0xff] }
  0x2f   :  { %4174 = vmatprep.subr.bf16.mxu1 %v4173_v54  ;;  %v870_v54 = vld [vmem:[%s9453_s3 + $0x700] sm:$0xff] }
  0x30   :  { %4212 = vmatpush1.bf16.msra.mxu0 %v6987_v52  ;;  %9737 = vst [vmem:[#allocation32_spill] sm:$0xff] %v7110_v51  ;;  %v7131_v62 = vpack.c.bf16 %v878_v55, %v870_v54  ;;  %9744 = vst [vmem:[#allocation39_spill] sm:$0xff] %v7187_v44  ;;  %v666_v54 = vld [vmem:[%s9453_s3 + $0xa0] sm:$0xff]  ;;  %v7201_v55 = vpack.c.bf16 %v675_v37, %v667_v33  ;;  %v697_v33 = vld [vmem:[%s9453_s3 + $0x198] sm:$0xff] }
  0x31   :  { %4214 = vmatprep.subr.bf16.mxu0 %v6999_v58  ;;  %4017 = vmatmul.mubr.msk.f32.gmra.mrb[18].mxu1 %vm105_vm0, %v6757_v45  ;;  %9745 = vst [vmem:[#allocation40_spill] sm:$0xff] %v7189_v47  ;;  %v7226_v15 = vpack.c.bf16 %v674_v56, %v666_v54  ;;  %v690_v32 = vld [vmem:[%s9453_s3 + $0x160] sm:$0xff]  ;;  %v705_v37 = vld [vmem:[%s9453_s3 + $0x1d8] sm:$0xff]  ;;  %v7262_v54 = vpack.c.bf16 %v688_v22, %v680_v16 }
  0x32   :  { %319 = vmatprep.mubr.f32.mxu1 %v9491_v3  ;;  %4176 = vmatpush1.bf16.msra.mxu1 %v4175_v5  ;;  %9739 = vst [vmem:[#allocation34_spill] sm:$0xff] %v7131_v62  ;;  %v651_v5 = vld [vmem:[%s9453_s3 + $0x28] sm:$0xff]  ;;  %9746 = vst [vmem:[#allocation41_spill] sm:$0xff] %v7201_v55  ;;  %v7267_v56 = vpack.c.bf16 %v690_v32, %v682_v24  ;;  %v706_v16 = vld [vmem:[%s9453_s3 + $0x1e0] sm:$0xff] }
  0x33   :  { %4242 = vmatprep.subr.bf16.mxu1 %v7025_v8  ;;  %v7164_v23 = vpack.c.bf16 %v659_v10, %v651_v5  ;;  %v691_v5 = vld [vmem:[%s9453_s3 + $0x168] sm:$0xff]  ;;  %v7222_v10 = vpack.c.bf16 %v672_v50, %v664_v48  ;;  %9748 = vst [vmem:[#allocation43_spill] sm:$0xff] %v7226_v15  ;;  %9751 = vst [vmem:[#allocation46_spill] sm:$0xff] %v7262_v54  ;;  %v713_v22 = vld [vmem:[%s9453_s3 + $0x218] sm:$0xff] }
  0x34   :  { %4216 = vmatpush1.bf16.msra.mxu0 %v7023_v7  ;;  %v7240_v25 = vpack.c.bf16 %v691_v5, %v683_v4  ;;  %v699_v48 = vld [vmem:[%s9453_s3 + $0x1a8] sm:$0xff]  ;;  %9752 = vst [vmem:[#allocation47_spill] sm:$0xff] %v7267_v56  ;;  %v698_v4 = vld [vmem:[%s9453_s3 + $0x1a0] sm:$0xff]  ;;  %v721_v24 = vld [vmem:[%s9453_s3 + $0x258] sm:$0xff] }
  0x35   :  { %4218 = vmatprep.subr.bf16.mxu0 %v7028_v9  ;;  %4018 = vmatmul.mubr.msk.f32.gmra.mrb[20].mxu1 %vm105_vm0, %v6797_v57  ;;  %9742 = vst [vmem:[#allocation37_spill] sm:$0xff] %v7164_v23  ;;  %9747 = vst [vmem:[#allocation42_spill] sm:$0xff] %v7222_v10  ;;  %v707_v50 = vld [vmem:[%s9453_s3 + $0x1e8] sm:$0xff] }
  0x36   :  { %325 = vmatprep.mubr.f32.mxu1 %v9491_v3  ;;  %9750 = vst [vmem:[#allocation45_spill] sm:$0xff] %v7240_v25  ;;  %v7281_v5 = vpack.c.bf16 %v707_v50, %v699_v48  ;;  %v715_v32 = vld [vmem:[%s9453_s3 + $0x228] sm:$0xff]  ;;  %v7306_v48 = vpack.c.bf16 %v706_v16, %v698_v4  ;;  %v7308_v50 = vpack.c.bf16 %v721_v24, %v713_v22  ;;  %v722_v4 = vld [vmem:[%s9453_s3 + $0x260] sm:$0xff]  ;;  %v729_v16 = vld [vmem:[%s9453_s3 + $0x298] sm:$0xff] }
  0x37   :  { %v737_v22 = vld [vmem:[%s9453_s3 + $0x2d8] sm:$0xff]  ;;  %v731_v24 = vld [vmem:[%s9453_s3 + $0x2a8] sm:$0xff] }
  0x38   :  { %4220 = vmatpush1.bf16.msra.mxu0 %v7046_v17  ;;  %9754 = vst [vmem:[#allocation49_spill] sm:$0xff] %v7281_v5  ;;  %9756 = vst [vmem:[#allocation51_spill] sm:$0xff] %v7306_v48 }
  0x39   :  { %4222 = vmatprep.subr.bf16.mxu0 %v7050_v18  ;;  %4019 = vmatmul.mubr.msk.f32.gmra.mrb[22].mxu1 %vm105_vm0, %v6826_v1  ;;  %9757 = vst [vmem:[#allocation52_spill] sm:$0xff] %v7308_v50 }
  0x3a   :  { %331 = vmatprep.mubr.f32.mxu1 %v9491_v3 }
  0x3c   :  { %4224 = vmatpush1.bf16.msra.mxu0 %v7068_v29 }
  0x3d   :  { %4226 = vmatprep.subr.bf16.mxu0 %v7071_v31  ;;  %4020 = vmatmul.mubr.msk.f32.gmra.mrb[24].mxu1 %vm105_vm0, %v6861_v12 }
  0x3e   :  { %337 = vmatprep.mubr.f32.mxu1 %v9491_v3 }
  0x40   :  { %4228 = vmatpush1.bf16.msra.mxu0 %v7089_v41 }
  0x41   :  { %4230 = vmatprep.subr.bf16.mxu0 %v7092_v43  ;;  %4021 = vmatmul.mubr.msk.f32.gmra.mrb[26].mxu1 %vm105_vm0, %v6890_v19 }
  0x42   :  { %343 = vmatprep.mubr.f32.mxu1 %v9491_v3 }
  0x44   :  { %4232 = vmatpush1.bf16.msra.mxu0 %v7110_v51 }
  0x45   :  { %4234 = vmatprep.subr.bf16.mxu0 %v7113_v53  ;;  %4022 = vmatmul.mubr.msk.f32.gmra.mrb[28].mxu1 %vm105_vm0, %v6919_v26 }
  0x46   :  { %349 = vmatprep.mubr.f32.mxu1 %v9491_v3 }
  0x48   :  { %4236 = vmatpush1.bf16.msra.mxu0 %v7131_v62 }
  0x49   :  { %4238 = vmatprep.subr.bf16.mxu0 %v7134_v63  ;;  %4023 = vmatmul.mubr.msk.f32.gmra.mrb[30].mxu1 %vm105_vm0, %v6948_v35 }
  0x4a   :  { %533 = vmatprep.mubr.f32.mxu1 %v9491_v3 }
  0x4c   :  { %4240 = vmatpush1.bf16.msra.mxu0 %v7152_v11 }
  0x4d   :  { %4306 = vmatprep.subr.bf16.mxu0 %v7164_v23  ;;  %4032 = vmatmul.mubr.msk.f32.vlgmr.msra.gmra.mrb[32].mxu1 %vm105_vm0, %v6722_v34  ;;  %v7228_v34 = vpack.c.bf16 %v689_v0, %v681_v61  ;;  %v7269_v61 = vpack.c.bf16 %v705_v37, %v697_v33  ;;  %v704_v0 = vld [vmem:[%s9453_s3 + $0x1d0] sm:$0xff]  ;;  %v723_v33 = vld [vmem:[%s9453_s3 + $0x268] sm:$0xff] }
  0x4e   :  { %4244 = vmatpush1.bf16.msra.mxu1 %v7184_v39  ;;  %539 = vmatprep.mubr.f32.mxu1 %v9491_v3 }
  0x4f   :  { %967 = vmatmul.mubr.f32.vlgmr.msra.gmra.mrb[16].mxu0 %v9491_v3  ;;  %4246 = vmatprep.subr.bf16.mxu1 %v7189_v47  ;;  %9749 = vst [vmem:[#allocation44_spill] sm:$0xff] %v7228_v34  ;;  %9753 = vst [vmem:[#allocation48_spill] sm:$0xff] %v7269_v61 }
  0x50   :  { %4308 = vmatpush1.bf16.msra.mxu0 %v7187_v44  ;;  %1108 = vmatprep.mubr.f32.mxu0 %v9491_v3  ;;  %v760_v44 = vld [vmem:[%s9453_s3 + $0x390] sm:$0xff] }
  0x51   :  { %4310 = vmatprep.subr.bf16.mxu0 %v7201_v55  ;;  %4033 = vmatmul.mubr.msk.f32.gmra.mrb[34].mxu1 %vm105_vm0, %v6757_v45  ;;  %v696_v45 = vld [vmem:[%s9453_s3 + $0x190] sm:$0xff] }
  0x52   :  { %4248 = vmatpush1.bf16.msra.mxu1 %v7222_v10  ;;  %545 = vmatprep.mubr.f32.mxu1 %v9491_v3  ;;  %v7301_v37 = vpack.c.bf16 %v704_v0, %v696_v45  ;;  %v714_v45 = vld [vmem:[%s9453_s3 + $0x220] sm:$0xff]  ;;  %v7320_v0 = vpack.c.bf16 %v723_v33, %v715_v32  ;;  %v739_v32 = vld [vmem:[%s9453_s3 + $0x2e8] sm:$0xff]  ;;  %v744_v55 = vld [vmem:[%s9453_s3 + $0x310] sm:$0xff] }
  0x53   :  { %4250 = vmatprep.subr.bf16.mxu1 %v7228_v34 }
  0x54   :  { %4312 = vmatpush1.bf16.msra.mxu0 %v7226_v15  ;;  %9755 = vst [vmem:[#allocation50_spill] sm:$0xff] %v7301_v37  ;;  %9758 = vst [vmem:[#allocation53_spill] sm:$0xff] %v7320_v0  ;;  %v728_v15 = vld [vmem:[%s9453_s3 + $0x290] sm:$0xff] }
  0x55   :  { %4314 = vmatprep.subr.bf16.mxu0 %v7240_v25  ;;  %4034 = vmatmul.mubr.msk.f32.gmra.mrb[36].mxu1 %vm105_vm0, %v6797_v57  ;;  %v712_v25 = vld [vmem:[%s9453_s3 + $0x210] sm:$0xff] }
  0x56   :  { %4252 = vmatpush1.bf16.msra.mxu1 %v7262_v54  ;;  %551 = vmatprep.mubr.f32.mxu1 %v9491_v3  ;;  %v720_v57 = vld [vmem:[%s9453_s3 + $0x250] sm:$0xff] }
  0x57   :  { %4254 = vmatprep.subr.bf16.mxu1 %v7269_v61  ;;  %v7340_v33 = vpack.c.bf16 %v720_v57, %v712_v25  ;;  %v730_v25 = vld [vmem:[%s9453_s3 + $0x2a0] sm:$0xff]  ;;  %v7359_v57 = vpack.c.bf16 %v739_v32, %v731_v24  ;;  %v755_v24 = vld [vmem:[%s9453_s3 + $0x368] sm:$0xff] }
  0x58   :  { %4316 = vmatpush1.bf16.msra.mxu0 %v7267_v56  ;;  %v7347_v56 = vpack.c.bf16 %v737_v22, %v729_v16  ;;  %v753_v16 = vld [vmem:[%s9453_s3 + $0x358] sm:$0xff]  ;;  %v747_v22 = vld [vmem:[%s9453_s3 + $0x328] sm:$0xff] }
  0x59   :  { %4318 = vmatprep.subr.bf16.mxu0 %v7281_v5  ;;  %4035 = vmatmul.mubr.msk.f32.gmra.mrb[38].mxu1 %vm105_vm0, %v6826_v1  ;;  %9759 = vst [vmem:[#allocation54_spill] sm:$0xff] %v7340_v33  ;;  %v7345_v5 = vpack.c.bf16 %v722_v4, %v714_v45  ;;  %v736_v1 = vld [vmem:[%s9453_s3 + $0x2d0] sm:$0xff]  ;;  %9762 = vst [vmem:[#allocation57_spill] sm:$0xff] %v7359_v57  ;;  %v738_v45 = vld [vmem:[%s9453_s3 + $0x2e0] sm:$0xff] }
  0x5a   :  { %4256 = vmatpush1.bf16.msra.mxu1 %v7301_v37  ;;  %557 = vmatprep.mubr.f32.mxu1 %v9491_v3  ;;  %9761 = vst [vmem:[#allocation56_spill] sm:$0xff] %v7347_v56  ;;  %v745_v4 = vld [vmem:[%s9453_s3 + $0x318] sm:$0xff]  ;;  %v7379_v32 = vpack.c.bf16 %v736_v1, %v728_v15  ;;  %v746_v15 = vld [vmem:[%s9453_s3 + $0x320] sm:$0xff]  ;;  %v7398_v1 = vpack.c.bf16 %v755_v24, %v747_v22  ;;  %v771_v22 = vld [vmem:[%s9453_s3 + $0x3e8] sm:$0xff] }
  0x5b   :  { %4258 = vmatprep.subr.bf16.mxu1 %v7308_v50  ;;  %9760 = vst [vmem:[#allocation55_spill] sm:$0xff] %v7345_v5 }
  0x5c   :  { %4320 = vmatpush1.bf16.msra.mxu0 %v7306_v48  ;;  %9763 = vst [vmem:[#allocation58_spill] sm:$0xff] %v7379_v32  ;;  %v7386_v48 = vpack.c.bf16 %v753_v16, %v745_v4  ;;  %9766 = vst [vmem:[#allocation61_spill] sm:$0xff] %v7398_v1  ;;  %v769_v4 = vld [vmem:[%s9453_s3 + $0x3d8] sm:$0xff]  ;;  %v763_v16 = vld [vmem:[%s9453_s3 + $0x3a8] sm:$0xff] }
  0x5d   :  { %4322 = vmatprep.subr.bf16.mxu0 %v7320_v0  ;;  %4036 = vmatmul.mubr.msk.f32.gmra.mrb[40].mxu1 %vm105_vm0, %v6861_v12  ;;  %v7384_v0 = vpack.c.bf16 %v738_v45, %v730_v25  ;;  %v752_v12 = vld [vmem:[%s9453_s3 + $0x350] sm:$0xff]  ;;  %v754_v25 = vld [vmem:[%s9453_s3 + $0x360] sm:$0xff]  ;;  %v761_v45 = vld [vmem:[%s9453_s3 + $0x398] sm:$0xff] }
  0x5e   :  { %4260 = vmatpush1.bf16.msra.mxu1 %v7340_v33  ;;  %563 = vmatprep.mubr.f32.mxu1 %v9491_v3  ;;  %9765 = vst [vmem:[#allocation60_spill] sm:$0xff] %v7386_v48  ;;  %v7418_v24 = vpack.c.bf16 %v752_v12, %v744_v55  ;;  %v762_v55 = vld [vmem:[%s9453_s3 + $0x3a0] sm:$0xff]  ;;  %v7437_v12 = vpack.c.bf16 %v771_v22, %v763_v16  ;;  %v787_v16 = vld [vmem:[%s9453_s3 + $0x468] sm:$0xff] }
  0x5f   :  { %4262 = vmatprep.subr.bf16.mxu1 %v7347_v56  ;;  %9764 = vst [vmem:[#allocation59_spill] sm:$0xff] %v7384_v0 }
  0x60   :  { %4324 = vmatpush1.bf16.msra.mxu0 %v7345_v5  ;;  %9767 = vst [vmem:[#allocation62_spill] sm:$0xff] %v7418_v24  ;;  %v7425_v5 = vpack.c.bf16 %v769_v4, %v761_v45  ;;  %9770 = vst [vmem:[#allocation65_spill] sm:$0xff] %v7437_v12  ;;  %v785_v45 = vld [vmem:[%s9453_s3 + $0x458] sm:$0xff]  ;;  %v779_v4 = vld [vmem:[%s9453_s3 + $0x428] sm:$0xff] }
  0x61   :  { %4326 = vmatprep.subr.bf16.mxu0 %v7359_v57  ;;  %4037 = vmatmul.mubr.msk.f32.gmra.mrb[42].mxu1 %vm105_vm0, %v6890_v19  ;;  %v7423_v57 = vpack.c.bf16 %v754_v25, %v746_v15  ;;  %v768_v19 = vld [vmem:[%s9453_s3 + $0x3d0] sm:$0xff]  ;;  %v770_v15 = vld [vmem:[%s9453_s3 + $0x3e0] sm:$0xff]  ;;  %v777_v25 = vld [vmem:[%s9453_s3 + $0x418] sm:$0xff] }
  0x62   :  { %4264 = vmatpush1.bf16.msra.mxu1 %v7379_v32  ;;  %569 = vmatprep.mubr.f32.mxu1 %v9491_v3  ;;  %9769 = vst [vmem:[#allocation64_spill] sm:$0xff] %v7425_v5  ;;  %v7457_v22 = vpack.c.bf16 %v768_v19, %v760_v44  ;;  %v778_v44 = vld [vmem:[%s9453_s3 + $0x420] sm:$0xff]  ;;  %v7476_v19 = vpack.c.bf16 %v787_v16, %v779_v4  ;;  %v803_v4 = vld [vmem:[%s9453_s3 + $0x4e8] sm:$0xff] }
  0x63   :  { %4266 = vmatprep.subr.bf16.mxu1 %v7386_v48  ;;  %9768 = vst [vmem:[#allocation63_spill] sm:$0xff] %v7423_v57  ;;  %v776_v48 = vld [vmem:[%s9453_s3 + $0x410] sm:$0xff] }
  0x64   :  { %4328 = vmatpush1.bf16.msra.mxu0 %v7384_v0  ;;  %9771 = vst [vmem:[#allocation66_spill] sm:$0xff] %v7457_v22  ;;  %v7464_v0 = vpack.c.bf16 %v785_v45, %v777_v25  ;;  %9774 = vst [vmem:[#allocation69_spill] sm:$0xff] %v7476_v19  ;;  %v801_v25 = vld [vmem:[%s9453_s3 + $0x4d8] sm:$0xff]  ;;  %v795_v45 = vld [vmem:[%s9453_s3 + $0x4a8] sm:$0xff] }
  0x65   :  { %4330 = vmatprep.subr.bf16.mxu0 %v7398_v1  ;;  %4038 = vmatmul.mubr.msk.f32.gmra.mrb[44].mxu1 %vm105_vm0, %v6919_v26  ;;  %v7462_v1 = vpack.c.bf16 %v770_v15, %v762_v55  ;;  %v784_v26 = vld [vmem:[%s9453_s3 + $0x450] sm:$0xff]  ;;  %v786_v55 = vld [vmem:[%s9453_s3 + $0x460] sm:$0xff]  ;;  %v793_v15 = vld [vmem:[%s9453_s3 + $0x498] sm:$0xff] }
  0x66   :  { %4268 = vmatpush1.bf16.msra.mxu1 %v7418_v24  ;;  %575 = vmatprep.mubr.f32.mxu1 %v9491_v3  ;;  %9773 = vst [vmem:[#allocation68_spill] sm:$0xff] %v7464_v0  ;;  %v7496_v16 = vpack.c.bf16 %v784_v26, %v776_v48  ;;  %v794_v48 = vld [vmem:[%s9453_s3 + $0x4a0] sm:$0xff]  ;;  %v7515_v26 = vpack.c.bf16 %v803_v4, %v795_v45  ;;  %v819_v45 = vld [vmem:[%s9453_s3 + $0x568] sm:$0xff] }
  0x67   :  { %4270 = vmatprep.subr.bf16.mxu1 %v7425_v5  ;;  %9772 = vst [vmem:[#allocation67_spill] sm:$0xff] %v7462_v1  ;;  %v792_v5 = vld [vmem:[%s9453_s3 + $0x490] sm:$0xff] }
  0x68   :  { %4332 = vmatpush1.bf16.msra.mxu0 %v7423_v57  ;;  %9775 = vst [vmem:[#allocation70_spill] sm:$0xff] %v7496_v16  ;;  %v7503_v57 = vpack.c.bf16 %v801_v25, %v793_v15  ;;  %9778 = vst [vmem:[#allocation73_spill] sm:$0xff] %v7515_v26  ;;  %v817_v15 = vld [vmem:[%s9453_s3 + $0x558] sm:$0xff]  ;;  %v811_v25 = vld [vmem:[%s9453_s3 + $0x528] sm:$0xff] }
  0x69   :  { %4334 = vmatprep.subr.bf16.mxu0 %v7437_v12  ;;  %4039 = vmatmul.mubr.msk.f32.gmra.mrb[46].mxu1 %vm105_vm0, %v6948_v35  ;;  %v7501_v12 = vpack.c.bf16 %v786_v55, %v778_v44  ;;  %v800_v35 = vld [vmem:[%s9453_s3 + $0x4d0] sm:$0xff]  ;;  %v802_v44 = vld [vmem:[%s9453_s3 + $0x4e0] sm:$0xff]  ;;  %v809_v55 = vld [vmem:[%s9453_s3 + $0x518] sm:$0xff] }
  0x6a   :  { %4272 = vmatpush1.bf16.msra.mxu1 %v7457_v22  ;;  %1037 = vmatprep.mubr.f32.mxu1 %v9491_v3  ;;  %9777 = vst [vmem:[#allocation72_spill] sm:$0xff] %v7503_v57  ;;  %v7533_v4 = vpack.c.bf16 %v800_v35, %v792_v5  ;;  %v7537_v3 = vpack.c.bf16 %v802_v44, %v794_v48  ;;  %v810_v5 = vld [vmem:[%s9453_s3 + $0x520] sm:$0xff]  ;;  %v825_v44 = vld [vmem:[%s9453_s3 + $0x598] sm:$0xff] }
  0x6b   :  { %4274 = vmatprep.subr.bf16.mxu1 %v7464_v0  ;;  %9776 = vst [vmem:[#allocation71_spill] sm:$0xff] %v7501_v12  ;;  %v816_v0 = vld [vmem:[%s9453_s3 + $0x550] sm:$0xff]  ;;  %v7551_v35 = vpack.c.bf16 %v819_v45, %v811_v25  ;;  %v818_v48 = vld [vmem:[%s9453_s3 + $0x560] sm:$0xff]  ;;  %v835_v25 = vld [vmem:[%s9453_s3 + $0x5e8] sm:$0xff] }
  0x6c   :  { %4336 = vmatpush1.bf16.msra.mxu0 %v7462_v1  ;;  %9779 = vst [vmem:[#allocation74_spill] sm:$0xff] %v7533_v4  ;;  %9780 = vst [vmem:[#allocation75_spill] sm:$0xff] %v7537_v3  ;;  %v808_v1 = vld [vmem:[%s9453_s3 + $0x510] sm:$0xff] }
  0x6d   :  { %4338 = vmatprep.subr.bf16.mxu0 %v7476_v19  ;;  %v7539_v19 = vpack.c.bf16 %v817_v15, %v809_v55  ;;  %9782 = vst [vmem:[#allocation77_spill] sm:$0xff] %v7551_v35  ;;  %v833_v55 = vld [vmem:[%s9453_s3 + $0x5d8] sm:$0xff]  ;;  %v827_v15 = vld [vmem:[%s9453_s3 + $0x5a8] sm:$0xff]  ;;  %v7569_v45 = vpack.c.bf16 %v816_v0, %v808_v1  ;;  %v826_v0 = vld [vmem:[%s9453_s3 + $0x5a0] sm:$0xff] }
  0x6e   :  { %4276 = vmatpush1.bf16.msra.mxu1 %v7496_v16  ;;  %v832_v16 = vld [vmem:[%s9453_s3 + $0x5d0] sm:$0xff]  ;;  %v7587_v1 = vpack.c.bf16 %v835_v25, %v827_v15  ;;  %v851_v15 = vld [vmem:[%s9453_s3 + $0x668] sm:$0xff] }
  0x6f   :  { %4278 = vmatprep.subr.bf16.mxu1 %v7503_v57  ;;  %9781 = vst [vmem:[#allocation76_spill] sm:$0xff] %v7539_v19  ;;  %9783 = vst [vmem:[#allocation78_spill] sm:$0xff] %v7569_v45  ;;  %v824_v57 = vld [vmem:[%s9453_s3 + $0x590] sm:$0xff] }
  0x70   :  { %4340 = vmatpush1.bf16.msra.mxu0 %v7501_v12  ;;  %v7575_v12 = vpack.c.bf16 %v833_v55, %v825_v44  ;;  %9786 = vst [vmem:[#allocation81_spill] sm:$0xff] %v7587_v1  ;;  %v849_v44 = vld [vmem:[%s9453_s3 + $0x658] sm:$0xff]  ;;  %v843_v55 = vld [vmem:[%s9453_s3 + $0x628] sm:$0xff]  ;;  %v7605_v25 = vpack.c.bf16 %v832_v16, %v824_v57  ;;  %v842_v57 = vld [vmem:[%s9453_s3 + $0x620] sm:$0xff] }
  0x71   :  { %4342 = vmatprep.subr.bf16.mxu0 %v7515_v26  ;;  %v7573_v26 = vpack.c.bf16 %v818_v48, %v810_v5  ;;  %v834_v5 = vld [vmem:[%s9453_s3 + $0x5e0] sm:$0xff]  ;;  %v841_v48 = vld [vmem:[%s9453_s3 + $0x618] sm:$0xff]  ;;  %v7623_v16 = vpack.c.bf16 %v851_v15, %v843_v55  ;;  %v867_v55 = vld [vmem:[%s9453_s3 + $0x6e8] sm:$0xff] }
  0x72   :  { %4280 = vmatpush1.bf16.msra.mxu1 %v7533_v4  ;;  %9785 = vst [vmem:[#allocation80_spill] sm:$0xff] %v7575_v12  ;;  %9787 = vst [vmem:[#allocation82_spill] sm:$0xff] %v7605_v25  ;;  %v848_v4 = vld [vmem:[%s9453_s3 + $0x650] sm:$0xff] }
  0x73   :  { %4282 = vmatprep.subr.bf16.mxu1 %v7539_v19  ;;  %9784 = vst [vmem:[#allocation79_spill] sm:$0xff] %v7573_v26  ;;  %v840_v19 = vld [vmem:[%s9453_s3 + $0x610] sm:$0xff]  ;;  %9790 = vst [vmem:[#allocation85_spill] sm:$0xff] %v7623_v16 }
  0x74   :  { %4344 = vmatpush1.bf16.msra.mxu0 %v7537_v3  ;;  %v7611_v3 = vpack.c.bf16 %v849_v44, %v841_v48  ;;  %v865_v48 = vld [vmem:[%s9453_s3 + $0x6d8] sm:$0xff]  ;;  %v859_v44 = vld [vmem:[%s9453_s3 + $0x6a8] sm:$0xff]  ;;  %v7641_v15 = vpack.c.bf16 %v848_v4, %v840_v19  ;;  %v858_v19 = vld [vmem:[%s9453_s3 + $0x6a0] sm:$0xff] }
  0x75   :  { %4346 = vmatprep.subr.bf16.mxu0 %v7551_v35  ;;  %v7609_v35 = vpack.c.bf16 %v834_v5, %v826_v0  ;;  %v850_v0 = vld [vmem:[%s9453_s3 + $0x660] sm:$0xff]  ;;  %v857_v5 = vld [vmem:[%s9453_s3 + $0x698] sm:$0xff]  ;;  %v7659_v4 = vpack.c.bf16 %v867_v55, %v859_v44  ;;  %v883_v44 = vld [vmem:[%s9453_s3 + $0x768] sm:$0xff] }
  0x76   :  { %4284 = vmatpush1.bf16.msra.mxu1 %v7569_v45  ;;  %9789 = vst [vmem:[#allocation84_spill] sm:$0xff] %v7611_v3  ;;  %9791 = vst [vmem:[#allocation86_spill] sm:$0xff] %v7641_v15  ;;  %v864_v45 = vld [vmem:[%s9453_s3 + $0x6d0] sm:$0xff] }
  0x77   :  { %4286 = vmatprep.subr.bf16.mxu1 %v7575_v12  ;;  %9788 = vst [vmem:[#allocation83_spill] sm:$0xff] %v7609_v35  ;;  %v856_v12 = vld [vmem:[%s9453_s3 + $0x690] sm:$0xff]  ;;  %9794 = vst [vmem:[#allocation89_spill] sm:$0xff] %v7659_v4 }
  0x78   :  { %4348 = vmatpush1.bf16.msra.mxu0 %v7573_v26  ;;  %v7647_v26 = vpack.c.bf16 %v865_v48, %v857_v5  ;;  %v881_v5 = vld [vmem:[%s9453_s3 + $0x758] sm:$0xff]  ;;  %v875_v48 = vld [vmem:[%s9453_s3 + $0x728] sm:$0xff]  ;;  %v7677_v55 = vpack.c.bf16 %v864_v45, %v856_v12  ;;  %v874_v12 = vld [vmem:[%s9453_s3 + $0x720] sm:$0xff] }
  0x79   :  { %4350 = vmatprep.subr.bf16.mxu0 %v7587_v1  ;;  %v7645_v1 = vpack.c.bf16 %v850_v0, %v842_v57  ;;  %v866_v57 = vld [vmem:[%s9453_s3 + $0x6e0] sm:$0xff]  ;;  %v873_v0 = vld [vmem:[%s9453_s3 + $0x718] sm:$0xff]  ;;  %v7695_v45 = vpack.c.bf16 %v883_v44, %v875_v48  ;;  %v899_v48 = vld [vmem:[%s9453_s3 + $0x7e8] sm:$0xff] }
  0x7a   :  { %4288 = vmatpush1.bf16.msra.mxu1 %v7605_v25  ;;  %9793 = vst [vmem:[#allocation88_spill] sm:$0xff] %v7647_v26  ;;  %9795 = vst [vmem:[#allocation90_spill] sm:$0xff] %v7677_v55  ;;  %v880_v25 = vld [vmem:[%s9453_s3 + $0x750] sm:$0xff] }
  0x7b   :  { %4290 = vmatprep.subr.bf16.mxu1 %v7611_v3  ;;  %9792 = vst [vmem:[#allocation87_spill] sm:$0xff] %v7645_v1  ;;  %v872_v3 = vld [vmem:[%s9453_s3 + $0x710] sm:$0xff]  ;;  %9798 = vst [vmem:[#allocation93_spill] sm:$0xff] %v7695_v45 }
  0x7c   :  { %4352 = vmatpush1.bf16.msra.mxu0 %v7609_v35  ;;  %v7683_v35 = vpack.c.bf16 %v881_v5, %v873_v0  ;;  %v897_v0 = vld [vmem:[%s9453_s3 + $0x7d8] sm:$0xff]  ;;  %v891_v5 = vld [vmem:[%s9453_s3 + $0x7a8] sm:$0xff]  ;;  %v7713_v44 = vpack.c.bf16 %v880_v25, %v872_v3  ;;  %v890_v3 = vld [vmem:[%s9453_s3 + $0x7a0] sm:$0xff] }
  0x7d   :  { %4354 = vmatprep.subr.bf16.mxu0 %v7623_v16  ;;  %v7681_v16 = vpack.c.bf16 %v866_v57, %v858_v19  ;;  %v882_v19 = vld [vmem:[%s9453_s3 + $0x760] sm:$0xff]  ;;  %v889_v57 = vld [vmem:[%s9453_s3 + $0x798] sm:$0xff]  ;;  %v7731_v25 = vpack.c.bf16 %v899_v48, %v891_v5 }
  0x7e   :  { %4292 = vmatpush1.bf16.msra.mxu1 %v7641_v15  ;;  %9797 = vst [vmem:[#allocation92_spill] sm:$0xff] %v7683_v35  ;;  %9799 = vst [vmem:[#allocation94_spill] sm:$0xff] %v7713_v44  ;;  %v896_v15 = vld [vmem:[%s9453_s3 + $0x7d0] sm:$0xff] }
  0x7f   :  { %4294 = vmatprep.subr.bf16.mxu1 %v7647_v26  ;;  %9796 = vst [vmem:[#allocation91_spill] sm:$0xff] %v7681_v16  ;;  %v888_v26 = vld [vmem:[%s9453_s3 + $0x790] sm:$0xff]  ;;  %9802 = vst [vmem:[#allocation97_spill] sm:$0xff] %v7731_v25 }
  0x80   :  { %4356 = vmatpush1.bf16.msra.mxu0 %v7645_v1  ;;  %v7719_v1 = vpack.c.bf16 %v897_v0, %v889_v57  ;;  %v661_v57 = vld [vmem:[%s9453_s3 + $0x78] sm:$0xff]  ;;  %v7743_v0 = vpack.c.bf16 %v896_v15, %v888_v26 }
  0x81   :  { %4358 = vmatprep.subr.bf16.mxu0 %v7659_v4  ;;  %v7717_v4 = vpack.c.bf16 %v882_v19, %v874_v12  ;;  %v898_v12 = vld [vmem:[%s9453_s3 + $0x7e0] sm:$0xff]  ;;  %v653_v19 = vld [vmem:[%s9453_s3 + $0x38] sm:$0xff] }
  0x82   :  { %4296 = vmatpush1.bf16.msra.mxu1 %v7677_v55  ;;  %9801 = vst [vmem:[#allocation96_spill] sm:$0xff] %v7719_v1  ;;  %9803 = vst [vmem:[#allocation98_spill] sm:$0xff] %v7743_v0  ;;  %v7747_v5 = vpack.c.bf16 %v898_v12, %v890_v3  ;;  %v7749_v48 = vpack.c.bf16 %v661_v57, %v653_v19  ;;  %v669_v26 = vld [vmem:[%s9453_s3 + $0xb8] sm:$0xff]  ;;  %v668_v19 = vld [vmem:[%s9453_s3 + $0xb0] sm:$0xff] }
  0x83   :  { %4298 = vmatprep.subr.bf16.mxu1 %v7683_v35  ;;  %9800 = vst [vmem:[#allocation95_spill] sm:$0xff] %v7717_v4  ;;  %v677_v15 = vld [vmem:[%s9453_s3 + $0xf8] sm:$0xff]  ;;  %v676_v57 = vld [vmem:[%s9453_s3 + $0xf0] sm:$0xff] }
  0x84   :  { %4360 = vmatpush1.bf16.msra.mxu0 %v7681_v16  ;;  %9804 = vst [vmem:[#allocation99_spill] sm:$0xff] %v7747_v5  ;;  %9805 = vst [vmem:[#allocation100_spill] sm:$0xff] %v7749_v48  ;;  %v660_v16 = vld [vmem:[%s9453_s3 + $0x70] sm:$0xff]  ;;  %v7769_v12 = vpack.c.bf16 %v677_v15, %v669_v26  ;;  %v7787_v26 = vpack.c.bf16 %v676_v57, %v668_v19  ;;  %v709_v19 = vld [vmem:[%s9453_s3 + $0x1f8] sm:$0xff] }
  0x85   :  { %4362 = vmatprep.subr.bf16.mxu0 %v7695_v45  ;;  %v652_v45 = vld [vmem:[%s9453_s3 + $0x30] sm:$0xff] }
  0x86   :  { %4300 = vmatpush1.bf16.msra.mxu1 %v7713_v44  ;;  %v7765_v3 = vpack.c.bf16 %v660_v16, %v652_v45  ;;  %9806 = vst [vmem:[#allocation101_spill] sm:$0xff] %v7769_v12  ;;  %v693_v16 = vld [vmem:[%s9453_s3 + $0x178] sm:$0xff]  ;;  %v9807_v45 = vmov 0.0  }
  0x87   :  { %4302 = vmatprep.subr.bf16.mxu1 %v7719_v1 }
  0x88   :  { %4364 = vmatpush1.bf16.msra.mxu0 %v7717_v4  ;;  %v701_v4 = vld [vmem:[%s9453_s3 + $0x1b8] sm:$0xff] }
  0x89   :  { %4366 = vmatprep.subr.bf16.mxu0 %v7731_v25  ;;  %v685_v25 = vld [vmem:[%s9453_s3 + $0x138] sm:$0xff]  ;;  %v7811_v57 = vpack.c.bf16 %v709_v19, %v701_v4  ;;  %v716_v19 = vld [vmem:[%s9453_s3 + $0x230] sm:$0xff] }
  0x8a   :  { %4304 = vmatpush1.bf16.msra.mxu1 %v7743_v0  ;;  %v7790_v15 = vpack.c.bf16 %v693_v16, %v685_v25  ;;  %v700_v16 = vld [vmem:[%s9453_s3 + $0x1b0] sm:$0xff] }
  0x8b   :  { %4370 = vmatprep.subr.bf16.mxu1 %v7749_v48 }
  0x8c   :  { %4368 = vmatpush1.bf16.msra.mxu0 %v7747_v5  ;;  %v684_v5 = vld [vmem:[%s9453_s3 + $0x130] sm:$0xff] }
  0x8d   :  { %4434 = vmatprep.subr.bf16.mxu0 %v6708_v30  ;;  %1038 = vmatmul.mubr.f32.vlgmr.msra.gmra.mrb[48].mxu1 %v9807_v45  ;;  %v692_v30 = vld [vmem:[%s9453_s3 + $0x170] sm:$0xff] }
  0x8e   :  { %4372 = vmatpush1.bf16.msra.mxu1 %v7765_v3  ;;  %1179 = vmatprep.mubr.f32.mxu1 %v9807_v45  ;;  %v7808_v25 = vpack.c.bf16 %v692_v30, %v684_v5  ;;  %v725_v30 = vld [vmem:[%s9453_s3 + $0x278] sm:$0xff] }
  0x8f   :  { %1109 = vmatmul.mubr.f32.vlgmr.msra.gmra.mrb[14].mxu0 %v9807_v45  ;;  %4374 = vmatprep.subr.bf16.mxu1 %v7769_v12  ;;  %v708_v12 = vld [vmem:[%s9453_s3 + $0x1f0] sm:$0xff] }
  0x90   :  { %4436 = vmatpush1.bf16.msra.mxu0 %v6730_v38  ;;  %v7828_v4 = vpack.c.bf16 %v708_v12, %v700_v16  ;;  %v724_v38 = vld [vmem:[%s9453_s3 + $0x270] sm:$0xff]  ;;  %v741_v12 = vld [vmem:[%s9453_s3 + $0x2f8] sm:$0xff] }
  0x91   :  { %4438 = vmatprep.subr.bf16.mxu0 %v6736_v40  ;;  %v717_v40 = vld [vmem:[%s9453_s3 + $0x238] sm:$0xff] }
  0x92   :  { %4376 = vmatpush1.bf16.msra.mxu1 %v7787_v26  ;;  %v7831_v5 = vpack.c.bf16 %v725_v30, %v717_v40  ;;  %v7848_v40 = vpack.c.bf16 %v724_v38, %v716_v19  ;;  %v732_v30 = vld [vmem:[%s9453_s3 + $0x2b0] sm:$0xff]  ;;  %v757_v38 = vld [vmem:[%s9453_s3 + $0x378] sm:$0xff] }
  0x93   :  { %4378 = vmatprep.subr.bf16.mxu1 %v7790_v15 }
  0x94   :  { %4440 = vmatpush1.bf16.msra.mxu0 %v6761_v46  ;;  %v740_v46 = vld [vmem:[%s9453_s3 + $0x2f0] sm:$0xff] }
  0x95   :  { %4442 = vmatprep.subr.bf16.mxu0 %v6770_v49  ;;  %v733_v49 = vld [vmem:[%s9453_s3 + $0x2b8] sm:$0xff] }
  0x96   :  { %4380 = vmatpush1.bf16.msra.mxu1 %v7808_v25  ;;  %v7851_v16 = vpack.c.bf16 %v741_v12, %v733_v49  ;;  %v7868_v49 = vpack.c.bf16 %v740_v46, %v732_v30  ;;  %v748_v12 = vld [vmem:[%s9453_s3 + $0x330] sm:$0xff]  ;;  %v773_v46 = vld [vmem:[%s9453_s3 + $0x3f8] sm:$0xff] }
  0x97   :  { %4382 = vmatprep.subr.bf16.mxu1 %v7811_v57 }
  0x98   :  { %4444 = vmatpush1.bf16.msra.mxu0 %v6802_v59  ;;  %v756_v59 = vld [vmem:[%s9453_s3 + $0x370] sm:$0xff] }
  0x99   :  { %4446 = vmatprep.subr.bf16.mxu0 %v6805_v60  ;;  %v749_v60 = vld [vmem:[%s9453_s3 + $0x338] sm:$0xff] }
  0x9a   :  { %4384 = vmatpush1.bf16.msra.mxu1 %v7828_v4  ;;  %v7871_v19 = vpack.c.bf16 %v757_v38, %v749_v60  ;;  %v7888_v60 = vpack.c.bf16 %v756_v59, %v748_v12  ;;  %v764_v38 = vld [vmem:[%s9453_s3 + $0x3b0] sm:$0xff]  ;;  %v789_v59 = vld [vmem:[%s9453_s3 + $0x478] sm:$0xff] }
  0x9b   :  { %4386 = vmatprep.subr.bf16.mxu1 %v7831_v5 }
  0x9c   :  { %4448 = vmatpush1.bf16.msra.mxu0 %v6831_v2  ;;  %v772_v2 = vld [vmem:[%s9453_s3 + $0x3f0] sm:$0xff] }
  0x9d   :  { %4450 = vmatprep.subr.bf16.mxu0 %v6841_v6  ;;  %v765_v6 = vld [vmem:[%s9453_s3 + $0x3b8] sm:$0xff] }
  0x9e   :  { %4388 = vmatpush1.bf16.msra.mxu1 %v7848_v40  ;;  %v7891_v30 = vpack.c.bf16 %v773_v46, %v765_v6  ;;  %v7908_v6 = vpack.c.bf16 %v772_v2, %v764_v38  ;;  %v780_v46 = vld [vmem:[%s9453_s3 + $0x430] sm:$0xff]  ;;  %v805_v2 = vld [vmem:[%s9453_s3 + $0x4f8] sm:$0xff] }
  0x9f   :  { %4390 = vmatprep.subr.bf16.mxu1 %v7851_v16 }
  0xa0   :  { %4452 = vmatpush1.bf16.msra.mxu0 %v6864_v13  ;;  %9808 = vst [vmem:[#allocation102_spill] sm:$0xff] %v7908_v6  ;;  %v788_v13 = vld [vmem:[%s9453_s3 + $0x470] sm:$0xff] }
  0xa1   :  { %4454 = vmatprep.subr.bf16.mxu0 %v6867_v14  ;;  %v781_v14 = vld [vmem:[%s9453_s3 + $0x438] sm:$0xff] }
  0xa2   :  { %4392 = vmatpush1.bf16.msra.mxu1 %v7868_v49  ;;  %v7911_v12 = vpack.c.bf16 %v789_v59, %v781_v14  ;;  %v7928_v14 = vpack.c.bf16 %v788_v13, %v780_v46  ;;  %v796_v59 = vld [vmem:[%s9453_s3 + $0x4b0] sm:$0xff]  ;;  %v821_v13 = vld [vmem:[%s9453_s3 + $0x578] sm:$0xff] }
  0xa3   :  { %4394 = vmatprep.subr.bf16.mxu1 %v7871_v19 }
  0xa4   :  { %4456 = vmatpush1.bf16.msra.mxu0 %v6893_v20  ;;  %9809 = vst [vmem:[#allocation103_spill] sm:$0xff] %v7911_v12  ;;  %9810 = vst [vmem:[#allocation104_spill] sm:$0xff] %v7928_v14  ;;  %v804_v20 = vld [vmem:[%s9453_s3 + $0x4f0] sm:$0xff] }
  0xa5   :  { %4458 = vmatprep.subr.bf16.mxu0 %v6896_v21  ;;  %v797_v21 = vld [vmem:[%s9453_s3 + $0x4b8] sm:$0xff] }
  0xa6   :  { %4396 = vmatpush1.bf16.msra.mxu1 %v7888_v60  ;;  %v7931_v38 = vpack.c.bf16 %v805_v2, %v797_v21  ;;  %v7948_v21 = vpack.c.bf16 %v804_v20, %v796_v59  ;;  %v812_v2 = vld [vmem:[%s9453_s3 + $0x530] sm:$0xff]  ;;  %v837_v20 = vld [vmem:[%s9453_s3 + $0x5f8] sm:$0xff] }
  0xa7   :  { %4398 = vmatprep.subr.bf16.mxu1 %v7891_v30 }
  0xa8   :  { %4460 = vmatpush1.bf16.msra.mxu0 %v6922_v27  ;;  %9811 = vst [vmem:[#allocation105_spill] sm:$0xff] %v7931_v38  ;;  %9812 = vst [vmem:[#allocation106_spill] sm:$0xff] %v7948_v21  ;;  %v820_v27 = vld [vmem:[%s9453_s3 + $0x570] sm:$0xff] }
  0xa9   :  { %4462 = vmatprep.subr.bf16.mxu0 %v6925_v28  ;;  %v813_v28 = vld [vmem:[%s9453_s3 + $0x538] sm:$0xff] }
  0xaa   :  { %4400 = vmatpush1.bf16.msra.mxu1 %v7908_v6  ;;  %v7951_v46 = vpack.c.bf16 %v821_v13, %v813_v28  ;;  %v7968_v28 = vpack.c.bf16 %v820_v27, %v812_v2  ;;  %v828_v13 = vld [vmem:[%s9453_s3 + $0x5b0] sm:$0xff]  ;;  %v853_v27 = vld [vmem:[%s9453_s3 + $0x678] sm:$0xff] }
  0xab   :  { %4402 = vmatprep.subr.bf16.mxu1 %v7911_v12 }
  0xac   :  { %4464 = vmatpush1.bf16.msra.mxu0 %v6951_v36  ;;  %9813 = vst [vmem:[#allocation107_spill] sm:$0xff] %v7951_v46  ;;  %9814 = vst [vmem:[#allocation108_spill] sm:$0xff] %v7968_v28  ;;  %v836_v36 = vld [vmem:[%s9453_s3 + $0x5f0] sm:$0xff] }
  0xad   :  { %4466 = vmatprep.subr.bf16.mxu0 %v6963_v42  ;;  %v829_v42 = vld [vmem:[%s9453_s3 + $0x5b8] sm:$0xff] }
  0xae   :  { %4404 = vmatpush1.bf16.msra.mxu1 %v7928_v14  ;;  %v7971_v59 = vpack.c.bf16 %v837_v20, %v829_v42  ;;  %v7988_v42 = vpack.c.bf16 %v836_v36, %v828_v13  ;;  %v844_v20 = vld [vmem:[%s9453_s3 + $0x630] sm:$0xff]  ;;  %v869_v36 = vld [vmem:[%s9453_s3 + $0x6f8] sm:$0xff] }
  0xaf   :  { %4406 = vmatprep.subr.bf16.mxu1 %v7931_v38 }
  0xb0   :  { %4468 = vmatpush1.bf16.msra.mxu0 %v6987_v52  ;;  %9815 = vst [vmem:[#allocation109_spill] sm:$0xff] %v7971_v59  ;;  %9816 = vst [vmem:[#allocation110_spill] sm:$0xff] %v7988_v42  ;;  %v852_v52 = vld [vmem:[%s9453_s3 + $0x670] sm:$0xff] }
  0xb1   :  { %4470 = vmatprep.subr.bf16.mxu0 %v6999_v58  ;;  %v845_v58 = vld [vmem:[%s9453_s3 + $0x638] sm:$0xff] }
  0xb2   :  { %4408 = vmatpush1.bf16.msra.mxu1 %v7948_v21  ;;  %v7991_v2 = vpack.c.bf16 %v853_v27, %v845_v58  ;;  %v8008_v58 = vpack.c.bf16 %v852_v52, %v844_v20  ;;  %v860_v27 = vld [vmem:[%s9453_s3 + $0x6b0] sm:$0xff]  ;;  %v885_v52 = vld [vmem:[%s9453_s3 + $0x778] sm:$0xff] }
  0xb3   :  { %4410 = vmatprep.subr.bf16.mxu1 %v7951_v46 }
  0xb4   :  { %4472 = vmatpush1.bf16.msra.mxu0 %v7023_v7  ;;  %9817 = vst [vmem:[#allocation111_spill] sm:$0xff] %v7991_v2  ;;  %9818 = vst [vmem:[#allocation112_spill] sm:$0xff] %v8008_v58  ;;  %v868_v7 = vld [vmem:[%s9453_s3 + $0x6f0] sm:$0xff] }
  0xb5   :  { %4474 = vmatprep.subr.bf16.mxu0 %v7028_v9  ;;  %v861_v9 = vld [vmem:[%s9453_s3 + $0x6b8] sm:$0xff] }
  0xb6   :  { %4412 = vmatpush1.bf16.msra.mxu1 %v7968_v28  ;;  %v8011_v13 = vpack.c.bf16 %v869_v36, %v861_v9  ;;  %v8028_v9 = vpack.c.bf16 %v868_v7, %v860_v27  ;;  %v876_v36 = vld [vmem:[%s9453_s3 + $0x730] sm:$0xff]  ;;  %v901_v7 = vld [vmem:[%s9453_s3 + $0x7f8] sm:$0xff] }
  0xb7   :  { %4414 = vmatprep.subr.bf16.mxu1 %v7971_v59 }
  0xb8   :  { %4476 = vmatpush1.bf16.msra.mxu0 %v7046_v17  ;;  %9819 = vst [vmem:[#allocation113_spill] sm:$0xff] %v8011_v13  ;;  %9820 = vst [vmem:[#allocation114_spill] sm:$0xff] %v8028_v9  ;;  %v884_v17 = vld [vmem:[%s9453_s3 + $0x770] sm:$0xff] }
  0xb9   :  { %4478 = vmatprep.subr.bf16.mxu0 %v7050_v18  ;;  %v877_v18 = vld [vmem:[%s9453_s3 + $0x738] sm:$0xff] }
  0xba   :  { %4416 = vmatpush1.bf16.msra.mxu1 %v7988_v42  ;;  %v8031_v20 = vpack.c.bf16 %v885_v52, %v877_v18  ;;  %v8048_v18 = vpack.c.bf16 %v884_v17, %v876_v36  ;;  %v892_v52 = vld [vmem:[%s9453_s3 + $0x7b0] sm:$0xff]  ;;  %v8088_v36 = vld [vmem:[%s9455_s2] sm:$0xff] }
  0xbb   :  { %4418 = vmatprep.subr.bf16.mxu1 %v7991_v2 }
  0xbc   :  { %4480 = vmatpush1.bf16.msra.mxu0 %v7068_v29  ;;  %9821 = vst [vmem:[#allocation115_spill] sm:$0xff] %v8031_v20  ;;  %9822 = vst [vmem:[#allocation116_spill] sm:$0xff] %v8048_v18  ;;  %v900_v29 = vld [vmem:[%s9453_s3 + $0x7f0] sm:$0xff] }
  0xbd   :  { %4482 = vmatprep.subr.bf16.mxu0 %v7071_v31  ;;  %v893_v31 = vld [vmem:[%s9453_s3 + $0x7b8] sm:$0xff]  ;;  %v8062_v17 = vpack.c.bf16 %v900_v29, %v892_v52  ;;  %v65_v29 = vlaneseq }
  0xbe   :  { %4420 = vmatpush1.bf16.msra.mxu1 %v8008_v58  ;;  %v8051_v27 = vpack.c.bf16 %v901_v7, %v893_v31 }
  0xbf   :  { %4422 = vmatprep.subr.bf16.mxu1 %v8011_v13  ;;  %9824 = vst [vmem:[#allocation118_spill] sm:$0xff] %v8062_v17  ;;  %v8079_v31 = vshrl.u32 %v65_v29, 7 }
  0xc0   :  { %4484 = vmatpush1.bf16.msra.mxu0 %v7089_v41  ;;  %9823 = vst [vmem:[#allocation117_spill] sm:$0xff] %v8051_v27  ;;  %v9828_v41 = vld [vmem:[#allocation64_spill] sm:$0xff] }
  0xc1   :  { %4486 = vmatprep.subr.bf16.mxu0 %v7092_v43  ;;  %v71_v52 = vsub.s32 1, %v8079_v31 }
  0xc2   :  { %4424 = vmatpush1.bf16.msra.mxu1 %v8028_v9 }
  0xc3   :  { %4426 = vmatprep.subr.bf16.mxu1 %v8031_v20 }
  0xc4   :  { %4488 = vmatpush1.bf16.msra.mxu0 %v7110_v51 }
  0xc5   :  { %4490 = vmatprep.subr.bf16.mxu0 %v7113_v53 }
  0xc6   :  { %4428 = vmatpush1.bf16.msra.mxu1 %v8048_v18 }
  0xc7   :  { %4430 = vmatprep.subr.bf16.mxu1 %v8051_v27 }
  0xc8   :  { %4492 = vmatpush1.bf16.msra.mxu0 %v7131_v62 }
  0xc9   :  { %4494 = vmatprep.subr.bf16.mxu0 %v7134_v63  ;;  %v8101_v63 = vrot.slane %v8088_v36, %v71_v52 }
  0xca   :  { %4432 = vmatpush1.bf16.msra.mxu1 %v8062_v17 }
  0xcb   :  { %4498 = vmatprep.subr.bf16.mxu1 %v7025_v8 }
  0xcc   :  { %4496 = vmatpush1.bf16.msra.mxu0 %v7152_v11  ;;  %v9825_v11 = vld [vmem:[#allocation60_spill] sm:$0xff] }
  0xcd   :  { %1180 = vmatmul.mubr.f32.vlgmr.msra.gmra.mrb[50].mxu1 %v9807_v45  ;;  %4562 = vmatprep.subr.bf16.mxu0 %v7164_v23  ;;  %v67_v45 = vsub.s32 0, %v8079_v31 }
  0xce   :  { %4500 = vmatpush1.bf16.msra.mxu1 %v7184_v39 }
  0xcf   :  { %4502 = vmatprep.subr.bf16.mxu1 %v7189_v47  ;;  %v8097_v29 = vrot.slane %v8088_v36, %v67_v45 }
  0xd2   :  { %4504 = vmatpush1.bf16.msra.mxu1 %v7222_v10 }
  0xd3   :  { %4506 = vmatprep.subr.bf16.mxu1 %v7228_v34 }
  0xd6   :  { %4508 = vmatpush1.bf16.msra.mxu1 %v7262_v54 }
  0xd7   :  { %4510 = vmatprep.subr.bf16.mxu1 %v7269_v61 }
  0xda   :  { %4512 = vmatpush1.bf16.msra.mxu1 %v7301_v37 }
  0xdb   :  { %4514 = vmatprep.subr.bf16.mxu1 %v7308_v50 }
  0xde   :  { %4516 = vmatpush1.bf16.msra.mxu1 %v7340_v33  ;;  %v83_v33 = vsub.s32 4, %v8079_v31 }
  0xdf   :  { %4518 = vmatprep.subr.bf16.mxu1 %v7347_v56 }
  0xe0   :  { %v8090_v7 = vpop.f32.mrb[0].mxu1 }
  0xe1   :  { %v8093_v23 = vpop.f32.mrb[1].mxu1 }
  0xe2   :  { %4520 = vmatpush1.bf16.msra.mxu1 %v7379_v32 }
  0xe3   :  { %4522 = vmatprep.subr.bf16.mxu1 %v9825_v11 }
  0xe4   :  { %v202_v62 = vpop.f32.mrb[2].mxu1 }
  0xe5   :  { %v8104_v53 = vadd.f32 %v202_v62, %v8097_v29  ;;  %v204_v51 = vpop.f32.mrb[3].mxu1  ;;  %v9831_v62 = vld [vmem:[#allocation68_spill] sm:$0xff] }
  0xe6   :  { %v8107_v43 = vadd.f32 %v204_v51, %v8101_v63  ;;  %4524 = vmatpush1.bf16.msra.mxu1 %v7418_v24 }
  0xe7   :  { %9826 = vst [vmem:[#allocation119_spill] sm:$0xff] %v8104_v53  ;;  %4526 = vmatprep.subr.bf16.mxu1 %v9828_v41  ;;  %v9834_v41 = vld [vmem:[#allocation70_spill] sm:$0xff] }
  0xe8   :  { %9827 = vst [vmem:[#allocation120_spill] sm:$0xff] %v8107_v43  ;;  %v208_v32 = vpop.f32.mrb[4].mxu1 }
  0xe9   :  { %v8112_v45 = vadd.f32 %v208_v32, %v8097_v29  ;;  %v210_v11 = vpop.f32.mrb[5].mxu1  ;;  %v9835_v32 = vld [vmem:[#allocation72_spill] sm:$0xff] }
  0xea   :  { %v8115_v52 = vadd.f32 %v210_v11, %v8101_v63  ;;  %4528 = vmatpush1.bf16.msra.mxu1 %v7457_v22 }
  0xeb   :  { %9829 = vst [vmem:[#allocation121_spill] sm:$0xff] %v8112_v45  ;;  %4530 = vmatprep.subr.bf16.mxu1 %v9831_v62  ;;  %v9838_v62 = vld [vmem:[#allocation74_spill] sm:$0xff] }
  0xec   :  { %9830 = vst [vmem:[#allocation122_spill] sm:$0xff] %v8115_v52  ;;  %v214_v53 = vpop.f32.mrb[6].mxu1 }
  0xed   :  { %v8120_v51 = vadd.f32 %v214_v53, %v8097_v29  ;;  %v216_v43 = vpop.f32.mrb[7].mxu1  ;;  %v9839_v53 = vld [vmem:[#allocation76_spill] sm:$0xff] }
  0xee   :  { %v8123_v24 = vadd.f32 %v216_v43, %v8101_v63  ;;  %4532 = vmatpush1.bf16.msra.mxu1 %v9834_v41 }
  0xef   :  { %9832 = vst [vmem:[#allocation123_spill] sm:$0xff] %v8120_v51  ;;  %4534 = vmatprep.subr.bf16.mxu1 %v9835_v32  ;;  %v9842_v32 = vld [vmem:[#allocation78_spill] sm:$0xff] }
  0xf0   :  { %9833 = vst [vmem:[#allocation124_spill] sm:$0xff] %v8123_v24  ;;  %v220_v45 = vpop.f32.mrb[8].mxu1 }
  0xf1   :  { %v8128_v11 = vadd.f32 %v220_v45, %v8097_v29  ;;  %v222_v52 = vpop.f32.mrb[9].mxu1  ;;  %v9843_v45 = vld [vmem:[#allocation80_spill] sm:$0xff] }
  0xf2   :  { %v8131_v22 = vadd.f32 %v222_v52, %v8101_v63  ;;  %4536 = vmatpush1.bf16.msra.mxu1 %v9838_v62 }
  0xf3   :  { %9836 = vst [vmem:[#allocation125_spill] sm:$0xff] %v8128_v11  ;;  %4538 = vmatprep.subr.bf16.mxu1 %v9839_v53  ;;  %v79_v53 = vsub.s32 3, %v8079_v31 }
  0xf4   :  { %9837 = vst [vmem:[#allocation126_spill] sm:$0xff] %v8131_v22  ;;  %v226_v51 = vpop.f32.mrb[10].mxu1 }
  0xf5   :  { %v8136_v43 = vadd.f32 %v226_v51, %v8097_v29  ;;  %v228_v24 = vpop.f32.mrb[11].mxu1  ;;  %v9846_v51 = vld [vmem:[#allocation82_spill] sm:$0xff] }
  0xf6   :  { %v8139_v41 = vadd.f32 %v228_v24, %v8101_v63  ;;  %4540 = vmatpush1.bf16.msra.mxu1 %v9842_v32 }
  0xf7   :  { %9840 = vst [vmem:[#allocation127_spill] sm:$0xff] %v8136_v43  ;;  %4542 = vmatprep.subr.bf16.mxu1 %v9843_v45  ;;  %v9847_v43 = vld [vmem:[#allocation84_spill] sm:$0xff] }
  0xf8   :  { %9841 = vst [vmem:[#allocation128_spill] sm:$0xff] %v8139_v41  ;;  %v232_v11 = vpop.f32.mrb[12].mxu1 }
  0xf9   :  { %v8144_v52 = vadd.f32 %v232_v11, %v8097_v29  ;;  %v234_v22 = vpop.f32.mrb[13].mxu1  ;;  %v8159_v11 = vrot.slane %v8088_v36, %v79_v53 }
  0xfa   :  { %v8147_v62 = vadd.f32 %v234_v22, %v8101_v63  ;;  %4544 = vmatpush1.bf16.msra.mxu1 %v9846_v51  ;;  %v75_v22 = vsub.s32 2, %v8079_v31 }
  0xfb   :  { %9844 = vst [vmem:[#allocation129_spill] sm:$0xff] %v8144_v52  ;;  %4546 = vmatprep.subr.bf16.mxu1 %v9847_v43  ;;  %v9850_v52 = vld [vmem:[#allocation86_spill] sm:$0xff] }
  0xfc   :  { %9845 = vst [vmem:[#allocation130_spill] sm:$0xff] %v8147_v62  ;;  %v238_v24 = vpop.f32.mrb[14].mxu1  ;;  %v9851_v62 = vld [vmem:[#allocation88_spill] sm:$0xff] }
  0xfd   :  { %v8153_v41 = vadd.f32 %v238_v24, %v8097_v29  ;;  %v240_v32 = vpop.f32.mrb[15].mxu1 }
  0xfe   :  { %v8156_v45 = vadd.f32 %v240_v32, %v8101_v63  ;;  %4548 = vmatpush1.bf16.msra.mxu1 %v9850_v52  ;;  %v8171_v32 = vrot.slane %v8088_v36, %v75_v22 }
  0xff   :  { %9848 = vst [vmem:[#allocation131_spill] sm:$0xff] %v8153_v41  ;;  %4550 = vmatprep.subr.bf16.mxu1 %v9851_v62 }
 0x100   :  { %9849 = vst [vmem:[#allocation132_spill] sm:$0xff] %v8156_v45  ;;  %v8164_v51 = vpop.f32.mrb[16].mxu1 }
 0x101   :  { %v311_v43 = vpop.f32.mrb[17].mxu1 }
 0x102   :  { %v8167_v56 = vadd.f32 %v311_v43, %v8159_v11  ;;  %4552 = vmatpush1.bf16.msra.mxu1 %v7677_v55 }
 0x103   :  { %4554 = vmatprep.subr.bf16.mxu1 %v7683_v35 }
 0x104   :  { %9852 = vst [vmem:[#allocation133_spill] sm:$0xff] %v8167_v56  ;;  %v315_v53 = vpop.f32.mrb[18].mxu1 }
 0x105   :  { %v8175_v24 = vadd.f32 %v315_v53, %v8171_v32  ;;  %v317_v45 = vpop.f32.mrb[19].mxu1 }
 0x106   :  { %v8178_v41 = vadd.f32 %v317_v45, %v8159_v11  ;;  %4556 = vmatpush1.bf16.msra.mxu1 %v7713_v44 }
 0x107   :  { %9853 = vst [vmem:[#allocation134_spill] sm:$0xff] %v8175_v24  ;;  %4558 = vmatprep.subr.bf16.mxu1 %v7719_v1 }
 0x108   :  { %9854 = vst [vmem:[#allocation135_spill] sm:$0xff] %v8178_v41  ;;  %v321_v43 = vpop.f32.mrb[20].mxu1 }
 0x109   :  { %v8183_v56 = vadd.f32 %v321_v43, %v8171_v32  ;;  %v323_v22 = vpop.f32.mrb[21].mxu1 }
 0x10a   :  { %v8186_v55 = vadd.f32 %v323_v22, %v8159_v11  ;;  %4560 = vmatpush1.bf16.msra.mxu1 %v7743_v0 }
 0x10b   :  { %9855 = vst [vmem:[#allocation136_spill] sm:$0xff] %v8183_v56  ;;  %4626 = vmatprep.subr.bf16.mxu1 %v7749_v48 }
 0x10c   :  { %9856 = vst [vmem:[#allocation137_spill] sm:$0xff] %v8186_v55  ;;  %v327_v53 = vpop.f32.mrb[22].mxu1 }
 0x10d   :  { %v8191_v45 = vadd.f32 %v327_v53, %v8171_v32  ;;  %v329_v41 = vpop.f32.mrb[23].mxu1 }
 0x10e   :  { %v8194_v24 = vadd.f32 %v329_v41, %v8159_v11 }
 0x10f   :  { %9857 = vst [vmem:[#allocation138_spill] sm:$0xff] %v8191_v45 }
 0x110   :  { %9858 = vst [vmem:[#allocation139_spill] sm:$0xff] %v8194_v24  ;;  %v333_v1 = vpop.f32.mrb[24].mxu1 }
 0x111   :  { %v8197_v43 = vadd.f32 %v333_v1, %v8171_v32  ;;  %v335_v56 = vpop.f32.mrb[25].mxu1 }
 0x112   :  { %v8200_v22 = vadd.f32 %v335_v56, %v8159_v11 }
 0x113   :  { %9859 = vst [vmem:[#allocation140_spill] sm:$0xff] %v8197_v43  ;;  %v95_v43 = vsub.s32 7, %v8079_v31 }
 0x114   :  { %9860 = vst [vmem:[#allocation141_spill] sm:$0xff] %v8200_v22  ;;  %v339_v55 = vpop.f32.mrb[26].mxu1 }
 0x115   :  { %v8203_v0 = vadd.f32 %v339_v55, %v8171_v32  ;;  %v341_v48 = vpop.f32.mrb[27].mxu1 }
 0x116   :  { %v8206_v53 = vadd.f32 %v341_v48, %v8159_v11  ;;  %v91_v48 = vsub.s32 6, %v8079_v31 }
 0x117   :  { %9861 = vst [vmem:[#allocation142_spill] sm:$0xff] %v8203_v0  ;;  %v8219_v0 = vrot.slane %v8088_v36, %v95_v43 }
 0x118   :  { %9862 = vst [vmem:[#allocation143_spill] sm:$0xff] %v8206_v53  ;;  %v345_v45 = vpop.f32.mrb[28].mxu1  ;;  %v8232_v43 = vrot.slane %v8088_v36, %v91_v48 }
 0x119   :  { %v8209_v41 = vadd.f32 %v345_v45, %v8171_v32  ;;  %v347_v24 = vpop.f32.mrb[29].mxu1  ;;  %v197_v45 = vadd.f32 %v8090_v7, %v8097_v29 }
 0x11a   :  { %v8212_v1 = vadd.f32 %v347_v24, %v8159_v11  ;;  %v199_v24 = vadd.f32 %v8093_v23, %v8101_v63 }
 0x11b   :  { %9863 = vst [vmem:[#allocation144_spill] sm:$0xff] %v8209_v41 }
 0x11c   :  { %9864 = vst [vmem:[#allocation145_spill] sm:$0xff] %v8212_v1  ;;  %v351_v56 = vpop.f32.mrb[30].mxu1 }
 0x11d   :  { %v8216_v22 = vadd.f32 %v351_v56, %v8171_v32  ;;  %v353_v55 = vpop.f32.mrb[31].mxu1 }
 0x11f   :  { %9865 = vst [vmem:[#allocation146_spill] sm:$0xff] %v8216_v22 }
 0x120   :  { %v8224_v41 = vpop.f32.mrb[32].mxu1 }
 0x121   :  { %v537_v1 = vpop.f32.mrb[33].mxu1 }
 0x122   :  { %v968_v53 = vpop.f32.mrb[16].mxu0  ;;  %v8229_v56 = vadd.f32 %v537_v1, %v8219_v0 }
 0x123   :  { %v1192_v44 = vadd.f32 %v968_v53, %v197_v45  ;;  %v970_v22 = vpop.f32.mrb[17].mxu0 }
 0x124   :  { %9866 = vst [vmem:[#allocation147_spill] sm:$0xff] %v8229_v56  ;;  %v1193_v35 = vadd.f32 %v970_v22, %v199_v24  ;;  %v541_v62 = vpop.f32.mrb[34].mxu1 }
 0x125   :  { %v8235_v52 = vadd.f32 %v541_v62, %v8232_v43  ;;  %v543_v7 = vpop.f32.mrb[35].mxu1 }
 0x126   :  { %v8238_v29 = vadd.f32 %v543_v7, %v8219_v0 }
 0x127   :  { %9867 = vst [vmem:[#allocation148_spill] sm:$0xff] %v8235_v52 }
 0x128   :  { %9868 = vst [vmem:[#allocation149_spill] sm:$0xff] %v8238_v29  ;;  %v547_v63 = vpop.f32.mrb[36].mxu1 }
 0x129   :  { %v8241_v23 = vadd.f32 %v547_v63, %v8232_v43  ;;  %v549_v53 = vpop.f32.mrb[37].mxu1 }
 0x12a   :  { %v8244_v1 = vadd.f32 %v549_v53, %v8219_v0 }
 0x12b   :  { %9869 = vst [vmem:[#allocation150_spill] sm:$0xff] %v8241_v23 }
 0x12c   :  { %9870 = vst [vmem:[#allocation151_spill] sm:$0xff] %v8244_v1  ;;  %v553_v45 = vpop.f32.mrb[38].mxu1 }
 0x12d   :  { %v8247_v48 = vadd.f32 %v553_v45, %v8232_v43  ;;  %v555_v22 = vpop.f32.mrb[39].mxu1 }
 0x12e   :  { %v8250_v62 = vadd.f32 %v555_v22, %v8219_v0 }
 0x12f   :  { %9871 = vst [vmem:[#allocation152_spill] sm:$0xff] %v8247_v48 }
 0x130   :  { %9872 = vst [vmem:[#allocation153_spill] sm:$0xff] %v8250_v62  ;;  %v559_v24 = vpop.f32.mrb[40].mxu1 }
 0x131   :  { %v8253_v7 = vadd.f32 %v559_v24, %v8232_v43  ;;  %v561_v56 = vpop.f32.mrb[41].mxu1 }
 0x132   :  { %v8256_v63 = vadd.f32 %v561_v56, %v8219_v0 }
 0x133   :  { %9873 = vst [vmem:[#allocation154_spill] sm:$0xff] %v8253_v7 }
 0x134   :  { %9874 = vst [vmem:[#allocation155_spill] sm:$0xff] %v8256_v63  ;;  %v565_v29 = vpop.f32.mrb[42].mxu1 }
 0x135   :  { %v8259_v53 = vadd.f32 %v565_v29, %v8232_v43  ;;  %v567_v1 = vpop.f32.mrb[43].mxu1  ;;  %v310_v29 = vadd.f32 %v8164_v51, %v8171_v32 }
 0x136   :  { %v8262_v45 = vadd.f32 %v567_v1, %v8219_v0 }
 0x137   :  { %9875 = vst [vmem:[#allocation156_spill] sm:$0xff] %v8259_v53  ;;  %v354_v53 = vadd.f32 %v353_v55, %v8159_v11  ;;  %v87_v11 = vsub.s32 5, %v8079_v31  ;;  %v536_v31 = vadd.f32 %v8224_v41, %v8232_v43 }
 0x138   :  { %9876 = vst [vmem:[#allocation157_spill] sm:$0xff] %v8262_v45  ;;  %v571_v48 = vpop.f32.mrb[44].mxu1 }
 0x139   :  { %v8265_v22 = vadd.f32 %v571_v48, %v8232_v43  ;;  %v573_v62 = vpop.f32.mrb[45].mxu1  ;;  %v8283_v32 = vrot.slane %v8088_v36, %v87_v11 }
 0x13a   :  { %v8268_v24 = vadd.f32 %v573_v62, %v8219_v0  ;;  %v8278_v62 = vrot.slane %v8088_v36, %v83_v33 }
 0x13b   :  { %9877 = vst [vmem:[#allocation158_spill] sm:$0xff] %v8265_v22 }
 0x13c   :  { %9878 = vst [vmem:[#allocation159_spill] sm:$0xff] %v8268_v24  ;;  %v577_v7 = vpop.f32.mrb[46].mxu1  ;;  %v4040_v24 = vmul.f32 -1.442695, %v1192_v44 }
 0x13d   :  { %v8271_v56 = vadd.f32 %v577_v7, %v8232_v43  ;;  %v579_v63 = vpop.f32.mrb[47].mxu1  ;;  %v4041_v7 = vmul.f32 -1.442695, %v1193_v35 }
 0x13e   :  { %6322 = vpow2.f32 %v4040_v24  ;;  %v580_v36 = vadd.f32 %v579_v63, %v8219_v0 }
 0x13f   :  { %9879 = vst [vmem:[#allocation160_spill] sm:$0xff] %v8271_v56  ;;  %6324 = vpow2.f32 %v4041_v7 }
 0x148   :  { %v6323_v55 = vpop.eup %6322 }
 0x160   :  { %v1039_v1 = vpop.f32.mrb[48].mxu1 }
 0x161   :  { %v1194_v45 = vadd.f32 %v1039_v1, %v310_v29  ;;  %v1041_v23 = vpop.f32.mrb[49].mxu1 }
 0x162   :  { %v1110_v52 = vpop.f32.mrb[14].mxu0  ;;  %v1219_v48 = vadd.f32 %v1041_v23, %v354_v53  ;;  %v6325_v23 = vpop.eup %6324  ;;  %v1204_v53 = vadd.f32 1.0, %v6323_v55 }
 0x163   :  { %v1112_v22 = vpop.f32.mrb[15].mxu0  ;;  %v6303_v56 = vadd.f32 %v1110_v52, %v8278_v62  ;;  %v1205_v35 = vadd.f32 1.0, %v6325_v23  ;;  %v4042_v52 = vmul.f32 -1.442695, %v1194_v45 }
 0x164   :  { %v4043_v50 = vmul.f32 -1.442695, %v1219_v48  ;;  %v6304_v33 = vadd.f32 %v1112_v22, %v8283_v32 }
 0x165   :  { %v4044_v51 = vmul.f32 -1.442695, %v6303_v56 }
 0x166   :  { %6326 = vpow2.f32 %v4043_v50  ;;  %v4045_v24 = vmul.f32 -1.442695, %v6304_v33 }
 0x167   :  { %6328 = vpow2.f32 %v4044_v51 }
 0x168   :  { %6330 = vrcp.f32 %v1204_v53 }
 0x169   :  { %6332 = vrcp.f32 %v1205_v35 }
 0x16a   :  { %6334 = vpow2.f32 %v4042_v52 }
 0x16b   :  { %6336 = vpow2.f32 %v4045_v24 }
 0x170   :  { %v6327_v44 = vpop.eup %6326 }
 0x171   :  { %v6329_v29 = vpop.eup %6328  ;;  %v1231_v1 = vadd.f32 1.0, %v6327_v44 }
 0x172   :  { %v1232_v50 = vadd.f32 1.0, %v6329_v29  ;;  %v6331_v45 = vpop.eup %6330 }
 0x173   :  { %6338 = vrcp.f32 %v1231_v1  ;;  %v6333_v51 = vpop.eup %6332 }
 0x174   :  { %6340 = vrcp.f32 %v1232_v50  ;;  %v6335_v11 = vpop.eup %6334  ;;  %v1246_v44 = vmul.f32 0.0, %v6333_v51  ;;  %v9885_v51 = vld [vmem:[#allocation43_spill] sm:$0xff] }
 0x175   :  { %v6337_v55 = vpop.eup %6336  ;;  %v1206_v29 = vadd.f32 1.0, %v6335_v11  ;;  %v9886_v11 = vld [vmem:[#allocation45_spill] sm:$0xff] }
 0x176   :  { %v1233_v41 = vadd.f32 1.0, %v6337_v55  ;;  %v9887_v55 = vld [vmem:[#allocation47_spill] sm:$0xff] }
 0x17d   :  { %v6339_v23 = vpop.eup %6338 }
 0x17e   :  { %v6341_v33 = vpop.eup %6340 }
 0x17f   :  { %v1249_v63 = vmul.f32 0.0, %v6341_v33  ;;  %v9889_v33 = vld [vmem:[#allocation51_spill] sm:$0xff] }
 0x1a0   :  { %v1181_v56 = vpop.f32.mrb[50].mxu1 }
 0x1a1   :  { %v1241_v22 = vadd.f32 %v1181_v56, %v536_v31  ;;  %v1183_v48 = vpop.f32.mrb[51].mxu1 }
 0x1a2   :  { %v1244_v7 = vadd.f32 %v1183_v48, %v580_v36  ;;  %v9882_v48 = vld [vmem:[#allocation39_spill] sm:$0xff] }
 0x1a3   :  { %6342 = vtanh.f32 %v1241_v22 }
 0x1a4   :  { %6344 = vtanh.f32 %v1244_v7  ;;  %v9883_v7 = vld [vmem:[#allocation41_spill] sm:$0xff] }
 0x1a5   :  { %6346 = vrcp.f32 %v1233_v41  ;;  %v9891_v41 = vld [vmem:[#allocation55_spill] sm:$0xff] }
 0x1ad   :  { %v6343_v53 = vpop.eup %6342 }
 0x1ae   :  { %v6345_v43 = vpop.eup %6344  ;;  %v1247_v0 = vmul.f32 %v6343_v53, %v6331_v45  ;;  %v9884_v45 = vld [vmem:[#allocation101_spill] sm:$0xff] }
 0x1af   :  { %v1250_v35 = vmul.f32 %v6345_v43, %v6339_v23  ;;  %v6347_v1 = vpop.eup %6346  ;;  %v9888_v23 = vld [vmem:[#allocation49_spill] sm:$0xff] }
 0x1b0   :  { %v8289_v52 = vadd.f32 %v1247_v0, %v1246_v44  ;;  %v9890_v53 = vld [vmem:[#allocation53_spill] sm:$0xff]  ;;  %v9893_v44 = vld [vmem:[#allocation59_spill] sm:$0xff] }
 0x1b1   :  { %v8291_v24 = vadd.f32 %v1250_v35, %v1249_v63  ;;  %v9892_v43 = vld [vmem:[#allocation57_spill] sm:$0xff]  ;;  %v9895_v63 = vld [vmem:[#allocation63_spill] sm:$0xff] }
 0x1b2   :  { %6348 = vtanh.f32 %v8289_v52  ;;  %v9894_v0 = vld [vmem:[#allocation61_spill] sm:$0xff] }
 0x1b3   :  { %6350 = vtanh.f32 %v8291_v24  ;;  %v9896_v35 = vld [vmem:[#allocation65_spill] sm:$0xff] }
 0x1b4   :  { %6352 = vrcp.f32 %v1206_v29  ;;  %v9897_v29 = vld [vmem:[#allocation67_spill] sm:$0xff] }
 0x1bc   :  { %v6349_v50 = vpop.eup %6348 }
 0x1bd   :  { %v6351_v31 = vpop.eup %6350 }
 0x1be   :  { %v6353_v36 = vpop.eup %6352  ;;  %v8295_v56 = vmul.f32 %v6351_v31, %v6347_v1  ;;  %v9898_v1 = vld [vmem:[#allocation69_spill] sm:$0xff] }
 0x1bf   :  { %v8297_v22 = vmul.f32 %v6353_v36, %v6349_v50  ;;  %v9899_v50 = vld [vmem:[#allocation71_spill] sm:$0xff]  ;;  %v9900_v31 = vld [vmem:[#allocation73_spill] sm:$0xff] }
 0x1c0   :  { %9880 = vst [vmem:[#allocation161_spill] sm:$0xff] %v8295_v56  ;;  %1328 = vmatprep.mubr.f32.mxu0 %v8295_v56  ;;  %1399 = vmatprep.mubr.f32.mxu1 %v8295_v56  ;;  %v9901_v36 = vld [vmem:[#allocation75_spill] sm:$0xff] }
 0x1c1   :  { %9881 = vst [vmem:[#allocation162_spill] sm:$0xff] %v8297_v22  ;;  %1329 = vmatmul.mubr.f32.vlgmr.msra.gmra.mrb[18].mxu0 %v8297_v22  ;;  %1400 = vmatmul.mubr.f32.vlgmr.msra.gmra.mrb[52].mxu1 %v8297_v22 }
 0x1c2   :  { %4564 = vmatpush1.bf16.msra.mxu0 %v9882_v48  ;;  %4628 = vmatpush1.bf16.msra.mxu1 %v7765_v3 }
 0x1c3   :  { %1470 = vmatprep.mubr.f32.mxu0 %v8295_v56  ;;  %1541 = vmatprep.mubr.f32.mxu1 %v8295_v56  ;;  %v9902_v56 = vld [vmem:[#allocation77_spill] sm:$0xff] }
 0x1c4   :  { %4566 = vmatprep.subr.bf16.mxu0 %v9883_v7  ;;  %4630 = vmatprep.subr.bf16.mxu1 %v9884_v45 }
 0x1c6   :  { %4568 = vmatpush1.bf16.msra.mxu0 %v9885_v51  ;;  %4632 = vmatpush1.bf16.msra.mxu1 %v7787_v26 }
 0x1c7   :  { %4570 = vmatprep.subr.bf16.mxu0 %v9886_v11  ;;  %4634 = vmatprep.subr.bf16.mxu1 %v7790_v15 }
 0x1ca   :  { %4572 = vmatpush1.bf16.msra.mxu0 %v9887_v55  ;;  %4636 = vmatpush1.bf16.msra.mxu1 %v7808_v25 }
 0x1cb   :  { %4574 = vmatprep.subr.bf16.mxu0 %v9888_v23  ;;  %4638 = vmatprep.subr.bf16.mxu1 %v7811_v57 }
 0x1ce   :  { %4576 = vmatpush1.bf16.msra.mxu0 %v9889_v33  ;;  %4640 = vmatpush1.bf16.msra.mxu1 %v7828_v4 }
 0x1cf   :  { %4578 = vmatprep.subr.bf16.mxu0 %v9890_v53  ;;  %4642 = vmatprep.subr.bf16.mxu1 %v7831_v5 }
 0x1d2   :  { %4580 = vmatpush1.bf16.msra.mxu0 %v9891_v41  ;;  %4644 = vmatpush1.bf16.msra.mxu1 %v7848_v40 }
 0x1d3   :  { %4582 = vmatprep.subr.bf16.mxu0 %v9892_v43  ;;  %4646 = vmatprep.subr.bf16.mxu1 %v7851_v16 }
 0x1d6   :  { %4584 = vmatpush1.bf16.msra.mxu0 %v9893_v44  ;;  %4648 = vmatpush1.bf16.msra.mxu1 %v7868_v49 }
 0x1d7   :  { %4586 = vmatprep.subr.bf16.mxu0 %v9894_v0  ;;  %4650 = vmatprep.subr.bf16.mxu1 %v7871_v19 }
 0x1da   :  { %4588 = vmatpush1.bf16.msra.mxu0 %v9895_v63  ;;  %4652 = vmatpush1.bf16.msra.mxu1 %v7888_v60 }
 0x1db   :  { %4590 = vmatprep.subr.bf16.mxu0 %v9896_v35  ;;  %4654 = vmatprep.subr.bf16.mxu1 %v7891_v30 }
 0x1de   :  { %4592 = vmatpush1.bf16.msra.mxu0 %v9897_v29  ;;  %4656 = vmatpush1.bf16.msra.mxu1 %v7908_v6  ;;  %v9903_v6 = vld [vmem:[#allocation79_spill] sm:$0xff] }
 0x1df   :  { %4594 = vmatprep.subr.bf16.mxu0 %v9898_v1  ;;  %4658 = vmatprep.subr.bf16.mxu1 %v7911_v12  ;;  %v9904_v12 = vld [vmem:[#allocation81_spill] sm:$0xff] }
 0x1e2   :  { %4596 = vmatpush1.bf16.msra.mxu0 %v9899_v50  ;;  %4660 = vmatpush1.bf16.msra.mxu1 %v7928_v14  ;;  %v9905_v14 = vld [vmem:[#allocation83_spill] sm:$0xff] }
 0x1e3   :  { %4598 = vmatprep.subr.bf16.mxu0 %v9900_v31  ;;  %4662 = vmatprep.subr.bf16.mxu1 %v7931_v38  ;;  %v9906_v38 = vld [vmem:[#allocation85_spill] sm:$0xff] }
 0x1e6   :  { %4600 = vmatpush1.bf16.msra.mxu0 %v9901_v36  ;;  %4664 = vmatpush1.bf16.msra.mxu1 %v7948_v21  ;;  %v9907_v21 = vld [vmem:[#allocation87_spill] sm:$0xff] }
 0x1e7   :  { %4602 = vmatprep.subr.bf16.mxu0 %v9902_v56  ;;  %4666 = vmatprep.subr.bf16.mxu1 %v7951_v46  ;;  %v9908_v46 = vld [vmem:[#allocation89_spill] sm:$0xff] }
 0x1ea   :  { %4604 = vmatpush1.bf16.msra.mxu0 %v9903_v6  ;;  %4668 = vmatpush1.bf16.msra.mxu1 %v7968_v28  ;;  %v9909_v28 = vld [vmem:[#allocation91_spill] sm:$0xff] }
 0x1eb   :  { %4606 = vmatprep.subr.bf16.mxu0 %v9904_v12  ;;  %4670 = vmatprep.subr.bf16.mxu1 %v7971_v59  ;;  %v9910_v59 = vld [vmem:[#allocation93_spill] sm:$0xff] }
 0x1ee   :  { %4608 = vmatpush1.bf16.msra.mxu0 %v9905_v14  ;;  %4672 = vmatpush1.bf16.msra.mxu1 %v7988_v42  ;;  %v9911_v42 = vld [vmem:[#allocation95_spill] sm:$0xff] }
 0x1ef   :  { %4610 = vmatprep.subr.bf16.mxu0 %v9906_v38  ;;  %4674 = vmatprep.subr.bf16.mxu1 %v7991_v2  ;;  %v9912_v2 = vld [vmem:[#allocation97_spill] sm:$0xff] }
 0x1f2   :  { %4612 = vmatpush1.bf16.msra.mxu0 %v9907_v21  ;;  %4676 = vmatpush1.bf16.msra.mxu1 %v8008_v58  ;;  %v9913_v58 = vld [vmem:[#allocation99_spill] sm:$0xff] }
 0x1f3   :  { %4614 = vmatprep.subr.bf16.mxu0 %v9908_v46  ;;  %4678 = vmatprep.subr.bf16.mxu1 %v8011_v13  ;;  %v9914_v13 = vld [vmem:[#allocation4_spill] sm:$0xff] }
 0x1f6   :  { %4616 = vmatpush1.bf16.msra.mxu0 %v9909_v28  ;;  %4680 = vmatpush1.bf16.msra.mxu1 %v8028_v9 }
 0x1f7   :  { %4618 = vmatprep.subr.bf16.mxu0 %v9910_v59  ;;  %4682 = vmatprep.subr.bf16.mxu1 %v8031_v20  ;;  %v9915_v20 = vld [vmem:[#allocation5_spill] sm:$0xff] }
 0x1fa   :  { %4620 = vmatpush1.bf16.msra.mxu0 %v9911_v42  ;;  %4684 = vmatpush1.bf16.msra.mxu1 %v8048_v18  ;;  %v9916_v18 = vld [vmem:[#allocation6_spill] sm:$0xff] }
 0x1fb   :  { %4622 = vmatprep.subr.bf16.mxu0 %v9912_v2  ;;  %4686 = vmatprep.subr.bf16.mxu1 %v8051_v27  ;;  %v9917_v27 = vld [vmem:[#allocation7_spill] sm:$0xff]  ;;  %v9975_v2 = vld [vmem:[#allocation145_spill] sm:$0xff] }
 0x1fe   :  { %4624 = vmatpush1.bf16.msra.mxu0 %v9913_v58  ;;  %4688 = vmatpush1.bf16.msra.mxu1 %v8062_v17  ;;  %v9918_v17 = vld [vmem:[#allocation8_spill] sm:$0xff] }
 0x1ff   :  { %4690 = vmatprep.subr.bf16.mxu0 %v9914_v13  ;;  %4754 = vmatprep.subr.bf16.mxu1 %v7025_v8  ;;  %v9919_v8 = vld [vmem:[#allocation9_spill] sm:$0xff]  ;;  %v9974_v58 = vld [vmem:[#allocation120_spill] sm:$0xff] }
 0x201   :  { %1471 = vmatmul.mubr.f32.vlgmr.msra.gmra.mrb[12].mxu0 %v8297_v22  ;;  %1542 = vmatmul.mubr.f32.vlgmr.msra.gmra.mrb[54].mxu1 %v8297_v22  ;;  %v9920_v22 = vld [vmem:[#allocation10_spill] sm:$0xff] }
 0x202   :  { %4692 = vmatpush1.bf16.msra.mxu0 %v9915_v20  ;;  %4756 = vmatpush1.bf16.msra.mxu1 %v7184_v39  ;;  %v9921_v39 = vld [vmem:[#allocation11_spill] sm:$0xff]  ;;  %v9973_v20 = vld [vmem:[#allocation134_spill] sm:$0xff] }
 0x203   :  { %4694 = vmatprep.subr.bf16.mxu0 %v9916_v18  ;;  %4758 = vmatprep.subr.bf16.mxu1 %v7189_v47  ;;  %v9922_v47 = vld [vmem:[#allocation12_spill] sm:$0xff]  ;;  %v9972_v18 = vld [vmem:[#allocation119_spill] sm:$0xff] }
 0x206   :  { %4696 = vmatpush1.bf16.msra.mxu0 %v9917_v27  ;;  %4760 = vmatpush1.bf16.msra.mxu1 %v7222_v10  ;;  %v9923_v27 = vld [vmem:[#allocation52_spill] sm:$0xff]  ;;  %v9924_v10 = vld [vmem:[#allocation13_spill] sm:$0xff] }
 0x207   :  { %4698 = vmatprep.subr.bf16.mxu0 %v9918_v17  ;;  %4762 = vmatprep.subr.bf16.mxu1 %v7228_v34  ;;  %v9925_v17 = vld [vmem:[#allocation54_spill] sm:$0xff] }
 0x208   :  { %v9926_v34 = vld [vmem:[#allocation14_spill] sm:$0xff] }
 0x20a   :  { %4700 = vmatpush1.bf16.msra.mxu0 %v9919_v8  ;;  %4764 = vmatpush1.bf16.msra.mxu1 %v7262_v54  ;;  %v9927_v8 = vld [vmem:[#allocation56_spill] sm:$0xff]  ;;  %v9928_v54 = vld [vmem:[#allocation15_spill] sm:$0xff] }
 0x20b   :  { %4702 = vmatprep.subr.bf16.mxu0 %v9920_v22  ;;  %4766 = vmatprep.subr.bf16.mxu1 %v7269_v61  ;;  %v9929_v22 = vld [vmem:[#allocation58_spill] sm:$0xff]  ;;  %v9930_v61 = vld [vmem:[#allocation16_spill] sm:$0xff] }
 0x20e   :  { %4704 = vmatpush1.bf16.msra.mxu0 %v9921_v39  ;;  %4768 = vmatpush1.bf16.msra.mxu1 %v7301_v37  ;;  %v9931_v39 = vld [vmem:[#allocation60_spill] sm:$0xff]  ;;  %v9932_v37 = vld [vmem:[#allocation17_spill] sm:$0xff] }
 0x20f   :  { %4706 = vmatprep.subr.bf16.mxu0 %v9922_v47  ;;  %4770 = vmatprep.subr.bf16.mxu1 %v9923_v27  ;;  %v9933_v47 = vld [vmem:[#allocation62_spill] sm:$0xff] }
 0x210   :  { %v9934_v27 = vld [vmem:[#allocation18_spill] sm:$0xff] }
 0x212   :  { %4708 = vmatpush1.bf16.msra.mxu0 %v9924_v10  ;;  %4772 = vmatpush1.bf16.msra.mxu1 %v9925_v17  ;;  %v9935_v10 = vld [vmem:[#allocation64_spill] sm:$0xff]  ;;  %v9936_v17 = vld [vmem:[#allocation19_spill] sm:$0xff] }
 0x213   :  { %4710 = vmatprep.subr.bf16.mxu0 %v9926_v34  ;;  %4774 = vmatprep.subr.bf16.mxu1 %v9927_v8  ;;  %v9937_v34 = vld [vmem:[#allocation66_spill] sm:$0xff]  ;;  %v9938_v8 = vld [vmem:[#allocation20_spill] sm:$0xff] }
 0x216   :  { %4712 = vmatpush1.bf16.msra.mxu0 %v9928_v54  ;;  %4776 = vmatpush1.bf16.msra.mxu1 %v9929_v22  ;;  %v9939_v54 = vld [vmem:[#allocation68_spill] sm:$0xff]  ;;  %v9940_v22 = vld [vmem:[#allocation21_spill] sm:$0xff] }
 0x217   :  { %4714 = vmatprep.subr.bf16.mxu0 %v9930_v61  ;;  %4778 = vmatprep.subr.bf16.mxu1 %v9931_v39  ;;  %v9941_v61 = vld [vmem:[#allocation70_spill] sm:$0xff] }
 0x218   :  { %v9942_v39 = vld [vmem:[#allocation22_spill] sm:$0xff] }
 0x21a   :  { %4716 = vmatpush1.bf16.msra.mxu0 %v9932_v37  ;;  %4780 = vmatpush1.bf16.msra.mxu1 %v9933_v47  ;;  %v9943_v37 = vld [vmem:[#allocation72_spill] sm:$0xff]  ;;  %v9944_v47 = vld [vmem:[#allocation23_spill] sm:$0xff] }
 0x21b   :  { %4718 = vmatprep.subr.bf16.mxu0 %v9934_v27  ;;  %4782 = vmatprep.subr.bf16.mxu1 %v9935_v10  ;;  %v9945_v27 = vld [vmem:[#allocation74_spill] sm:$0xff]  ;;  %v9946_v10 = vld [vmem:[#allocation25_spill] sm:$0xff] }
 0x21e   :  { %4720 = vmatpush1.bf16.msra.mxu0 %v9936_v17  ;;  %4784 = vmatpush1.bf16.msra.mxu1 %v9937_v34  ;;  %v9947_v17 = vld [vmem:[#allocation76_spill] sm:$0xff]  ;;  %v9948_v34 = vld [vmem:[#allocation26_spill] sm:$0xff] }
 0x21f   :  { %4722 = vmatprep.subr.bf16.mxu0 %v9938_v8  ;;  %4786 = vmatprep.subr.bf16.mxu1 %v9939_v54  ;;  %v9949_v8 = vld [vmem:[#allocation78_spill] sm:$0xff]  ;;  %v9950_v54 = vld [vmem:[#allocation27_spill] sm:$0xff] }
 0x222   :  { %4724 = vmatpush1.bf16.msra.mxu0 %v9940_v22  ;;  %4788 = vmatpush1.bf16.msra.mxu1 %v9941_v61  ;;  %v9951_v22 = vld [vmem:[#allocation80_spill] sm:$0xff] }
 0x223   :  { %4726 = vmatprep.subr.bf16.mxu0 %v9942_v39  ;;  %4790 = vmatprep.subr.bf16.mxu1 %v9943_v37  ;;  %v9952_v61 = vld [vmem:[#allocation28_spill] sm:$0xff]  ;;  %v9953_v39 = vld [vmem:[#allocation82_spill] sm:$0xff]  ;;  %v9954_v37 = vld [vmem:[#allocation29_spill] sm:$0xff] }
 0x226   :  { %4728 = vmatpush1.bf16.msra.mxu0 %v9944_v47  ;;  %4792 = vmatpush1.bf16.msra.mxu1 %v9945_v27  ;;  %v9955_v47 = vld [vmem:[#allocation84_spill] sm:$0xff]  ;;  %v9956_v27 = vld [vmem:[#allocation30_spill] sm:$0xff] }
 0x227   :  { %4730 = vmatprep.subr.bf16.mxu0 %v9946_v10  ;;  %4794 = vmatprep.subr.bf16.mxu1 %v9947_v17  ;;  %v9957_v10 = vld [vmem:[#allocation86_spill] sm:$0xff]  ;;  %v9958_v17 = vld [vmem:[#allocation31_spill] sm:$0xff] }
 0x22a   :  { %4732 = vmatpush1.bf16.msra.mxu0 %v9948_v34  ;;  %4796 = vmatpush1.bf16.msra.mxu1 %v9949_v8  ;;  %v9959_v34 = vld [vmem:[#allocation88_spill] sm:$0xff] }
 0x22b   :  { %4734 = vmatprep.subr.bf16.mxu0 %v9950_v54  ;;  %4798 = vmatprep.subr.bf16.mxu1 %v9951_v22  ;;  %v9960_v8 = vld [vmem:[#allocation32_spill] sm:$0xff]  ;;  %v9961_v54 = vld [vmem:[#allocation90_spill] sm:$0xff]  ;;  %v9962_v22 = vld [vmem:[#allocation33_spill] sm:$0xff] }
 0x22e   :  { %4736 = vmatpush1.bf16.msra.mxu0 %v9952_v61  ;;  %4800 = vmatpush1.bf16.msra.mxu1 %v9953_v39  ;;  %v9963_v61 = vld [vmem:[#allocation92_spill] sm:$0xff]  ;;  %v9964_v39 = vld [vmem:[#allocation34_spill] sm:$0xff] }
 0x22f   :  { %4738 = vmatprep.subr.bf16.mxu0 %v9954_v37  ;;  %4802 = vmatprep.subr.bf16.mxu1 %v9955_v47  ;;  %v9965_v37 = vld [vmem:[#allocation94_spill] sm:$0xff]  ;;  %v9966_v47 = vld [vmem:[#allocation35_spill] sm:$0xff] }
 0x232   :  { %4740 = vmatpush1.bf16.msra.mxu0 %v9956_v27  ;;  %4804 = vmatpush1.bf16.msra.mxu1 %v9957_v10  ;;  %v9967_v27 = vld [vmem:[#allocation96_spill] sm:$0xff] }
 0x233   :  { %4742 = vmatprep.subr.bf16.mxu0 %v9958_v17  ;;  %4806 = vmatprep.subr.bf16.mxu1 %v9959_v34  ;;  %v9968_v10 = vld [vmem:[#allocation36_spill] sm:$0xff]  ;;  %v9969_v17 = vld [vmem:[#allocation98_spill] sm:$0xff]  ;;  %v9970_v34 = vld [vmem:[#allocation37_spill] sm:$0xff] }
 0x236   :  { %4744 = vmatpush1.bf16.msra.mxu0 %v9960_v8  ;;  %4808 = vmatpush1.bf16.msra.mxu1 %v9961_v54  ;;  %v9971_v8 = vld [vmem:[#allocation100_spill] sm:$0xff] }
 0x237   :  { %4746 = vmatprep.subr.bf16.mxu0 %v9962_v22  ;;  %4810 = vmatprep.subr.bf16.mxu1 %v9963_v61 }
 0x23a   :  { %4748 = vmatpush1.bf16.msra.mxu0 %v9964_v39  ;;  %4812 = vmatpush1.bf16.msra.mxu1 %v9965_v37 }
 0x23b   :  { %4750 = vmatprep.subr.bf16.mxu0 %v9966_v47  ;;  %4814 = vmatprep.subr.bf16.mxu1 %v9967_v27 }
 0x23e   :  { %4752 = vmatpush1.bf16.msra.mxu0 %v9968_v10  ;;  %4816 = vmatpush1.bf16.msra.mxu1 %v9969_v17 }
 0x23f   :  { %4818 = vmatprep.subr.bf16.mxu0 %v9970_v34  ;;  %4882 = vmatprep.subr.bf16.mxu1 %v9971_v8 }
 0x294   :  { %v1330_v54 = vpop.f32.mrb[18].mxu0  ;;  %v1401_v22 = vpop.f32.mrb[52].mxu1 }
 0x295   :  { %v1554_v61 = vadd.f32 %v1330_v54, %v9972_v18  ;;  %v1556_v39 = vadd.f32 %v1401_v22, %v9973_v20  ;;  %v1332_v13 = vpop.f32.mrb[19].mxu0  ;;  %v1403_v37 = vpop.f32.mrb[53].mxu1 }
 0x296   :  { %v1555_v47 = vadd.f32 %v1332_v13, %v9974_v58  ;;  %v1581_v27 = vadd.f32 %v1403_v37, %v9975_v2  ;;  %v9976_v13 = vld [vmem:[#allocation148_spill] sm:$0xff] }
 0x297   :  { %v4046_v42 = vmul.f32 -1.442695, %v1554_v61 }
 0x298   :  { %v4047_v10 = vmul.f32 -1.442695, %v1555_v47  ;;  %v4049_v59 = vmul.f32 -1.442695, %v1581_v27 }
 0x299   :  { %6354 = vpow2.f32 %v4046_v42  ;;  %v9977_v42 = vld [vmem:[#allocation159_spill] sm:$0xff] }
 0x29a   :  { %6356 = vpow2.f32 %v4047_v10 }
 0x29b   :  { %6358 = vpow2.f32 %v4049_v59 }
 0x2a3   :  { %v6355_v34 = vpop.eup %6354 }
 0x2a4   :  { %v6357_v8 = vpop.eup %6356  ;;  %v1566_v9 = vadd.f32 1.0, %v6355_v34 }
 0x2a5   :  { %v6359_v17 = vpop.eup %6358  ;;  %v1567_v28 = vadd.f32 1.0, %v6357_v8 }
 0x2a6   :  { %v1593_v54 = vadd.f32 1.0, %v6359_v17  ;;  %6360 = vrcp.f32 %v1566_v9  ;;  %v4048_v17 = vmul.f32 -1.442695, %v1556_v39 }
 0x2a7   :  { %6362 = vrcp.f32 %v1567_v28 }
 0x2a8   :  { %6364 = vrcp.f32 %v1593_v54 }
 0x2b0   :  { %v6361_v34 = vpop.eup %6360 }
 0x2b1   :  { %v6363_v2 = vpop.eup %6362 }
 0x2b2   :  { %v6365_v27 = vpop.eup %6364 }
 0x2d4   :  { %v1472_v20 = vpop.f32.mrb[12].mxu0  ;;  %v1543_v18 = vpop.f32.mrb[54].mxu1 }
 0x2d5   :  { %v6301_v58 = vadd.f32 %v1472_v20, %v8278_v62  ;;  %v1603_v37 = vadd.f32 %v1543_v18, %v9976_v13  ;;  %v1474_v61 = vpop.f32.mrb[13].mxu0  ;;  %v1545_v47 = vpop.f32.mrb[55].mxu1  ;;  %v1608_v20 = vmul.f32 %v6363_v2, %v8289_v52 }
 0x2d6   :  { %v1606_v10 = vadd.f32 %v1545_v47, %v9977_v42  ;;  %v6302_v8 = vadd.f32 %v1474_v61, %v8283_v32 }
 0x2d7   :  { %v4050_v59 = vmul.f32 -1.442695, %v6301_v58  ;;  %6366 = vtanh.f32 %v1603_v37 }
 0x2d8   :  { %6368 = vtanh.f32 %v1606_v10  ;;  %v4051_v9 = vmul.f32 -1.442695, %v6302_v8 }
 0x2d9   :  { %6370 = vpow2.f32 %v4050_v59 }
 0x2da   :  { %6372 = vpow2.f32 %v4051_v9 }
 0x2db   :  { %6374 = vpow2.f32 %v4048_v17  ;;  %v9981_v17 = vld [vmem:[#allocation103_spill] sm:$0xff] }
 0x2e1   :  { %v6367_v28 = vpop.eup %6366 }
 0x2e2   :  { %v6369_v22 = vpop.eup %6368  ;;  %v1609_v18 = vmul.f32 %v6367_v28, %v6361_v34 }
 0x2e3   :  { %v6371_v13 = vpop.eup %6370  ;;  %v1612_v54 = vmul.f32 %v6369_v22, %v6365_v27  ;;  %v9982_v22 = vld [vmem:[#allocation104_spill] sm:$0xff] }
 0x2e4   :  { %v1594_v47 = vadd.f32 1.0, %v6371_v13  ;;  %v8444_v58 = vadd.f32 %v1609_v18, %v1608_v20  ;;  %v6373_v37 = vpop.eup %6372  ;;  %v9983_v20 = vld [vmem:[#allocation105_spill] sm:$0xff]  ;;  %v9984_v18 = vld [vmem:[#allocation106_spill] sm:$0xff]  ;;  %v9985_v13 = vld [vmem:[#allocation107_spill] sm:$0xff] }
 0x2e5   :  { %v6375_v61 = vpop.eup %6374  ;;  %v1595_v10 = vadd.f32 1.0, %v6373_v37  ;;  %v9988_v37 = vld [vmem:[#allocation110_spill] sm:$0xff] }
 0x2e6   :  { %6376 = vrcp.f32 %v1594_v47  ;;  %v1568_v8 = vadd.f32 1.0, %v6375_v61  ;;  %v9987_v47 = vld [vmem:[#allocation109_spill] sm:$0xff]  ;;  %v9989_v61 = vld [vmem:[#allocation111_spill] sm:$0xff] }
 0x2e7   :  { %6378 = vtanh.f32 %v8444_v58 }
 0x2e8   :  { %6380 = vrcp.f32 %v1595_v10  ;;  %v9991_v10 = vld [vmem:[#allocation113_spill] sm:$0xff] }
 0x2f0   :  { %v6377_v42 = vpop.eup %6376 }
 0x2f1   :  { %v1611_v59 = vmul.f32 %v6377_v42, %v8291_v24  ;;  %v6379_v52 = vpop.eup %6378  ;;  %v9980_v24 = vld [vmem:[#allocation102_spill] sm:$0xff]  ;;  %v9990_v42 = vld [vmem:[#allocation112_spill] sm:$0xff] }
 0x2f2   :  { %v6381_v34 = vpop.eup %6380 }
 0x2f3   :  { %v8448_v39 = vadd.f32 %v1612_v54, %v1611_v59  ;;  %v9986_v54 = vld [vmem:[#allocation108_spill] sm:$0xff]  ;;  %v9992_v59 = vld [vmem:[#allocation91_spill] sm:$0xff] }
 0x2f5   :  { %6382 = vtanh.f32 %v8448_v39 }
 0x2f6   :  { %6384 = vrcp.f32 %v1568_v8  ;;  %v9993_v8 = vld [vmem:[#allocation114_spill] sm:$0xff] }
 0x2ff   :  { %v6383_v2 = vpop.eup %6382 }
 0x300   :  { %v6385_v9 = vpop.eup %6384  ;;  %v8451_v27 = vmul.f32 %v6383_v2, %v6381_v34  ;;  %v9995_v34 = vld [vmem:[#allocation115_spill] sm:$0xff] }
 0x301   :  { %v8453_v28 = vmul.f32 %v6385_v9, %v6379_v52  ;;  %v9994_v52 = vld [vmem:[#allocation93_spill] sm:$0xff]  ;;  %v9996_v2 = vld [vmem:[#allocation95_spill] sm:$0xff]  ;;  %v9997_v9 = vld [vmem:[#allocation116_spill] sm:$0xff] }
 0x302   :  { %9978 = vst [vmem:[#allocation39_spill] sm:$0xff] %v8451_v27  ;;  %1690 = vmatprep.mubr.f32.mxu0 %v8451_v27  ;;  %1761 = vmatprep.mubr.f32.mxu1 %v8451_v27 }
 0x303   :  { %9979 = vst [vmem:[#allocation41_spill] sm:$0xff] %v8453_v28  ;;  %1691 = vmatmul.mubr.f32.vlgmr.msra.gmra.mrb[20].mxu0 %v8453_v28  ;;  %1762 = vmatmul.mubr.f32.vlgmr.msra.gmra.mrb[56].mxu1 %v8453_v28 }
 0x304   :  { %4820 = vmatpush1.bf16.msra.mxu0 %v9882_v48  ;;  %4884 = vmatpush1.bf16.msra.mxu1 %v7765_v3 }
 0x305   :  { %1832 = vmatprep.mubr.f32.mxu0 %v8451_v27  ;;  %1903 = vmatprep.mubr.f32.mxu1 %v8451_v27  ;;  %v9998_v27 = vld [vmem:[#allocation97_spill] sm:$0xff] }
 0x306   :  { %4822 = vmatprep.subr.bf16.mxu0 %v9883_v7  ;;  %4886 = vmatprep.subr.bf16.mxu1 %v9884_v45 }
 0x308   :  { %4824 = vmatpush1.bf16.msra.mxu0 %v9885_v51  ;;  %4888 = vmatpush1.bf16.msra.mxu1 %v7787_v26 }
 0x309   :  { %4826 = vmatprep.subr.bf16.mxu0 %v9886_v11  ;;  %4890 = vmatprep.subr.bf16.mxu1 %v7790_v15 }
 0x30c   :  { %4828 = vmatpush1.bf16.msra.mxu0 %v9887_v55  ;;  %4892 = vmatpush1.bf16.msra.mxu1 %v7808_v25 }
 0x30d   :  { %4830 = vmatprep.subr.bf16.mxu0 %v9888_v23  ;;  %4894 = vmatprep.subr.bf16.mxu1 %v7811_v57 }
 0x310   :  { %4832 = vmatpush1.bf16.msra.mxu0 %v9889_v33  ;;  %4896 = vmatpush1.bf16.msra.mxu1 %v7828_v4 }
 0x311   :  { %4834 = vmatprep.subr.bf16.mxu0 %v9890_v53  ;;  %4898 = vmatprep.subr.bf16.mxu1 %v7831_v5 }
 0x314   :  { %4836 = vmatpush1.bf16.msra.mxu0 %v9891_v41  ;;  %4900 = vmatpush1.bf16.msra.mxu1 %v7848_v40 }
 0x315   :  { %4838 = vmatprep.subr.bf16.mxu0 %v9892_v43  ;;  %4902 = vmatprep.subr.bf16.mxu1 %v7851_v16 }
 0x318   :  { %4840 = vmatpush1.bf16.msra.mxu0 %v9893_v44  ;;  %4904 = vmatpush1.bf16.msra.mxu1 %v7868_v49 }
 0x319   :  { %4842 = vmatprep.subr.bf16.mxu0 %v9894_v0  ;;  %4906 = vmatprep.subr.bf16.mxu1 %v7871_v19 }
 0x31c   :  { %4844 = vmatpush1.bf16.msra.mxu0 %v9895_v63  ;;  %4908 = vmatpush1.bf16.msra.mxu1 %v7888_v60 }
 0x31d   :  { %4846 = vmatprep.subr.bf16.mxu0 %v9896_v35  ;;  %4910 = vmatprep.subr.bf16.mxu1 %v7891_v30 }
 0x320   :  { %4848 = vmatpush1.bf16.msra.mxu0 %v9897_v29  ;;  %4912 = vmatpush1.bf16.msra.mxu1 %v9980_v24 }
 0x321   :  { %4850 = vmatprep.subr.bf16.mxu0 %v9898_v1  ;;  %4914 = vmatprep.subr.bf16.mxu1 %v9981_v17 }
 0x324   :  { %4852 = vmatpush1.bf16.msra.mxu0 %v9899_v50  ;;  %4916 = vmatpush1.bf16.msra.mxu1 %v9982_v22 }
 0x325   :  { %4854 = vmatprep.subr.bf16.mxu0 %v9900_v31  ;;  %4918 = vmatprep.subr.bf16.mxu1 %v9983_v20 }
 0x328   :  { %4856 = vmatpush1.bf16.msra.mxu0 %v9901_v36  ;;  %4920 = vmatpush1.bf16.msra.mxu1 %v9984_v18 }
 0x329   :  { %4858 = vmatprep.subr.bf16.mxu0 %v9902_v56  ;;  %4922 = vmatprep.subr.bf16.mxu1 %v9985_v13 }
 0x32c   :  { %4860 = vmatpush1.bf16.msra.mxu0 %v9903_v6  ;;  %4924 = vmatpush1.bf16.msra.mxu1 %v9986_v54 }
 0x32d   :  { %4862 = vmatprep.subr.bf16.mxu0 %v9904_v12  ;;  %4926 = vmatprep.subr.bf16.mxu1 %v9987_v47 }
 0x330   :  { %4864 = vmatpush1.bf16.msra.mxu0 %v9905_v14  ;;  %4928 = vmatpush1.bf16.msra.mxu1 %v9988_v37  ;;  %v10070_v37 = vld [vmem:[#allocation122_spill] sm:$0xff]  ;;  %v10071_v14 = vld [vmem:[#allocation143_spill] sm:$0xff] }
 0x331   :  { %4866 = vmatprep.subr.bf16.mxu0 %v9906_v38  ;;  %4930 = vmatprep.subr.bf16.mxu1 %v9989_v61  ;;  %v10069_v61 = vld [vmem:[#allocation136_spill] sm:$0xff] }
 0x334   :  { %4868 = vmatpush1.bf16.msra.mxu0 %v9907_v21  ;;  %4932 = vmatpush1.bf16.msra.mxu1 %v9990_v42  ;;  %v9999_v21 = vld [vmem:[#allocation117_spill] sm:$0xff]  ;;  %v10000_v42 = vld [vmem:[#allocation99_spill] sm:$0xff] }
 0x335   :  { %4870 = vmatprep.subr.bf16.mxu0 %v9908_v46  ;;  %4934 = vmatprep.subr.bf16.mxu1 %v9991_v10  ;;  %v10001_v46 = vld [vmem:[#allocation118_spill] sm:$0xff]  ;;  %v10002_v10 = vld [vmem:[#allocation4_spill] sm:$0xff] }
 0x338   :  { %4872 = vmatpush1.bf16.msra.mxu0 %v9992_v59  ;;  %4936 = vmatpush1.bf16.msra.mxu1 %v9993_v8  ;;  %v10003_v59 = vld [vmem:[#allocation24_spill] sm:$0xff]  ;;  %v10068_v8 = vld [vmem:[#allocation121_spill] sm:$0xff] }
 0x339   :  { %4874 = vmatprep.subr.bf16.mxu0 %v9994_v52  ;;  %4938 = vmatprep.subr.bf16.mxu1 %v9995_v34  ;;  %v10004_v34 = vld [vmem:[#allocation5_spill] sm:$0xff]  ;;  %v10013_v52 = vld [vmem:[#allocation46_spill] sm:$0xff] }
 0x33c   :  { %4876 = vmatpush1.bf16.msra.mxu0 %v9996_v2  ;;  %4940 = vmatpush1.bf16.msra.mxu1 %v9997_v9  ;;  %v10005_v2 = vld [vmem:[#allocation38_spill] sm:$0xff] }
 0x33d   :  { %4878 = vmatprep.subr.bf16.mxu0 %v9998_v27  ;;  %4942 = vmatprep.subr.bf16.mxu1 %v9999_v21  ;;  %v10006_v9 = vld [vmem:[#allocation6_spill] sm:$0xff]  ;;  %v10007_v27 = vld [vmem:[#allocation40_spill] sm:$0xff]  ;;  %v10008_v21 = vld [vmem:[#allocation7_spill] sm:$0xff] }
 0x340   :  { %4880 = vmatpush1.bf16.msra.mxu0 %v10000_v42  ;;  %4944 = vmatpush1.bf16.msra.mxu1 %v10001_v46  ;;  %v10009_v42 = vld [vmem:[#allocation42_spill] sm:$0xff]  ;;  %v10010_v46 = vld [vmem:[#allocation8_spill] sm:$0xff] }
 0x341   :  { %4946 = vmatprep.subr.bf16.mxu0 %v10002_v10  ;;  %5010 = vmatprep.subr.bf16.mxu1 %v10003_v59  ;;  %v10011_v10 = vld [vmem:[#allocation44_spill] sm:$0xff]  ;;  %v10012_v59 = vld [vmem:[#allocation9_spill] sm:$0xff] }
 0x343   :  { %1833 = vmatmul.mubr.f32.vlgmr.msra.gmra.mrb[10].mxu0 %v8453_v28  ;;  %1904 = vmatmul.mubr.f32.vlgmr.msra.gmra.mrb[58].mxu1 %v8453_v28  ;;  %v10014_v28 = vld [vmem:[#allocation10_spill] sm:$0xff] }
 0x344   :  { %4948 = vmatpush1.bf16.msra.mxu0 %v10004_v34  ;;  %5012 = vmatpush1.bf16.msra.mxu1 %v10005_v2  ;;  %v10015_v34 = vld [vmem:[#allocation48_spill] sm:$0xff]  ;;  %v10016_v2 = vld [vmem:[#allocation11_spill] sm:$0xff] }
 0x345   :  { %4950 = vmatprep.subr.bf16.mxu0 %v10006_v9  ;;  %5014 = vmatprep.subr.bf16.mxu1 %v10007_v27  ;;  %v10017_v9 = vld [vmem:[#allocation50_spill] sm:$0xff]  ;;  %v10018_v27 = vld [vmem:[#allocation12_spill] sm:$0xff] }
 0x348   :  { %4952 = vmatpush1.bf16.msra.mxu0 %v10008_v21  ;;  %5016 = vmatpush1.bf16.msra.mxu1 %v10009_v42  ;;  %v10019_v21 = vld [vmem:[#allocation52_spill] sm:$0xff]  ;;  %v10020_v42 = vld [vmem:[#allocation13_spill] sm:$0xff] }
 0x349   :  { %4954 = vmatprep.subr.bf16.mxu0 %v10010_v46  ;;  %5018 = vmatprep.subr.bf16.mxu1 %v10011_v10  ;;  %v10021_v46 = vld [vmem:[#allocation54_spill] sm:$0xff] }
 0x34a   :  { %v10022_v10 = vld [vmem:[#allocation14_spill] sm:$0xff] }
 0x34c   :  { %4956 = vmatpush1.bf16.msra.mxu0 %v10012_v59  ;;  %5020 = vmatpush1.bf16.msra.mxu1 %v10013_v52  ;;  %v10023_v59 = vld [vmem:[#allocation56_spill] sm:$0xff]  ;;  %v10024_v52 = vld [vmem:[#allocation15_spill] sm:$0xff] }
 0x34d   :  { %4958 = vmatprep.subr.bf16.mxu0 %v10014_v28  ;;  %5022 = vmatprep.subr.bf16.mxu1 %v10015_v34  ;;  %v10025_v28 = vld [vmem:[#allocation58_spill] sm:$0xff]  ;;  %v10026_v34 = vld [vmem:[#allocation16_spill] sm:$0xff] }
 0x350   :  { %4960 = vmatpush1.bf16.msra.mxu0 %v10016_v2  ;;  %5024 = vmatpush1.bf16.msra.mxu1 %v10017_v9  ;;  %v10027_v2 = vld [vmem:[#allocation60_spill] sm:$0xff]  ;;  %v10028_v9 = vld [vmem:[#allocation17_spill] sm:$0xff] }
 0x351   :  { %4962 = vmatprep.subr.bf16.mxu0 %v10018_v27  ;;  %5026 = vmatprep.subr.bf16.mxu1 %v10019_v21  ;;  %v10029_v27 = vld [vmem:[#allocation62_spill] sm:$0xff] }
 0x352   :  { %v10030_v21 = vld [vmem:[#allocation18_spill] sm:$0xff] }
 0x354   :  { %4964 = vmatpush1.bf16.msra.mxu0 %v10020_v42  ;;  %5028 = vmatpush1.bf16.msra.mxu1 %v10021_v46  ;;  %v10031_v42 = vld [vmem:[#allocation64_spill] sm:$0xff]  ;;  %v10032_v46 = vld [vmem:[#allocation19_spill] sm:$0xff] }
 0x355   :  { %4966 = vmatprep.subr.bf16.mxu0 %v10022_v10  ;;  %5030 = vmatprep.subr.bf16.mxu1 %v10023_v59  ;;  %v10033_v10 = vld [vmem:[#allocation66_spill] sm:$0xff]  ;;  %v10034_v59 = vld [vmem:[#allocation20_spill] sm:$0xff] }
 0x358   :  { %4968 = vmatpush1.bf16.msra.mxu0 %v10024_v52  ;;  %5032 = vmatpush1.bf16.msra.mxu1 %v10025_v28  ;;  %v10035_v52 = vld [vmem:[#allocation68_spill] sm:$0xff]  ;;  %v10036_v28 = vld [vmem:[#allocation21_spill] sm:$0xff] }
 0x359   :  { %4970 = vmatprep.subr.bf16.mxu0 %v10026_v34  ;;  %5034 = vmatprep.subr.bf16.mxu1 %v10027_v2  ;;  %v10037_v34 = vld [vmem:[#allocation70_spill] sm:$0xff] }
 0x35a   :  { %v10038_v2 = vld [vmem:[#allocation22_spill] sm:$0xff] }
 0x35c   :  { %4972 = vmatpush1.bf16.msra.mxu0 %v10028_v9  ;;  %5036 = vmatpush1.bf16.msra.mxu1 %v10029_v27  ;;  %v10039_v9 = vld [vmem:[#allocation72_spill] sm:$0xff]  ;;  %v10040_v27 = vld [vmem:[#allocation23_spill] sm:$0xff] }
 0x35d   :  { %4974 = vmatprep.subr.bf16.mxu0 %v10030_v21  ;;  %5038 = vmatprep.subr.bf16.mxu1 %v10031_v42  ;;  %v10041_v21 = vld [vmem:[#allocation74_spill] sm:$0xff]  ;;  %v10042_v42 = vld [vmem:[#allocation25_spill] sm:$0xff] }
 0x360   :  { %4976 = vmatpush1.bf16.msra.mxu0 %v10032_v46  ;;  %5040 = vmatpush1.bf16.msra.mxu1 %v10033_v10  ;;  %v10043_v46 = vld [vmem:[#allocation76_spill] sm:$0xff]  ;;  %v10044_v10 = vld [vmem:[#allocation26_spill] sm:$0xff] }
 0x361   :  { %4978 = vmatprep.subr.bf16.mxu0 %v10034_v59  ;;  %5042 = vmatprep.subr.bf16.mxu1 %v10035_v52  ;;  %v10045_v59 = vld [vmem:[#allocation78_spill] sm:$0xff]  ;;  %v10046_v52 = vld [vmem:[#allocation27_spill] sm:$0xff] }
 0x364   :  { %4980 = vmatpush1.bf16.msra.mxu0 %v10036_v28  ;;  %5044 = vmatpush1.bf16.msra.mxu1 %v10037_v34  ;;  %v10047_v28 = vld [vmem:[#allocation80_spill] sm:$0xff] }
 0x365   :  { %4982 = vmatprep.subr.bf16.mxu0 %v10038_v2  ;;  %5046 = vmatprep.subr.bf16.mxu1 %v10039_v9  ;;  %v10048_v34 = vld [vmem:[#allocation28_spill] sm:$0xff]  ;;  %v10049_v2 = vld [vmem:[#allocation82_spill] sm:$0xff]  ;;  %v10050_v9 = vld [vmem:[#allocation29_spill] sm:$0xff] }
 0x368   :  { %4984 = vmatpush1.bf16.msra.mxu0 %v10040_v27  ;;  %5048 = vmatpush1.bf16.msra.mxu1 %v10041_v21  ;;  %v10051_v27 = vld [vmem:[#allocation84_spill] sm:$0xff]  ;;  %v10052_v21 = vld [vmem:[#allocation30_spill] sm:$0xff] }
 0x369   :  { %4986 = vmatprep.subr.bf16.mxu0 %v10042_v42  ;;  %5050 = vmatprep.subr.bf16.mxu1 %v10043_v46  ;;  %v10053_v42 = vld [vmem:[#allocation86_spill] sm:$0xff]  ;;  %v10054_v46 = vld [vmem:[#allocation31_spill] sm:$0xff] }
 0x36c   :  { %4988 = vmatpush1.bf16.msra.mxu0 %v10044_v10  ;;  %5052 = vmatpush1.bf16.msra.mxu1 %v10045_v59  ;;  %v10055_v10 = vld [vmem:[#allocation88_spill] sm:$0xff] }
 0x36d   :  { %4990 = vmatprep.subr.bf16.mxu0 %v10046_v52  ;;  %5054 = vmatprep.subr.bf16.mxu1 %v10047_v28  ;;  %v10056_v59 = vld [vmem:[#allocation32_spill] sm:$0xff]  ;;  %v10057_v52 = vld [vmem:[#allocation90_spill] sm:$0xff]  ;;  %v10058_v28 = vld [vmem:[#allocation33_spill] sm:$0xff] }
 0x370   :  { %4992 = vmatpush1.bf16.msra.mxu0 %v10048_v34  ;;  %5056 = vmatpush1.bf16.msra.mxu1 %v10049_v2  ;;  %v10059_v34 = vld [vmem:[#allocation92_spill] sm:$0xff]  ;;  %v10060_v2 = vld [vmem:[#allocation34_spill] sm:$0xff] }
 0x371   :  { %4994 = vmatprep.subr.bf16.mxu0 %v10050_v9  ;;  %5058 = vmatprep.subr.bf16.mxu1 %v10051_v27  ;;  %v10061_v9 = vld [vmem:[#allocation94_spill] sm:$0xff]  ;;  %v10062_v27 = vld [vmem:[#allocation35_spill] sm:$0xff] }
 0x374   :  { %4996 = vmatpush1.bf16.msra.mxu0 %v10052_v21  ;;  %5060 = vmatpush1.bf16.msra.mxu1 %v10053_v42  ;;  %v10063_v21 = vld [vmem:[#allocation96_spill] sm:$0xff] }
 0x375   :  { %4998 = vmatprep.subr.bf16.mxu0 %v10054_v46  ;;  %5062 = vmatprep.subr.bf16.mxu1 %v10055_v10  ;;  %v10064_v42 = vld [vmem:[#allocation36_spill] sm:$0xff]  ;;  %v10065_v46 = vld [vmem:[#allocation98_spill] sm:$0xff]  ;;  %v10066_v10 = vld [vmem:[#allocation37_spill] sm:$0xff] }
 0x378   :  { %5000 = vmatpush1.bf16.msra.mxu0 %v10056_v59  ;;  %5064 = vmatpush1.bf16.msra.mxu1 %v10057_v52  ;;  %v10067_v59 = vld [vmem:[#allocation100_spill] sm:$0xff] }
 0x379   :  { %5002 = vmatprep.subr.bf16.mxu0 %v10058_v28  ;;  %5066 = vmatprep.subr.bf16.mxu1 %v10059_v34 }
 0x37c   :  { %5004 = vmatpush1.bf16.msra.mxu0 %v10060_v2  ;;  %5068 = vmatpush1.bf16.msra.mxu1 %v10061_v9 }
 0x37d   :  { %5006 = vmatprep.subr.bf16.mxu0 %v10062_v27  ;;  %5070 = vmatprep.subr.bf16.mxu1 %v10063_v21 }
 0x380   :  { %5008 = vmatpush1.bf16.msra.mxu0 %v10064_v42  ;;  %5072 = vmatpush1.bf16.msra.mxu1 %v10065_v46 }
 0x381   :  { %5074 = vmatprep.subr.bf16.mxu0 %v10066_v10  ;;  %5138 = vmatprep.subr.bf16.mxu1 %v10067_v59 }
 0x3d6   :  { %v1692_v52 = vpop.f32.mrb[20].mxu0  ;;  %v1763_v28 = vpop.f32.mrb[56].mxu1 }
 0x3d7   :  { %v1916_v34 = vadd.f32 %v1692_v52, %v10068_v8  ;;  %v1918_v2 = vadd.f32 %v1763_v28, %v10069_v61  ;;  %v1694_v38 = vpop.f32.mrb[21].mxu0  ;;  %v1765_v9 = vpop.f32.mrb[57].mxu1 }
 0x3d8   :  { %v1917_v27 = vadd.f32 %v1694_v38, %v10070_v37  ;;  %v1943_v21 = vadd.f32 %v1765_v9, %v10071_v14  ;;  %v10072_v37 = vld [vmem:[#allocation150_spill] sm:$0xff] }
 0x3d9   :  { %v4052_v47 = vmul.f32 -1.442695, %v1916_v34  ;;  %v4054_v34 = vmul.f32 -1.442695, %v1918_v2 }
 0x3da   :  { %v4053_v42 = vmul.f32 -1.442695, %v1917_v27  ;;  %v4055_v12 = vmul.f32 -1.442695, %v1943_v21  ;;  %v10073_v21 = vld [vmem:[#allocation157_spill] sm:$0xff] }
 0x3db   :  { %6386 = vpow2.f32 %v4052_v47 }
 0x3dc   :  { %6388 = vpow2.f32 %v4053_v42 }
 0x3dd   :  { %6390 = vpow2.f32 %v4055_v12 }
 0x3e5   :  { %v6387_v10 = vpop.eup %6386 }
 0x3e6   :  { %v6389_v59 = vpop.eup %6388  ;;  %v1928_v54 = vadd.f32 1.0, %v6387_v10 }
 0x3e7   :  { %v6391_v46 = vpop.eup %6390  ;;  %v1929_v6 = vadd.f32 1.0, %v6389_v59 }
 0x3e8   :  { %v1955_v8 = vadd.f32 1.0, %v6391_v46  ;;  %6392 = vrcp.f32 %v1928_v54 }
 0x3e9   :  { %6394 = vrcp.f32 %v1929_v6 }
 0x3ea   :  { %6396 = vrcp.f32 %v1955_v8 }
 0x3f2   :  { %v6393_v46 = vpop.eup %6392 }
 0x3f3   :  { %v6395_v54 = vpop.eup %6394 }
 0x3f4   :  { %v6397_v59 = vpop.eup %6396 }
 0x416   :  { %v1834_v28 = vpop.f32.mrb[10].mxu0  ;;  %v1905_v61 = vpop.f32.mrb[58].mxu1 }
 0x417   :  { %v6299_v38 = vadd.f32 %v1834_v28, %v8278_v62  ;;  %v1965_v14 = vadd.f32 %v1905_v61, %v10072_v37  ;;  %v1836_v52 = vpop.f32.mrb[11].mxu0  ;;  %v1907_v27 = vpop.f32.mrb[59].mxu1  ;;  %v1970_v28 = vmul.f32 %v6395_v54, %v8444_v58 }
 0x418   :  { %v1968_v47 = vadd.f32 %v1907_v27, %v10073_v21  ;;  %v6300_v42 = vadd.f32 %v1836_v52, %v8283_v32 }
 0x419   :  { %v4056_v12 = vmul.f32 -1.442695, %v6299_v38  ;;  %6398 = vtanh.f32 %v1965_v14 }
 0x41a   :  { %6400 = vtanh.f32 %v1968_v47  ;;  %v4057_v10 = vmul.f32 -1.442695, %v6300_v42 }
 0x41b   :  { %6402 = vpow2.f32 %v4056_v12 }
 0x41c   :  { %6404 = vpow2.f32 %v4057_v10 }
 0x41d   :  { %6406 = vpow2.f32 %v4054_v34  ;;  %v10077_v34 = vld [vmem:[#allocation108_spill] sm:$0xff] }
 0x423   :  { %v6399_v6 = vpop.eup %6398 }
 0x424   :  { %v6401_v9 = vpop.eup %6400  ;;  %v1971_v61 = vmul.f32 %v6399_v6, %v6393_v46 }
 0x425   :  { %v6403_v37 = vpop.eup %6402  ;;  %v1974_v8 = vmul.f32 %v6401_v9, %v6397_v59  ;;  %v10078_v9 = vld [vmem:[#allocation81_spill] sm:$0xff] }
 0x426   :  { %v1956_v27 = vadd.f32 1.0, %v6403_v37  ;;  %v8600_v38 = vadd.f32 %v1971_v61, %v1970_v28  ;;  %v6405_v14 = vpop.eup %6404  ;;  %v10079_v28 = vld [vmem:[#allocation109_spill] sm:$0xff]  ;;  %v10080_v61 = vld [vmem:[#allocation83_spill] sm:$0xff]  ;;  %v10081_v37 = vld [vmem:[#allocation110_spill] sm:$0xff] }
 0x427   :  { %v6407_v52 = vpop.eup %6406  ;;  %v1957_v47 = vadd.f32 1.0, %v6405_v14  ;;  %v10084_v14 = vld [vmem:[#allocation87_spill] sm:$0xff] }
 0x428   :  { %6408 = vrcp.f32 %v1956_v27  ;;  %v1930_v42 = vadd.f32 1.0, %v6407_v52  ;;  %v10083_v27 = vld [vmem:[#allocation111_spill] sm:$0xff]  ;;  %v10085_v52 = vld [vmem:[#allocation112_spill] sm:$0xff] }
 0x429   :  { %6410 = vtanh.f32 %v8600_v38 }
 0x42a   :  { %6412 = vrcp.f32 %v1957_v47  ;;  %v10087_v47 = vld [vmem:[#allocation113_spill] sm:$0xff] }
 0x432   :  { %v6409_v21 = vpop.eup %6408 }
 0x433   :  { %v1973_v12 = vmul.f32 %v6409_v21, %v8448_v39  ;;  %v6411_v58 = vpop.eup %6410  ;;  %v10076_v39 = vld [vmem:[#allocation79_spill] sm:$0xff]  ;;  %v10086_v21 = vld [vmem:[#allocation89_spill] sm:$0xff] }
 0x434   :  { %v6413_v46 = vpop.eup %6412 }
 0x435   :  { %v8604_v2 = vadd.f32 %v1974_v8, %v1973_v12  ;;  %v10082_v8 = vld [vmem:[#allocation85_spill] sm:$0xff]  ;;  %v10088_v12 = vld [vmem:[#allocation91_spill] sm:$0xff] }
 0x437   :  { %6414 = vtanh.f32 %v8604_v2 }
 0x438   :  { %6416 = vrcp.f32 %v1930_v42  ;;  %v10089_v42 = vld [vmem:[#allocation114_spill] sm:$0xff] }
 0x441   :  { %v6415_v54 = vpop.eup %6414 }
 0x442   :  { %v6417_v10 = vpop.eup %6416  ;;  %v8607_v59 = vmul.f32 %v6415_v54, %v6413_v46  ;;  %v10091_v46 = vld [vmem:[#allocation115_spill] sm:$0xff] }
 0x443   :  { %v8609_v6 = vmul.f32 %v6417_v10, %v6411_v58  ;;  %v10090_v58 = vld [vmem:[#allocation93_spill] sm:$0xff]  ;;  %v10092_v54 = vld [vmem:[#allocation95_spill] sm:$0xff]  ;;  %v10093_v10 = vld [vmem:[#allocation116_spill] sm:$0xff] }
 0x444   :  { %10074 = vst [vmem:[#allocation101_spill] sm:$0xff] %v8607_v59  ;;  %2052 = vmatprep.mubr.f32.mxu0 %v8607_v59  ;;  %2123 = vmatprep.mubr.f32.mxu1 %v8607_v59 }
 0x445   :  { %10075 = vst [vmem:[#allocation43_spill] sm:$0xff] %v8609_v6  ;;  %2053 = vmatmul.mubr.f32.vlgmr.msra.gmra.mrb[22].mxu0 %v8609_v6  ;;  %2124 = vmatmul.mubr.f32.vlgmr.msra.gmra.mrb[60].mxu1 %v8609_v6 }
 0x446   :  { %5076 = vmatpush1.bf16.msra.mxu0 %v9882_v48  ;;  %5140 = vmatpush1.bf16.msra.mxu1 %v7765_v3 }
 0x447   :  { %2194 = vmatprep.mubr.f32.mxu0 %v8607_v59  ;;  %2265 = vmatprep.mubr.f32.mxu1 %v8607_v59  ;;  %v10094_v59 = vld [vmem:[#allocation97_spill] sm:$0xff] }
 0x448   :  { %5078 = vmatprep.subr.bf16.mxu0 %v9883_v7  ;;  %5142 = vmatprep.subr.bf16.mxu1 %v9884_v45 }
 0x44a   :  { %5080 = vmatpush1.bf16.msra.mxu0 %v9885_v51  ;;  %5144 = vmatpush1.bf16.msra.mxu1 %v7787_v26 }
 0x44b   :  { %5082 = vmatprep.subr.bf16.mxu0 %v9886_v11  ;;  %5146 = vmatprep.subr.bf16.mxu1 %v7790_v15 }
 0x44e   :  { %5084 = vmatpush1.bf16.msra.mxu0 %v9887_v55  ;;  %5148 = vmatpush1.bf16.msra.mxu1 %v7808_v25 }
 0x44f   :  { %5086 = vmatprep.subr.bf16.mxu0 %v9888_v23  ;;  %5150 = vmatprep.subr.bf16.mxu1 %v7811_v57 }
 0x452   :  { %5088 = vmatpush1.bf16.msra.mxu0 %v9889_v33  ;;  %5152 = vmatpush1.bf16.msra.mxu1 %v7828_v4 }
 0x453   :  { %5090 = vmatprep.subr.bf16.mxu0 %v9890_v53  ;;  %5154 = vmatprep.subr.bf16.mxu1 %v7831_v5 }
 0x456   :  { %5092 = vmatpush1.bf16.msra.mxu0 %v9891_v41  ;;  %5156 = vmatpush1.bf16.msra.mxu1 %v7848_v40 }
 0x457   :  { %5094 = vmatprep.subr.bf16.mxu0 %v9892_v43  ;;  %5158 = vmatprep.subr.bf16.mxu1 %v7851_v16 }
 0x45a   :  { %5096 = vmatpush1.bf16.msra.mxu0 %v9893_v44  ;;  %5160 = vmatpush1.bf16.msra.mxu1 %v7868_v49 }
 0x45b   :  { %5098 = vmatprep.subr.bf16.mxu0 %v9894_v0  ;;  %5162 = vmatprep.subr.bf16.mxu1 %v7871_v19 }
 0x45e   :  { %5100 = vmatpush1.bf16.msra.mxu0 %v9895_v63  ;;  %5164 = vmatpush1.bf16.msra.mxu1 %v7888_v60 }
 0x45f   :  { %5102 = vmatprep.subr.bf16.mxu0 %v9896_v35  ;;  %5166 = vmatprep.subr.bf16.mxu1 %v7891_v30 }
 0x462   :  { %5104 = vmatpush1.bf16.msra.mxu0 %v9897_v29  ;;  %5168 = vmatpush1.bf16.msra.mxu1 %v9980_v24 }
 0x463   :  { %5106 = vmatprep.subr.bf16.mxu0 %v9898_v1  ;;  %5170 = vmatprep.subr.bf16.mxu1 %v9981_v17 }
 0x466   :  { %5108 = vmatpush1.bf16.msra.mxu0 %v9899_v50  ;;  %5172 = vmatpush1.bf16.msra.mxu1 %v9982_v22 }
 0x467   :  { %5110 = vmatprep.subr.bf16.mxu0 %v9900_v31  ;;  %5174 = vmatprep.subr.bf16.mxu1 %v9983_v20 }
 0x46a   :  { %5112 = vmatpush1.bf16.msra.mxu0 %v9901_v36  ;;  %5176 = vmatpush1.bf16.msra.mxu1 %v9984_v18 }
 0x46b   :  { %5114 = vmatprep.subr.bf16.mxu0 %v9902_v56  ;;  %5178 = vmatprep.subr.bf16.mxu1 %v9985_v13 }
 0x46e   :  { %5116 = vmatpush1.bf16.msra.mxu0 %v10076_v39  ;;  %5180 = vmatpush1.bf16.msra.mxu1 %v10077_v34 }
 0x46f   :  { %5118 = vmatprep.subr.bf16.mxu0 %v10078_v9  ;;  %5182 = vmatprep.subr.bf16.mxu1 %v10079_v28 }
 0x472   :  { %5120 = vmatpush1.bf16.msra.mxu0 %v10080_v61  ;;  %5184 = vmatpush1.bf16.msra.mxu1 %v10081_v37  ;;  %v10166_v37 = vld [vmem:[#allocation124_spill] sm:$0xff]  ;;  %v10167_v61 = vld [vmem:[#allocation141_spill] sm:$0xff] }
 0x473   :  { %5122 = vmatprep.subr.bf16.mxu0 %v10082_v8  ;;  %5186 = vmatprep.subr.bf16.mxu1 %v10083_v27  ;;  %v10165_v27 = vld [vmem:[#allocation138_spill] sm:$0xff] }
 0x476   :  { %5124 = vmatpush1.bf16.msra.mxu0 %v10084_v14  ;;  %5188 = vmatpush1.bf16.msra.mxu1 %v10085_v52  ;;  %v10095_v14 = vld [vmem:[#allocation117_spill] sm:$0xff]  ;;  %v10096_v52 = vld [vmem:[#allocation99_spill] sm:$0xff] }
 0x477   :  { %5126 = vmatprep.subr.bf16.mxu0 %v10086_v21  ;;  %5190 = vmatprep.subr.bf16.mxu1 %v10087_v47  ;;  %v10097_v21 = vld [vmem:[#allocation118_spill] sm:$0xff]  ;;  %v10098_v47 = vld [vmem:[#allocation4_spill] sm:$0xff] }
 0x47a   :  { %5128 = vmatpush1.bf16.msra.mxu0 %v10088_v12  ;;  %5192 = vmatpush1.bf16.msra.mxu1 %v10089_v42  ;;  %v10099_v12 = vld [vmem:[#allocation24_spill] sm:$0xff]  ;;  %v10164_v42 = vld [vmem:[#allocation123_spill] sm:$0xff] }
 0x47b   :  { %5130 = vmatprep.subr.bf16.mxu0 %v10090_v58  ;;  %5194 = vmatprep.subr.bf16.mxu1 %v10091_v46  ;;  %v10100_v46 = vld [vmem:[#allocation5_spill] sm:$0xff]  ;;  %v10109_v58 = vld [vmem:[#allocation46_spill] sm:$0xff] }
 0x47e   :  { %5132 = vmatpush1.bf16.msra.mxu0 %v10092_v54  ;;  %5196 = vmatpush1.bf16.msra.mxu1 %v10093_v10  ;;  %v10101_v54 = vld [vmem:[#allocation38_spill] sm:$0xff] }
 0x47f   :  { %5134 = vmatprep.subr.bf16.mxu0 %v10094_v59  ;;  %5198 = vmatprep.subr.bf16.mxu1 %v10095_v14  ;;  %v10102_v10 = vld [vmem:[#allocation6_spill] sm:$0xff]  ;;  %v10103_v59 = vld [vmem:[#allocation40_spill] sm:$0xff]  ;;  %v10104_v14 = vld [vmem:[#allocation7_spill] sm:$0xff] }
 0x482   :  { %5136 = vmatpush1.bf16.msra.mxu0 %v10096_v52  ;;  %5200 = vmatpush1.bf16.msra.mxu1 %v10097_v21  ;;  %v10105_v52 = vld [vmem:[#allocation42_spill] sm:$0xff]  ;;  %v10106_v21 = vld [vmem:[#allocation8_spill] sm:$0xff] }
 0x483   :  { %5202 = vmatprep.subr.bf16.mxu0 %v10098_v47  ;;  %5266 = vmatprep.subr.bf16.mxu1 %v10099_v12  ;;  %v10107_v47 = vld [vmem:[#allocation44_spill] sm:$0xff]  ;;  %v10108_v12 = vld [vmem:[#allocation9_spill] sm:$0xff] }
 0x485   :  { %2195 = vmatmul.mubr.f32.vlgmr.msra.gmra.mrb[8].mxu0 %v8609_v6  ;;  %2266 = vmatmul.mubr.f32.vlgmr.msra.gmra.mrb[62].mxu1 %v8609_v6  ;;  %v10110_v6 = vld [vmem:[#allocation10_spill] sm:$0xff] }
 0x486   :  { %5204 = vmatpush1.bf16.msra.mxu0 %v10100_v46  ;;  %5268 = vmatpush1.bf16.msra.mxu1 %v10101_v54  ;;  %v10111_v46 = vld [vmem:[#allocation48_spill] sm:$0xff]  ;;  %v10112_v54 = vld [vmem:[#allocation11_spill] sm:$0xff] }
 0x487   :  { %5206 = vmatprep.subr.bf16.mxu0 %v10102_v10  ;;  %5270 = vmatprep.subr.bf16.mxu1 %v10103_v59  ;;  %v10113_v10 = vld [vmem:[#allocation50_spill] sm:$0xff]  ;;  %v10114_v59 = vld [vmem:[#allocation12_spill] sm:$0xff] }
 0x48a   :  { %5208 = vmatpush1.bf16.msra.mxu0 %v10104_v14  ;;  %5272 = vmatpush1.bf16.msra.mxu1 %v10105_v52  ;;  %v10115_v14 = vld [vmem:[#allocation52_spill] sm:$0xff]  ;;  %v10116_v52 = vld [vmem:[#allocation13_spill] sm:$0xff] }
 0x48b   :  { %5210 = vmatprep.subr.bf16.mxu0 %v10106_v21  ;;  %5274 = vmatprep.subr.bf16.mxu1 %v10107_v47  ;;  %v10117_v21 = vld [vmem:[#allocation54_spill] sm:$0xff] }
 0x48c   :  { %v10118_v47 = vld [vmem:[#allocation14_spill] sm:$0xff] }
 0x48e   :  { %5212 = vmatpush1.bf16.msra.mxu0 %v10108_v12  ;;  %5276 = vmatpush1.bf16.msra.mxu1 %v10109_v58  ;;  %v10119_v12 = vld [vmem:[#allocation56_spill] sm:$0xff]  ;;  %v10120_v58 = vld [vmem:[#allocation15_spill] sm:$0xff] }
 0x48f   :  { %5214 = vmatprep.subr.bf16.mxu0 %v10110_v6  ;;  %5278 = vmatprep.subr.bf16.mxu1 %v10111_v46  ;;  %v10121_v6 = vld [vmem:[#allocation58_spill] sm:$0xff]  ;;  %v10122_v46 = vld [vmem:[#allocation16_spill] sm:$0xff] }
 0x492   :  { %5216 = vmatpush1.bf16.msra.mxu0 %v10112_v54  ;;  %5280 = vmatpush1.bf16.msra.mxu1 %v10113_v10  ;;  %v10123_v54 = vld [vmem:[#allocation60_spill] sm:$0xff]  ;;  %v10124_v10 = vld [vmem:[#allocation17_spill] sm:$0xff] }
 0x493   :  { %5218 = vmatprep.subr.bf16.mxu0 %v10114_v59  ;;  %5282 = vmatprep.subr.bf16.mxu1 %v10115_v14  ;;  %v10125_v59 = vld [vmem:[#allocation62_spill] sm:$0xff] }
 0x494   :  { %v10126_v14 = vld [vmem:[#allocation18_spill] sm:$0xff] }
 0x496   :  { %5220 = vmatpush1.bf16.msra.mxu0 %v10116_v52  ;;  %5284 = vmatpush1.bf16.msra.mxu1 %v10117_v21  ;;  %v10127_v52 = vld [vmem:[#allocation64_spill] sm:$0xff]  ;;  %v10128_v21 = vld [vmem:[#allocation19_spill] sm:$0xff] }
 0x497   :  { %5222 = vmatprep.subr.bf16.mxu0 %v10118_v47  ;;  %5286 = vmatprep.subr.bf16.mxu1 %v10119_v12  ;;  %v10129_v47 = vld [vmem:[#allocation66_spill] sm:$0xff]  ;;  %v10130_v12 = vld [vmem:[#allocation20_spill] sm:$0xff] }
 0x49a   :  { %5224 = vmatpush1.bf16.msra.mxu0 %v10120_v58  ;;  %5288 = vmatpush1.bf16.msra.mxu1 %v10121_v6  ;;  %v10131_v58 = vld [vmem:[#allocation68_spill] sm:$0xff]  ;;  %v10132_v6 = vld [vmem:[#allocation21_spill] sm:$0xff] }
 0x49b   :  { %5226 = vmatprep.subr.bf16.mxu0 %v10122_v46  ;;  %5290 = vmatprep.subr.bf16.mxu1 %v10123_v54  ;;  %v10133_v46 = vld [vmem:[#allocation70_spill] sm:$0xff] }
 0x49c   :  { %v10134_v54 = vld [vmem:[#allocation22_spill] sm:$0xff] }
 0x49e   :  { %5228 = vmatpush1.bf16.msra.mxu0 %v10124_v10  ;;  %5292 = vmatpush1.bf16.msra.mxu1 %v10125_v59  ;;  %v10135_v10 = vld [vmem:[#allocation72_spill] sm:$0xff]  ;;  %v10136_v59 = vld [vmem:[#allocation23_spill] sm:$0xff] }
 0x49f   :  { %5230 = vmatprep.subr.bf16.mxu0 %v10126_v14  ;;  %5294 = vmatprep.subr.bf16.mxu1 %v10127_v52  ;;  %v10137_v14 = vld [vmem:[#allocation74_spill] sm:$0xff]  ;;  %v10138_v52 = vld [vmem:[#allocation25_spill] sm:$0xff] }
 0x4a2   :  { %5232 = vmatpush1.bf16.msra.mxu0 %v10128_v21  ;;  %5296 = vmatpush1.bf16.msra.mxu1 %v10129_v47  ;;  %v10139_v21 = vld [vmem:[#allocation76_spill] sm:$0xff]  ;;  %v10140_v47 = vld [vmem:[#allocation26_spill] sm:$0xff] }
 0x4a3   :  { %5234 = vmatprep.subr.bf16.mxu0 %v10130_v12  ;;  %5298 = vmatprep.subr.bf16.mxu1 %v10131_v58  ;;  %v10141_v12 = vld [vmem:[#allocation78_spill] sm:$0xff]  ;;  %v10142_v58 = vld [vmem:[#allocation27_spill] sm:$0xff] }
 0x4a6   :  { %5236 = vmatpush1.bf16.msra.mxu0 %v10132_v6  ;;  %5300 = vmatpush1.bf16.msra.mxu1 %v10133_v46  ;;  %v10143_v6 = vld [vmem:[#allocation80_spill] sm:$0xff] }
 0x4a7   :  { %5238 = vmatprep.subr.bf16.mxu0 %v10134_v54  ;;  %5302 = vmatprep.subr.bf16.mxu1 %v10135_v10  ;;  %v10144_v46 = vld [vmem:[#allocation28_spill] sm:$0xff]  ;;  %v10145_v54 = vld [vmem:[#allocation82_spill] sm:$0xff]  ;;  %v10146_v10 = vld [vmem:[#allocation29_spill] sm:$0xff] }
 0x4aa   :  { %5240 = vmatpush1.bf16.msra.mxu0 %v10136_v59  ;;  %5304 = vmatpush1.bf16.msra.mxu1 %v10137_v14  ;;  %v10147_v59 = vld [vmem:[#allocation84_spill] sm:$0xff]  ;;  %v10148_v14 = vld [vmem:[#allocation30_spill] sm:$0xff] }
 0x4ab   :  { %5242 = vmatprep.subr.bf16.mxu0 %v10138_v52  ;;  %5306 = vmatprep.subr.bf16.mxu1 %v10139_v21  ;;  %v10149_v52 = vld [vmem:[#allocation86_spill] sm:$0xff]  ;;  %v10150_v21 = vld [vmem:[#allocation31_spill] sm:$0xff] }
 0x4ae   :  { %5244 = vmatpush1.bf16.msra.mxu0 %v10140_v47  ;;  %5308 = vmatpush1.bf16.msra.mxu1 %v10141_v12  ;;  %v10151_v47 = vld [vmem:[#allocation88_spill] sm:$0xff] }
 0x4af   :  { %5246 = vmatprep.subr.bf16.mxu0 %v10142_v58  ;;  %5310 = vmatprep.subr.bf16.mxu1 %v10143_v6  ;;  %v10152_v12 = vld [vmem:[#allocation32_spill] sm:$0xff]  ;;  %v10153_v58 = vld [vmem:[#allocation90_spill] sm:$0xff]  ;;  %v10154_v6 = vld [vmem:[#allocation33_spill] sm:$0xff] }
 0x4b2   :  { %5248 = vmatpush1.bf16.msra.mxu0 %v10144_v46  ;;  %5312 = vmatpush1.bf16.msra.mxu1 %v10145_v54  ;;  %v10155_v46 = vld [vmem:[#allocation92_spill] sm:$0xff]  ;;  %v10156_v54 = vld [vmem:[#allocation34_spill] sm:$0xff] }
 0x4b3   :  { %5250 = vmatprep.subr.bf16.mxu0 %v10146_v10  ;;  %5314 = vmatprep.subr.bf16.mxu1 %v10147_v59  ;;  %v10157_v10 = vld [vmem:[#allocation94_spill] sm:$0xff]  ;;  %v10158_v59 = vld [vmem:[#allocation35_spill] sm:$0xff] }
 0x4b6   :  { %5252 = vmatpush1.bf16.msra.mxu0 %v10148_v14  ;;  %5316 = vmatpush1.bf16.msra.mxu1 %v10149_v52  ;;  %v10159_v14 = vld [vmem:[#allocation96_spill] sm:$0xff] }
 0x4b7   :  { %5254 = vmatprep.subr.bf16.mxu0 %v10150_v21  ;;  %5318 = vmatprep.subr.bf16.mxu1 %v10151_v47  ;;  %v10160_v52 = vld [vmem:[#allocation36_spill] sm:$0xff]  ;;  %v10161_v21 = vld [vmem:[#allocation98_spill] sm:$0xff]  ;;  %v10162_v47 = vld [vmem:[#allocation37_spill] sm:$0xff] }
 0x4ba   :  { %5256 = vmatpush1.bf16.msra.mxu0 %v10152_v12  ;;  %5320 = vmatpush1.bf16.msra.mxu1 %v10153_v58  ;;  %v10163_v12 = vld [vmem:[#allocation100_spill] sm:$0xff] }
 0x4bb   :  { %5258 = vmatprep.subr.bf16.mxu0 %v10154_v6  ;;  %5322 = vmatprep.subr.bf16.mxu1 %v10155_v46 }
 0x4be   :  { %5260 = vmatpush1.bf16.msra.mxu0 %v10156_v54  ;;  %5324 = vmatpush1.bf16.msra.mxu1 %v10157_v10 }
 0x4bf   :  { %5262 = vmatprep.subr.bf16.mxu0 %v10158_v59  ;;  %5326 = vmatprep.subr.bf16.mxu1 %v10159_v14 }
 0x4c2   :  { %5264 = vmatpush1.bf16.msra.mxu0 %v10160_v52  ;;  %5328 = vmatpush1.bf16.msra.mxu1 %v10161_v21 }
 0x4c3   :  { %5330 = vmatprep.subr.bf16.mxu0 %v10162_v47  ;;  %5394 = vmatprep.subr.bf16.mxu1 %v10163_v12 }
 0x518   :  { %v2054_v58 = vpop.f32.mrb[22].mxu0  ;;  %v2125_v6 = vpop.f32.mrb[60].mxu1 }
 0x519   :  { %v2278_v46 = vadd.f32 %v2054_v58, %v10164_v42  ;;  %v2280_v54 = vadd.f32 %v2125_v6, %v10165_v27  ;;  %v2056_v8 = vpop.f32.mrb[23].mxu0  ;;  %v2127_v10 = vpop.f32.mrb[61].mxu1 }
 0x51a   :  { %v2279_v59 = vadd.f32 %v2056_v8, %v10166_v37  ;;  %v2305_v14 = vadd.f32 %v2127_v10, %v10167_v61  ;;  %v10168_v8 = vld [vmem:[#allocation152_spill] sm:$0xff] }
 0x51b   :  { %v4058_v28 = vmul.f32 -1.442695, %v2278_v46  ;;  %v4060_v46 = vmul.f32 -1.442695, %v2280_v54 }
 0x51c   :  { %v4059_v52 = vmul.f32 -1.442695, %v2279_v59  ;;  %v4061_v9 = vmul.f32 -1.442695, %v2305_v14 }
 0x51d   :  { %6418 = vpow2.f32 %v4058_v28  ;;  %v10169_v28 = vld [vmem:[#allocation155_spill] sm:$0xff] }
 0x51e   :  { %6420 = vpow2.f32 %v4059_v52 }
 0x51f   :  { %6422 = vpow2.f32 %v4061_v9 }
 0x527   :  { %v6419_v47 = vpop.eup %6418 }
 0x528   :  { %v6421_v12 = vpop.eup %6420  ;;  %v2290_v34 = vadd.f32 1.0, %v6419_v47 }
 0x529   :  { %v6423_v21 = vpop.eup %6422  ;;  %v2291_v39 = vadd.f32 1.0, %v6421_v12 }
 0x52a   :  { %v2317_v42 = vadd.f32 1.0, %v6423_v21  ;;  %6424 = vrcp.f32 %v2290_v34 }
 0x52b   :  { %6426 = vrcp.f32 %v2291_v39 }
 0x52c   :  { %6428 = vrcp.f32 %v2317_v42 }
 0x534   :  { %v6425_v21 = vpop.eup %6424 }
 0x535   :  { %v6427_v34 = vpop.eup %6426 }
 0x536   :  { %v6429_v12 = vpop.eup %6428 }
 0x558   :  { %v2196_v6 = vpop.f32.mrb[8].mxu0  ;;  %v2267_v27 = vpop.f32.mrb[62].mxu1 }
 0x559   :  { %v6297_v37 = vadd.f32 %v2196_v6, %v8278_v62  ;;  %v2327_v61 = vadd.f32 %v2267_v27, %v10168_v8  ;;  %v2198_v58 = vpop.f32.mrb[9].mxu0  ;;  %v2269_v59 = vpop.f32.mrb[63].mxu1  ;;  %v2332_v6 = vmul.f32 %v6427_v34, %v8600_v38 }
 0x55a   :  { %v2330_v14 = vadd.f32 %v2269_v59, %v10169_v28  ;;  %v6298_v52 = vadd.f32 %v2198_v58, %v8283_v32 }
 0x55b   :  { %v4062_v9 = vmul.f32 -1.442695, %v6297_v37  ;;  %6430 = vtanh.f32 %v2327_v61 }
 0x55c   :  { %6432 = vtanh.f32 %v2330_v14  ;;  %v4063_v47 = vmul.f32 -1.442695, %v6298_v52 }
 0x55d   :  { %6434 = vpow2.f32 %v4062_v9 }
 0x55e   :  { %6436 = vpow2.f32 %v4063_v47 }
 0x55f   :  { %6438 = vpow2.f32 %v4060_v46  ;;  %v10173_v46 = vld [vmem:[#allocation108_spill] sm:$0xff] }
 0x565   :  { %v6431_v39 = vpop.eup %6430 }
 0x566   :  { %v6433_v10 = vpop.eup %6432  ;;  %v2333_v27 = vmul.f32 %v6431_v39, %v6425_v21 }
 0x567   :  { %v6435_v8 = vpop.eup %6434  ;;  %v2336_v42 = vmul.f32 %v6433_v10, %v6429_v12  ;;  %v10174_v10 = vld [vmem:[#allocation81_spill] sm:$0xff] }
 0x568   :  { %v2318_v59 = vadd.f32 1.0, %v6435_v8  ;;  %v8756_v37 = vadd.f32 %v2333_v27, %v2332_v6  ;;  %v6437_v61 = vpop.eup %6436  ;;  %v10175_v6 = vld [vmem:[#allocation109_spill] sm:$0xff]  ;;  %v10176_v27 = vld [vmem:[#allocation83_spill] sm:$0xff]  ;;  %v10177_v8 = vld [vmem:[#allocation110_spill] sm:$0xff] }
 0x569   :  { %v6439_v58 = vpop.eup %6438  ;;  %v2319_v14 = vadd.f32 1.0, %v6437_v61  ;;  %v10180_v61 = vld [vmem:[#allocation87_spill] sm:$0xff] }
 0x56a   :  { %6440 = vrcp.f32 %v2318_v59  ;;  %v2292_v52 = vadd.f32 1.0, %v6439_v58  ;;  %v10179_v59 = vld [vmem:[#allocation111_spill] sm:$0xff]  ;;  %v10181_v58 = vld [vmem:[#allocation112_spill] sm:$0xff] }
 0x56b   :  { %6442 = vtanh.f32 %v8756_v37 }
 0x56c   :  { %6444 = vrcp.f32 %v2319_v14  ;;  %v10183_v14 = vld [vmem:[#allocation113_spill] sm:$0xff] }
 0x574   :  { %v6441_v28 = vpop.eup %6440 }
 0x575   :  { %v2335_v9 = vmul.f32 %v6441_v28, %v8604_v2  ;;  %v6443_v38 = vpop.eup %6442  ;;  %v10172_v2 = vld [vmem:[#allocation79_spill] sm:$0xff]  ;;  %v10182_v28 = vld [vmem:[#allocation89_spill] sm:$0xff] }
 0x576   :  { %v6445_v21 = vpop.eup %6444 }
 0x577   :  { %v8760_v54 = vadd.f32 %v2336_v42, %v2335_v9  ;;  %v10178_v42 = vld [vmem:[#allocation85_spill] sm:$0xff]  ;;  %v10184_v9 = vld [vmem:[#allocation91_spill] sm:$0xff] }
 0x579   :  { %6446 = vtanh.f32 %v8760_v54 }
 0x57a   :  { %6448 = vrcp.f32 %v2292_v52  ;;  %v10185_v52 = vld [vmem:[#allocation114_spill] sm:$0xff] }
 0x583   :  { %v6447_v34 = vpop.eup %6446 }
 0x584   :  { %v6449_v47 = vpop.eup %6448  ;;  %v8763_v12 = vmul.f32 %v6447_v34, %v6445_v21  ;;  %v10187_v21 = vld [vmem:[#allocation115_spill] sm:$0xff] }
 0x585   :  { %v8765_v39 = vmul.f32 %v6449_v47, %v6443_v38  ;;  %v10186_v38 = vld [vmem:[#allocation93_spill] sm:$0xff]  ;;  %v10188_v34 = vld [vmem:[#allocation95_spill] sm:$0xff]  ;;  %v10189_v47 = vld [vmem:[#allocation116_spill] sm:$0xff] }
 0x586   :  { %10170 = vst [vmem:[#allocation45_spill] sm:$0xff] %v8763_v12  ;;  %2414 = vmatprep.mubr.f32.mxu0 %v8763_v12  ;;  %2485 = vmatprep.mubr.f32.mxu1 %v8763_v12 }
 0x587   :  { %10171 = vst [vmem:[#allocation47_spill] sm:$0xff] %v8765_v39  ;;  %2415 = vmatmul.mubr.f32.vlgmr.msra.gmra.mrb[24].mxu0 %v8765_v39  ;;  %2486 = vmatmul.mubr.f32.vlgmr.msra.gmra.mrb[64].mxu1 %v8765_v39 }
 0x588   :  { %5332 = vmatpush1.bf16.msra.mxu0 %v9882_v48  ;;  %5396 = vmatpush1.bf16.msra.mxu1 %v7765_v3 }
 0x589   :  { %2556 = vmatprep.mubr.f32.mxu0 %v8763_v12  ;;  %2627 = vmatprep.mubr.f32.mxu1 %v8763_v12  ;;  %v10190_v12 = vld [vmem:[#allocation97_spill] sm:$0xff] }
 0x58a   :  { %5334 = vmatprep.subr.bf16.mxu0 %v9883_v7  ;;  %5398 = vmatprep.subr.bf16.mxu1 %v9884_v45 }
 0x58c   :  { %5336 = vmatpush1.bf16.msra.mxu0 %v9885_v51  ;;  %5400 = vmatpush1.bf16.msra.mxu1 %v7787_v26 }
 0x58d   :  { %5338 = vmatprep.subr.bf16.mxu0 %v9886_v11  ;;  %5402 = vmatprep.subr.bf16.mxu1 %v7790_v15 }
 0x590   :  { %5340 = vmatpush1.bf16.msra.mxu0 %v9887_v55  ;;  %5404 = vmatpush1.bf16.msra.mxu1 %v7808_v25 }
 0x591   :  { %5342 = vmatprep.subr.bf16.mxu0 %v9888_v23  ;;  %5406 = vmatprep.subr.bf16.mxu1 %v7811_v57 }
 0x594   :  { %5344 = vmatpush1.bf16.msra.mxu0 %v9889_v33  ;;  %5408 = vmatpush1.bf16.msra.mxu1 %v7828_v4 }
 0x595   :  { %5346 = vmatprep.subr.bf16.mxu0 %v9890_v53  ;;  %5410 = vmatprep.subr.bf16.mxu1 %v7831_v5 }
 0x598   :  { %5348 = vmatpush1.bf16.msra.mxu0 %v9891_v41  ;;  %5412 = vmatpush1.bf16.msra.mxu1 %v7848_v40 }
 0x599   :  { %5350 = vmatprep.subr.bf16.mxu0 %v9892_v43  ;;  %5414 = vmatprep.subr.bf16.mxu1 %v7851_v16 }
 0x59c   :  { %5352 = vmatpush1.bf16.msra.mxu0 %v9893_v44  ;;  %5416 = vmatpush1.bf16.msra.mxu1 %v7868_v49 }
 0x59d   :  { %5354 = vmatprep.subr.bf16.mxu0 %v9894_v0  ;;  %5418 = vmatprep.subr.bf16.mxu1 %v7871_v19 }
 0x5a0   :  { %5356 = vmatpush1.bf16.msra.mxu0 %v9895_v63  ;;  %5420 = vmatpush1.bf16.msra.mxu1 %v7888_v60 }
 0x5a1   :  { %5358 = vmatprep.subr.bf16.mxu0 %v9896_v35  ;;  %5422 = vmatprep.subr.bf16.mxu1 %v7891_v30 }
 0x5a4   :  { %5360 = vmatpush1.bf16.msra.mxu0 %v9897_v29  ;;  %5424 = vmatpush1.bf16.msra.mxu1 %v9980_v24 }
 0x5a5   :  { %5362 = vmatprep.subr.bf16.mxu0 %v9898_v1  ;;  %5426 = vmatprep.subr.bf16.mxu1 %v9981_v17 }
 0x5a8   :  { %5364 = vmatpush1.bf16.msra.mxu0 %v9899_v50  ;;  %5428 = vmatpush1.bf16.msra.mxu1 %v9982_v22 }
 0x5a9   :  { %5366 = vmatprep.subr.bf16.mxu0 %v9900_v31  ;;  %5430 = vmatprep.subr.bf16.mxu1 %v9983_v20 }
 0x5ac   :  { %5368 = vmatpush1.bf16.msra.mxu0 %v9901_v36  ;;  %5432 = vmatpush1.bf16.msra.mxu1 %v9984_v18 }
 0x5ad   :  { %5370 = vmatprep.subr.bf16.mxu0 %v9902_v56  ;;  %5434 = vmatprep.subr.bf16.mxu1 %v9985_v13 }
 0x5b0   :  { %5372 = vmatpush1.bf16.msra.mxu0 %v10172_v2  ;;  %5436 = vmatpush1.bf16.msra.mxu1 %v10173_v46 }
 0x5b1   :  { %5374 = vmatprep.subr.bf16.mxu0 %v10174_v10  ;;  %5438 = vmatprep.subr.bf16.mxu1 %v10175_v6 }
 0x5b4   :  { %5376 = vmatpush1.bf16.msra.mxu0 %v10176_v27  ;;  %5440 = vmatpush1.bf16.msra.mxu1 %v10177_v8  ;;  %v10262_v8 = vld [vmem:[#allocation126_spill] sm:$0xff]  ;;  %v10263_v27 = vld [vmem:[#allocation139_spill] sm:$0xff] }
 0x5b5   :  { %5378 = vmatprep.subr.bf16.mxu0 %v10178_v42  ;;  %5442 = vmatprep.subr.bf16.mxu1 %v10179_v59  ;;  %v10261_v59 = vld [vmem:[#allocation140_spill] sm:$0xff] }
 0x5b8   :  { %5380 = vmatpush1.bf16.msra.mxu0 %v10180_v61  ;;  %5444 = vmatpush1.bf16.msra.mxu1 %v10181_v58  ;;  %v10191_v61 = vld [vmem:[#allocation117_spill] sm:$0xff]  ;;  %v10192_v58 = vld [vmem:[#allocation99_spill] sm:$0xff] }
 0x5b9   :  { %5382 = vmatprep.subr.bf16.mxu0 %v10182_v28  ;;  %5446 = vmatprep.subr.bf16.mxu1 %v10183_v14  ;;  %v10193_v28 = vld [vmem:[#allocation118_spill] sm:$0xff]  ;;  %v10194_v14 = vld [vmem:[#allocation4_spill] sm:$0xff] }
 0x5bc   :  { %5384 = vmatpush1.bf16.msra.mxu0 %v10184_v9  ;;  %5448 = vmatpush1.bf16.msra.mxu1 %v10185_v52  ;;  %v10195_v9 = vld [vmem:[#allocation24_spill] sm:$0xff]  ;;  %v10260_v52 = vld [vmem:[#allocation125_spill] sm:$0xff] }
 0x5bd   :  { %5386 = vmatprep.subr.bf16.mxu0 %v10186_v38  ;;  %5450 = vmatprep.subr.bf16.mxu1 %v10187_v21  ;;  %v10196_v21 = vld [vmem:[#allocation5_spill] sm:$0xff]  ;;  %v10205_v38 = vld [vmem:[#allocation46_spill] sm:$0xff] }
 0x5c0   :  { %5388 = vmatpush1.bf16.msra.mxu0 %v10188_v34  ;;  %5452 = vmatpush1.bf16.msra.mxu1 %v10189_v47  ;;  %v10197_v34 = vld [vmem:[#allocation38_spill] sm:$0xff] }
 0x5c1   :  { %5390 = vmatprep.subr.bf16.mxu0 %v10190_v12  ;;  %5454 = vmatprep.subr.bf16.mxu1 %v10191_v61  ;;  %v10198_v47 = vld [vmem:[#allocation6_spill] sm:$0xff]  ;;  %v10199_v12 = vld [vmem:[#allocation40_spill] sm:$0xff]  ;;  %v10200_v61 = vld [vmem:[#allocation7_spill] sm:$0xff] }
 0x5c4   :  { %5392 = vmatpush1.bf16.msra.mxu0 %v10192_v58  ;;  %5456 = vmatpush1.bf16.msra.mxu1 %v10193_v28  ;;  %v10201_v58 = vld [vmem:[#allocation42_spill] sm:$0xff]  ;;  %v10202_v28 = vld [vmem:[#allocation8_spill] sm:$0xff] }
 0x5c5   :  { %5458 = vmatprep.subr.bf16.mxu0 %v10194_v14  ;;  %5522 = vmatprep.subr.bf16.mxu1 %v10195_v9  ;;  %v10203_v14 = vld [vmem:[#allocation44_spill] sm:$0xff]  ;;  %v10204_v9 = vld [vmem:[#allocation9_spill] sm:$0xff] }
 0x5c7   :  { %2557 = vmatmul.mubr.f32.vlgmr.msra.gmra.mrb[6].mxu0 %v8765_v39  ;;  %2628 = vmatmul.mubr.f32.vlgmr.msra.gmra.mrb[66].mxu1 %v8765_v39  ;;  %v10206_v39 = vld [vmem:[#allocation10_spill] sm:$0xff] }
 0x5c8   :  { %5460 = vmatpush1.bf16.msra.mxu0 %v10196_v21  ;;  %5524 = vmatpush1.bf16.msra.mxu1 %v10197_v34  ;;  %v10207_v21 = vld [vmem:[#allocation48_spill] sm:$0xff]  ;;  %v10208_v34 = vld [vmem:[#allocation11_spill] sm:$0xff] }
 0x5c9   :  { %5462 = vmatprep.subr.bf16.mxu0 %v10198_v47  ;;  %5526 = vmatprep.subr.bf16.mxu1 %v10199_v12  ;;  %v10209_v47 = vld [vmem:[#allocation50_spill] sm:$0xff]  ;;  %v10210_v12 = vld [vmem:[#allocation12_spill] sm:$0xff] }
 0x5cc   :  { %5464 = vmatpush1.bf16.msra.mxu0 %v10200_v61  ;;  %5528 = vmatpush1.bf16.msra.mxu1 %v10201_v58  ;;  %v10211_v61 = vld [vmem:[#allocation52_spill] sm:$0xff]  ;;  %v10212_v58 = vld [vmem:[#allocation13_spill] sm:$0xff] }
 0x5cd   :  { %5466 = vmatprep.subr.bf16.mxu0 %v10202_v28  ;;  %5530 = vmatprep.subr.bf16.mxu1 %v10203_v14  ;;  %v10213_v28 = vld [vmem:[#allocation54_spill] sm:$0xff] }
 0x5ce   :  { %v10214_v14 = vld [vmem:[#allocation14_spill] sm:$0xff] }
 0x5d0   :  { %5468 = vmatpush1.bf16.msra.mxu0 %v10204_v9  ;;  %5532 = vmatpush1.bf16.msra.mxu1 %v10205_v38  ;;  %v10215_v9 = vld [vmem:[#allocation56_spill] sm:$0xff]  ;;  %v10216_v38 = vld [vmem:[#allocation15_spill] sm:$0xff] }
 0x5d1   :  { %5470 = vmatprep.subr.bf16.mxu0 %v10206_v39  ;;  %5534 = vmatprep.subr.bf16.mxu1 %v10207_v21  ;;  %v10217_v39 = vld [vmem:[#allocation58_spill] sm:$0xff]  ;;  %v10218_v21 = vld [vmem:[#allocation16_spill] sm:$0xff] }
 0x5d4   :  { %5472 = vmatpush1.bf16.msra.mxu0 %v10208_v34  ;;  %5536 = vmatpush1.bf16.msra.mxu1 %v10209_v47  ;;  %v10219_v34 = vld [vmem:[#allocation60_spill] sm:$0xff]  ;;  %v10220_v47 = vld [vmem:[#allocation17_spill] sm:$0xff] }
 0x5d5   :  { %5474 = vmatprep.subr.bf16.mxu0 %v10210_v12  ;;  %5538 = vmatprep.subr.bf16.mxu1 %v10211_v61  ;;  %v10221_v12 = vld [vmem:[#allocation62_spill] sm:$0xff] }
 0x5d6   :  { %v10222_v61 = vld [vmem:[#allocation18_spill] sm:$0xff] }
 0x5d8   :  { %5476 = vmatpush1.bf16.msra.mxu0 %v10212_v58  ;;  %5540 = vmatpush1.bf16.msra.mxu1 %v10213_v28  ;;  %v10223_v58 = vld [vmem:[#allocation64_spill] sm:$0xff]  ;;  %v10224_v28 = vld [vmem:[#allocation19_spill] sm:$0xff] }
 0x5d9   :  { %5478 = vmatprep.subr.bf16.mxu0 %v10214_v14  ;;  %5542 = vmatprep.subr.bf16.mxu1 %v10215_v9  ;;  %v10225_v14 = vld [vmem:[#allocation66_spill] sm:$0xff]  ;;  %v10226_v9 = vld [vmem:[#allocation20_spill] sm:$0xff] }
 0x5dc   :  { %5480 = vmatpush1.bf16.msra.mxu0 %v10216_v38  ;;  %5544 = vmatpush1.bf16.msra.mxu1 %v10217_v39  ;;  %v10227_v38 = vld [vmem:[#allocation68_spill] sm:$0xff]  ;;  %v10228_v39 = vld [vmem:[#allocation21_spill] sm:$0xff] }
 0x5dd   :  { %5482 = vmatprep.subr.bf16.mxu0 %v10218_v21  ;;  %5546 = vmatprep.subr.bf16.mxu1 %v10219_v34  ;;  %v10229_v21 = vld [vmem:[#allocation70_spill] sm:$0xff] }
 0x5de   :  { %v10230_v34 = vld [vmem:[#allocation22_spill] sm:$0xff] }
 0x5e0   :  { %5484 = vmatpush1.bf16.msra.mxu0 %v10220_v47  ;;  %5548 = vmatpush1.bf16.msra.mxu1 %v10221_v12  ;;  %v10231_v47 = vld [vmem:[#allocation72_spill] sm:$0xff]  ;;  %v10232_v12 = vld [vmem:[#allocation23_spill] sm:$0xff] }
 0x5e1   :  { %5486 = vmatprep.subr.bf16.mxu0 %v10222_v61  ;;  %5550 = vmatprep.subr.bf16.mxu1 %v10223_v58  ;;  %v10233_v61 = vld [vmem:[#allocation74_spill] sm:$0xff]  ;;  %v10234_v58 = vld [vmem:[#allocation25_spill] sm:$0xff] }
 0x5e4   :  { %5488 = vmatpush1.bf16.msra.mxu0 %v10224_v28  ;;  %5552 = vmatpush1.bf16.msra.mxu1 %v10225_v14  ;;  %v10235_v28 = vld [vmem:[#allocation76_spill] sm:$0xff]  ;;  %v10236_v14 = vld [vmem:[#allocation26_spill] sm:$0xff] }
 0x5e5   :  { %5490 = vmatprep.subr.bf16.mxu0 %v10226_v9  ;;  %5554 = vmatprep.subr.bf16.mxu1 %v10227_v38  ;;  %v10237_v9 = vld [vmem:[#allocation78_spill] sm:$0xff]  ;;  %v10238_v38 = vld [vmem:[#allocation27_spill] sm:$0xff] }
 0x5e8   :  { %5492 = vmatpush1.bf16.msra.mxu0 %v10228_v39  ;;  %5556 = vmatpush1.bf16.msra.mxu1 %v10229_v21  ;;  %v10239_v39 = vld [vmem:[#allocation80_spill] sm:$0xff] }
 0x5e9   :  { %5494 = vmatprep.subr.bf16.mxu0 %v10230_v34  ;;  %5558 = vmatprep.subr.bf16.mxu1 %v10231_v47  ;;  %v10240_v21 = vld [vmem:[#allocation28_spill] sm:$0xff]  ;;  %v10241_v34 = vld [vmem:[#allocation82_spill] sm:$0xff]  ;;  %v10242_v47 = vld [vmem:[#allocation29_spill] sm:$0xff] }
 0x5ec   :  { %5496 = vmatpush1.bf16.msra.mxu0 %v10232_v12  ;;  %5560 = vmatpush1.bf16.msra.mxu1 %v10233_v61  ;;  %v10243_v12 = vld [vmem:[#allocation84_spill] sm:$0xff]  ;;  %v10244_v61 = vld [vmem:[#allocation30_spill] sm:$0xff] }
 0x5ed   :  { %5498 = vmatprep.subr.bf16.mxu0 %v10234_v58  ;;  %5562 = vmatprep.subr.bf16.mxu1 %v10235_v28  ;;  %v10245_v58 = vld [vmem:[#allocation86_spill] sm:$0xff]  ;;  %v10246_v28 = vld [vmem:[#allocation31_spill] sm:$0xff] }
 0x5f0   :  { %5500 = vmatpush1.bf16.msra.mxu0 %v10236_v14  ;;  %5564 = vmatpush1.bf16.msra.mxu1 %v10237_v9  ;;  %v10247_v14 = vld [vmem:[#allocation88_spill] sm:$0xff] }
 0x5f1   :  { %5502 = vmatprep.subr.bf16.mxu0 %v10238_v38  ;;  %5566 = vmatprep.subr.bf16.mxu1 %v10239_v39  ;;  %v10248_v9 = vld [vmem:[#allocation32_spill] sm:$0xff]  ;;  %v10249_v38 = vld [vmem:[#allocation90_spill] sm:$0xff]  ;;  %v10250_v39 = vld [vmem:[#allocation33_spill] sm:$0xff] }
 0x5f4   :  { %5504 = vmatpush1.bf16.msra.mxu0 %v10240_v21  ;;  %5568 = vmatpush1.bf16.msra.mxu1 %v10241_v34  ;;  %v10251_v21 = vld [vmem:[#allocation92_spill] sm:$0xff]  ;;  %v10252_v34 = vld [vmem:[#allocation34_spill] sm:$0xff] }
 0x5f5   :  { %5506 = vmatprep.subr.bf16.mxu0 %v10242_v47  ;;  %5570 = vmatprep.subr.bf16.mxu1 %v10243_v12  ;;  %v10253_v47 = vld [vmem:[#allocation94_spill] sm:$0xff]  ;;  %v10254_v12 = vld [vmem:[#allocation35_spill] sm:$0xff] }
 0x5f8   :  { %5508 = vmatpush1.bf16.msra.mxu0 %v10244_v61  ;;  %5572 = vmatpush1.bf16.msra.mxu1 %v10245_v58  ;;  %v10255_v61 = vld [vmem:[#allocation96_spill] sm:$0xff] }
 0x5f9   :  { %5510 = vmatprep.subr.bf16.mxu0 %v10246_v28  ;;  %5574 = vmatprep.subr.bf16.mxu1 %v10247_v14  ;;  %v10256_v58 = vld [vmem:[#allocation36_spill] sm:$0xff]  ;;  %v10257_v28 = vld [vmem:[#allocation98_spill] sm:$0xff]  ;;  %v10258_v14 = vld [vmem:[#allocation37_spill] sm:$0xff] }
 0x5fc   :  { %5512 = vmatpush1.bf16.msra.mxu0 %v10248_v9  ;;  %5576 = vmatpush1.bf16.msra.mxu1 %v10249_v38  ;;  %v10259_v9 = vld [vmem:[#allocation100_spill] sm:$0xff] }
 0x5fd   :  { %5514 = vmatprep.subr.bf16.mxu0 %v10250_v39  ;;  %5578 = vmatprep.subr.bf16.mxu1 %v10251_v21 }
 0x600   :  { %5516 = vmatpush1.bf16.msra.mxu0 %v10252_v34  ;;  %5580 = vmatpush1.bf16.msra.mxu1 %v10253_v47 }
 0x601   :  { %5518 = vmatprep.subr.bf16.mxu0 %v10254_v12  ;;  %5582 = vmatprep.subr.bf16.mxu1 %v10255_v61 }
 0x604   :  { %5520 = vmatpush1.bf16.msra.mxu0 %v10256_v58  ;;  %5584 = vmatpush1.bf16.msra.mxu1 %v10257_v28 }
 0x605   :  { %5586 = vmatprep.subr.bf16.mxu0 %v10258_v14  ;;  %5650 = vmatprep.subr.bf16.mxu1 %v10259_v9 }
 0x65a   :  { %v2416_v38 = vpop.f32.mrb[24].mxu0  ;;  %v2487_v39 = vpop.f32.mrb[64].mxu1 }
 0x65b   :  { %v2637_v21 = vadd.f32 %v2416_v38, %v10260_v52  ;;  %v2639_v34 = vadd.f32 %v2487_v39, %v10261_v59  ;;  %v2418_v42 = vpop.f32.mrb[25].mxu0  ;;  %v2489_v47 = vpop.f32.mrb[65].mxu1 }
 0x65c   :  { %v2638_v12 = vadd.f32 %v2418_v42, %v10262_v8  ;;  %v2661_v61 = vadd.f32 %v2489_v47, %v10263_v27  ;;  %v10264_v42 = vld [vmem:[#allocation154_spill] sm:$0xff] }
 0x65d   :  { %v4064_v6 = vmul.f32 -1.442695, %v2637_v21  ;;  %v4066_v21 = vmul.f32 -1.442695, %v2639_v34 }
 0x65e   :  { %v4065_v58 = vmul.f32 -1.442695, %v2638_v12  ;;  %v4067_v10 = vmul.f32 -1.442695, %v2661_v61 }
 0x65f   :  { %6450 = vpow2.f32 %v4064_v6  ;;  %v10265_v6 = vld [vmem:[#allocation153_spill] sm:$0xff] }
 0x660   :  { %6452 = vpow2.f32 %v4065_v58 }
 0x661   :  { %6454 = vpow2.f32 %v4067_v10 }
 0x669   :  { %v6451_v14 = vpop.eup %6450 }
 0x66a   :  { %v6453_v9 = vpop.eup %6452  ;;  %v2649_v46 = vadd.f32 1.0, %v6451_v14 }
 0x66b   :  { %v6455_v28 = vpop.eup %6454  ;;  %v2650_v2 = vadd.f32 1.0, %v6453_v9 }
 0x66c   :  { %v2673_v52 = vadd.f32 1.0, %v6455_v28  ;;  %6456 = vrcp.f32 %v2649_v46 }
 0x66d   :  { %6458 = vrcp.f32 %v2650_v2 }
 0x66e   :  { %6460 = vrcp.f32 %v2673_v52 }
 0x676   :  { %v6457_v28 = vpop.eup %6456 }
 0x677   :  { %v6459_v46 = vpop.eup %6458 }
 0x678   :  { %v6461_v9 = vpop.eup %6460 }
 0x69a   :  { %v2558_v39 = vpop.f32.mrb[6].mxu0  ;;  %v2629_v59 = vpop.f32.mrb[66].mxu1 }
 0x69b   :  { %v6295_v8 = vadd.f32 %v2558_v39, %v8278_v62  ;;  %v2683_v27 = vadd.f32 %v2629_v59, %v10264_v42  ;;  %v2560_v38 = vpop.f32.mrb[7].mxu0  ;;  %v2631_v12 = vpop.f32.mrb[67].mxu1  ;;  %v2688_v39 = vmul.f32 %v6459_v46, %v8756_v37 }
 0x69c   :  { %v2686_v61 = vadd.f32 %v2631_v12, %v10265_v6  ;;  %v6296_v58 = vadd.f32 %v2560_v38, %v8283_v32 }
 0x69d   :  { %v4068_v10 = vmul.f32 -1.442695, %v6295_v8  ;;  %6462 = vtanh.f32 %v2683_v27 }
 0x69e   :  { %6464 = vtanh.f32 %v2686_v61  ;;  %v4069_v14 = vmul.f32 -1.442695, %v6296_v58 }
 0x69f   :  { %6466 = vpow2.f32 %v4068_v10 }
 0x6a0   :  { %6468 = vpow2.f32 %v4069_v14 }
 0x6a1   :  { %6470 = vpow2.f32 %v4066_v21  ;;  %v10269_v21 = vld [vmem:[#allocation108_spill] sm:$0xff] }
 0x6a7   :  { %v6463_v2 = vpop.eup %6462 }
 0x6a8   :  { %v6465_v47 = vpop.eup %6464  ;;  %v2689_v59 = vmul.f32 %v6463_v2, %v6457_v28 }
 0x6a9   :  { %v6467_v42 = vpop.eup %6466  ;;  %v2692_v52 = vmul.f32 %v6465_v47, %v6461_v9  ;;  %v10270_v47 = vld [vmem:[#allocation81_spill] sm:$0xff] }
 0x6aa   :  { %v2674_v12 = vadd.f32 1.0, %v6467_v42  ;;  %v8912_v8 = vadd.f32 %v2689_v59, %v2688_v39  ;;  %v6469_v27 = vpop.eup %6468  ;;  %v10271_v39 = vld [vmem:[#allocation109_spill] sm:$0xff]  ;;  %v10272_v59 = vld [vmem:[#allocation83_spill] sm:$0xff]  ;;  %v10273_v42 = vld [vmem:[#allocation110_spill] sm:$0xff] }
 0x6ab   :  { %v6471_v38 = vpop.eup %6470  ;;  %v2675_v61 = vadd.f32 1.0, %v6469_v27  ;;  %v10276_v27 = vld [vmem:[#allocation87_spill] sm:$0xff] }
 0x6ac   :  { %6472 = vrcp.f32 %v2674_v12  ;;  %v2651_v58 = vadd.f32 1.0, %v6471_v38  ;;  %v10275_v12 = vld [vmem:[#allocation111_spill] sm:$0xff]  ;;  %v10277_v38 = vld [vmem:[#allocation112_spill] sm:$0xff] }
 0x6ad   :  { %6474 = vtanh.f32 %v8912_v8 }
 0x6ae   :  { %6476 = vrcp.f32 %v2675_v61  ;;  %v10279_v61 = vld [vmem:[#allocation113_spill] sm:$0xff] }
 0x6b6   :  { %v6473_v6 = vpop.eup %6472 }
 0x6b7   :  { %v2691_v10 = vmul.f32 %v6473_v6, %v8760_v54  ;;  %v6475_v37 = vpop.eup %6474  ;;  %v10268_v54 = vld [vmem:[#allocation79_spill] sm:$0xff]  ;;  %v10278_v6 = vld [vmem:[#allocation89_spill] sm:$0xff] }
 0x6b8   :  { %v6477_v28 = vpop.eup %6476 }
 0x6b9   :  { %v8916_v34 = vadd.f32 %v2692_v52, %v2691_v10  ;;  %v10274_v52 = vld [vmem:[#allocation85_spill] sm:$0xff]  ;;  %v10280_v10 = vld [vmem:[#allocation91_spill] sm:$0xff] }
 0x6bb   :  { %6478 = vtanh.f32 %v8916_v34 }
 0x6bc   :  { %6480 = vrcp.f32 %v2651_v58  ;;  %v10281_v58 = vld [vmem:[#allocation114_spill] sm:$0xff] }
 0x6c5   :  { %v6479_v46 = vpop.eup %6478 }
 0x6c6   :  { %v6481_v14 = vpop.eup %6480  ;;  %v8919_v9 = vmul.f32 %v6479_v46, %v6477_v28  ;;  %v10283_v28 = vld [vmem:[#allocation115_spill] sm:$0xff] }
 0x6c7   :  { %v8921_v2 = vmul.f32 %v6481_v14, %v6475_v37  ;;  %v10282_v37 = vld [vmem:[#allocation93_spill] sm:$0xff]  ;;  %v10284_v46 = vld [vmem:[#allocation95_spill] sm:$0xff]  ;;  %v10285_v14 = vld [vmem:[#allocation116_spill] sm:$0xff] }
 0x6c8   :  { %10266 = vst [vmem:[#allocation49_spill] sm:$0xff] %v8919_v9  ;;  %2764 = vmatprep.mubr.f32.mxu0 %v8919_v9  ;;  %2835 = vmatprep.mubr.f32.mxu1 %v8919_v9 }
 0x6c9   :  { %10267 = vst [vmem:[#allocation51_spill] sm:$0xff] %v8921_v2  ;;  %2765 = vmatmul.mubr.f32.vlgmr.msra.gmra.mrb[26].mxu0 %v8921_v2  ;;  %2836 = vmatmul.mubr.f32.vlgmr.msra.gmra.mrb[68].mxu1 %v8921_v2 }
 0x6ca   :  { %5588 = vmatpush1.bf16.msra.mxu0 %v9882_v48  ;;  %5652 = vmatpush1.bf16.msra.mxu1 %v7765_v3 }
 0x6cb   :  { %2906 = vmatprep.mubr.f32.mxu0 %v8919_v9  ;;  %2977 = vmatprep.mubr.f32.mxu1 %v8919_v9  ;;  %v10286_v9 = vld [vmem:[#allocation97_spill] sm:$0xff] }
 0x6cc   :  { %5590 = vmatprep.subr.bf16.mxu0 %v9883_v7  ;;  %5654 = vmatprep.subr.bf16.mxu1 %v9884_v45 }
 0x6ce   :  { %5592 = vmatpush1.bf16.msra.mxu0 %v9885_v51  ;;  %5656 = vmatpush1.bf16.msra.mxu1 %v7787_v26 }
 0x6cf   :  { %5594 = vmatprep.subr.bf16.mxu0 %v9886_v11  ;;  %5658 = vmatprep.subr.bf16.mxu1 %v7790_v15 }
 0x6d2   :  { %5596 = vmatpush1.bf16.msra.mxu0 %v9887_v55  ;;  %5660 = vmatpush1.bf16.msra.mxu1 %v7808_v25 }
 0x6d3   :  { %5598 = vmatprep.subr.bf16.mxu0 %v9888_v23  ;;  %5662 = vmatprep.subr.bf16.mxu1 %v7811_v57 }
 0x6d6   :  { %5600 = vmatpush1.bf16.msra.mxu0 %v9889_v33  ;;  %5664 = vmatpush1.bf16.msra.mxu1 %v7828_v4 }
 0x6d7   :  { %5602 = vmatprep.subr.bf16.mxu0 %v9890_v53  ;;  %5666 = vmatprep.subr.bf16.mxu1 %v7831_v5 }
 0x6da   :  { %5604 = vmatpush1.bf16.msra.mxu0 %v9891_v41  ;;  %5668 = vmatpush1.bf16.msra.mxu1 %v7848_v40 }
 0x6db   :  { %5606 = vmatprep.subr.bf16.mxu0 %v9892_v43  ;;  %5670 = vmatprep.subr.bf16.mxu1 %v7851_v16 }
 0x6de   :  { %5608 = vmatpush1.bf16.msra.mxu0 %v9893_v44  ;;  %5672 = vmatpush1.bf16.msra.mxu1 %v7868_v49 }
 0x6df   :  { %5610 = vmatprep.subr.bf16.mxu0 %v9894_v0  ;;  %5674 = vmatprep.subr.bf16.mxu1 %v7871_v19 }
 0x6e2   :  { %5612 = vmatpush1.bf16.msra.mxu0 %v9895_v63  ;;  %5676 = vmatpush1.bf16.msra.mxu1 %v7888_v60 }
 0x6e3   :  { %5614 = vmatprep.subr.bf16.mxu0 %v9896_v35  ;;  %5678 = vmatprep.subr.bf16.mxu1 %v7891_v30 }
 0x6e6   :  { %5616 = vmatpush1.bf16.msra.mxu0 %v9897_v29  ;;  %5680 = vmatpush1.bf16.msra.mxu1 %v9980_v24 }
 0x6e7   :  { %5618 = vmatprep.subr.bf16.mxu0 %v9898_v1  ;;  %5682 = vmatprep.subr.bf16.mxu1 %v9981_v17 }
 0x6ea   :  { %5620 = vmatpush1.bf16.msra.mxu0 %v9899_v50  ;;  %5684 = vmatpush1.bf16.msra.mxu1 %v9982_v22 }
 0x6eb   :  { %5622 = vmatprep.subr.bf16.mxu0 %v9900_v31  ;;  %5686 = vmatprep.subr.bf16.mxu1 %v9983_v20 }
 0x6ee   :  { %5624 = vmatpush1.bf16.msra.mxu0 %v9901_v36  ;;  %5688 = vmatpush1.bf16.msra.mxu1 %v9984_v18 }
 0x6ef   :  { %5626 = vmatprep.subr.bf16.mxu0 %v9902_v56  ;;  %5690 = vmatprep.subr.bf16.mxu1 %v9985_v13 }
 0x6f2   :  { %5628 = vmatpush1.bf16.msra.mxu0 %v10268_v54  ;;  %5692 = vmatpush1.bf16.msra.mxu1 %v10269_v21 }
 0x6f3   :  { %5630 = vmatprep.subr.bf16.mxu0 %v10270_v47  ;;  %5694 = vmatprep.subr.bf16.mxu1 %v10271_v39 }
 0x6f6   :  { %5632 = vmatpush1.bf16.msra.mxu0 %v10272_v59  ;;  %5696 = vmatpush1.bf16.msra.mxu1 %v10273_v42  ;;  %v10358_v42 = vld [vmem:[#allocation128_spill] sm:$0xff]  ;;  %v10359_v59 = vld [vmem:[#allocation137_spill] sm:$0xff] }
 0x6f7   :  { %5634 = vmatprep.subr.bf16.mxu0 %v10274_v52  ;;  %5698 = vmatprep.subr.bf16.mxu1 %v10275_v12  ;;  %v10357_v12 = vld [vmem:[#allocation142_spill] sm:$0xff] }
 0x6fa   :  { %5636 = vmatpush1.bf16.msra.mxu0 %v10276_v27  ;;  %5700 = vmatpush1.bf16.msra.mxu1 %v10277_v38  ;;  %v10287_v27 = vld [vmem:[#allocation117_spill] sm:$0xff]  ;;  %v10288_v38 = vld [vmem:[#allocation99_spill] sm:$0xff] }
 0x6fb   :  { %5638 = vmatprep.subr.bf16.mxu0 %v10278_v6  ;;  %5702 = vmatprep.subr.bf16.mxu1 %v10279_v61  ;;  %v10289_v6 = vld [vmem:[#allocation118_spill] sm:$0xff]  ;;  %v10290_v61 = vld [vmem:[#allocation4_spill] sm:$0xff] }
 0x6fe   :  { %5640 = vmatpush1.bf16.msra.mxu0 %v10280_v10  ;;  %5704 = vmatpush1.bf16.msra.mxu1 %v10281_v58  ;;  %v10291_v10 = vld [vmem:[#allocation24_spill] sm:$0xff]  ;;  %v10356_v58 = vld [vmem:[#allocation127_spill] sm:$0xff] }
 0x6ff   :  { %5642 = vmatprep.subr.bf16.mxu0 %v10282_v37  ;;  %5706 = vmatprep.subr.bf16.mxu1 %v10283_v28  ;;  %v10292_v28 = vld [vmem:[#allocation5_spill] sm:$0xff]  ;;  %v10301_v37 = vld [vmem:[#allocation46_spill] sm:$0xff] }
 0x702   :  { %5644 = vmatpush1.bf16.msra.mxu0 %v10284_v46  ;;  %5708 = vmatpush1.bf16.msra.mxu1 %v10285_v14  ;;  %v10293_v46 = vld [vmem:[#allocation38_spill] sm:$0xff] }
 0x703   :  { %5646 = vmatprep.subr.bf16.mxu0 %v10286_v9  ;;  %5710 = vmatprep.subr.bf16.mxu1 %v10287_v27  ;;  %v10294_v14 = vld [vmem:[#allocation6_spill] sm:$0xff]  ;;  %v10295_v9 = vld [vmem:[#allocation40_spill] sm:$0xff]  ;;  %v10296_v27 = vld [vmem:[#allocation7_spill] sm:$0xff] }
 0x706   :  { %5648 = vmatpush1.bf16.msra.mxu0 %v10288_v38  ;;  %5712 = vmatpush1.bf16.msra.mxu1 %v10289_v6  ;;  %v10297_v38 = vld [vmem:[#allocation42_spill] sm:$0xff]  ;;  %v10298_v6 = vld [vmem:[#allocation8_spill] sm:$0xff] }
 0x707   :  { %5714 = vmatprep.subr.bf16.mxu0 %v10290_v61  ;;  %5778 = vmatprep.subr.bf16.mxu1 %v10291_v10  ;;  %v10299_v61 = vld [vmem:[#allocation44_spill] sm:$0xff]  ;;  %v10300_v10 = vld [vmem:[#allocation9_spill] sm:$0xff] }
 0x709   :  { %2907 = vmatmul.mubr.f32.vlgmr.msra.gmra.mrb[4].mxu0 %v8921_v2  ;;  %2978 = vmatmul.mubr.f32.vlgmr.msra.gmra.mrb[70].mxu1 %v8921_v2  ;;  %v10302_v2 = vld [vmem:[#allocation10_spill] sm:$0xff] }
 0x70a   :  { %5716 = vmatpush1.bf16.msra.mxu0 %v10292_v28  ;;  %5780 = vmatpush1.bf16.msra.mxu1 %v10293_v46  ;;  %v10303_v28 = vld [vmem:[#allocation48_spill] sm:$0xff]  ;;  %v10304_v46 = vld [vmem:[#allocation11_spill] sm:$0xff] }
 0x70b   :  { %5718 = vmatprep.subr.bf16.mxu0 %v10294_v14  ;;  %5782 = vmatprep.subr.bf16.mxu1 %v10295_v9  ;;  %v10305_v14 = vld [vmem:[#allocation50_spill] sm:$0xff]  ;;  %v10306_v9 = vld [vmem:[#allocation12_spill] sm:$0xff] }
 0x70e   :  { %5720 = vmatpush1.bf16.msra.mxu0 %v10296_v27  ;;  %5784 = vmatpush1.bf16.msra.mxu1 %v10297_v38  ;;  %v10307_v27 = vld [vmem:[#allocation52_spill] sm:$0xff]  ;;  %v10308_v38 = vld [vmem:[#allocation13_spill] sm:$0xff] }
 0x70f   :  { %5722 = vmatprep.subr.bf16.mxu0 %v10298_v6  ;;  %5786 = vmatprep.subr.bf16.mxu1 %v10299_v61  ;;  %v10309_v6 = vld [vmem:[#allocation54_spill] sm:$0xff] }
 0x710   :  { %v10310_v61 = vld [vmem:[#allocation14_spill] sm:$0xff] }
 0x712   :  { %5724 = vmatpush1.bf16.msra.mxu0 %v10300_v10  ;;  %5788 = vmatpush1.bf16.msra.mxu1 %v10301_v37  ;;  %v10311_v10 = vld [vmem:[#allocation56_spill] sm:$0xff]  ;;  %v10312_v37 = vld [vmem:[#allocation15_spill] sm:$0xff] }
 0x713   :  { %5726 = vmatprep.subr.bf16.mxu0 %v10302_v2  ;;  %5790 = vmatprep.subr.bf16.mxu1 %v10303_v28  ;;  %v10313_v2 = vld [vmem:[#allocation58_spill] sm:$0xff]  ;;  %v10314_v28 = vld [vmem:[#allocation16_spill] sm:$0xff] }
 0x716   :  { %5728 = vmatpush1.bf16.msra.mxu0 %v10304_v46  ;;  %5792 = vmatpush1.bf16.msra.mxu1 %v10305_v14  ;;  %v10315_v46 = vld [vmem:[#allocation60_spill] sm:$0xff]  ;;  %v10316_v14 = vld [vmem:[#allocation17_spill] sm:$0xff] }
 0x717   :  { %5730 = vmatprep.subr.bf16.mxu0 %v10306_v9  ;;  %5794 = vmatprep.subr.bf16.mxu1 %v10307_v27  ;;  %v10317_v9 = vld [vmem:[#allocation62_spill] sm:$0xff] }
 0x718   :  { %v10318_v27 = vld [vmem:[#allocation18_spill] sm:$0xff] }
 0x71a   :  { %5732 = vmatpush1.bf16.msra.mxu0 %v10308_v38  ;;  %5796 = vmatpush1.bf16.msra.mxu1 %v10309_v6  ;;  %v10319_v38 = vld [vmem:[#allocation64_spill] sm:$0xff]  ;;  %v10320_v6 = vld [vmem:[#allocation19_spill] sm:$0xff] }
 0x71b   :  { %5734 = vmatprep.subr.bf16.mxu0 %v10310_v61  ;;  %5798 = vmatprep.subr.bf16.mxu1 %v10311_v10  ;;  %v10321_v61 = vld [vmem:[#allocation66_spill] sm:$0xff]  ;;  %v10322_v10 = vld [vmem:[#allocation20_spill] sm:$0xff] }
 0x71e   :  { %5736 = vmatpush1.bf16.msra.mxu0 %v10312_v37  ;;  %5800 = vmatpush1.bf16.msra.mxu1 %v10313_v2  ;;  %v10323_v37 = vld [vmem:[#allocation68_spill] sm:$0xff]  ;;  %v10324_v2 = vld [vmem:[#allocation21_spill] sm:$0xff] }
 0x71f   :  { %5738 = vmatprep.subr.bf16.mxu0 %v10314_v28  ;;  %5802 = vmatprep.subr.bf16.mxu1 %v10315_v46  ;;  %v10325_v28 = vld [vmem:[#allocation70_spill] sm:$0xff] }
 0x720   :  { %v10326_v46 = vld [vmem:[#allocation22_spill] sm:$0xff] }
 0x722   :  { %5740 = vmatpush1.bf16.msra.mxu0 %v10316_v14  ;;  %5804 = vmatpush1.bf16.msra.mxu1 %v10317_v9  ;;  %v10327_v14 = vld [vmem:[#allocation72_spill] sm:$0xff]  ;;  %v10328_v9 = vld [vmem:[#allocation23_spill] sm:$0xff] }
 0x723   :  { %5742 = vmatprep.subr.bf16.mxu0 %v10318_v27  ;;  %5806 = vmatprep.subr.bf16.mxu1 %v10319_v38  ;;  %v10329_v27 = vld [vmem:[#allocation74_spill] sm:$0xff]  ;;  %v10330_v38 = vld [vmem:[#allocation25_spill] sm:$0xff] }
 0x726   :  { %5744 = vmatpush1.bf16.msra.mxu0 %v10320_v6  ;;  %5808 = vmatpush1.bf16.msra.mxu1 %v10321_v61  ;;  %v10331_v6 = vld [vmem:[#allocation76_spill] sm:$0xff]  ;;  %v10332_v61 = vld [vmem:[#allocation26_spill] sm:$0xff] }
 0x727   :  { %5746 = vmatprep.subr.bf16.mxu0 %v10322_v10  ;;  %5810 = vmatprep.subr.bf16.mxu1 %v10323_v37  ;;  %v10333_v10 = vld [vmem:[#allocation78_spill] sm:$0xff]  ;;  %v10334_v37 = vld [vmem:[#allocation27_spill] sm:$0xff] }
 0x72a   :  { %5748 = vmatpush1.bf16.msra.mxu0 %v10324_v2  ;;  %5812 = vmatpush1.bf16.msra.mxu1 %v10325_v28  ;;  %v10335_v2 = vld [vmem:[#allocation80_spill] sm:$0xff] }
 0x72b   :  { %5750 = vmatprep.subr.bf16.mxu0 %v10326_v46  ;;  %5814 = vmatprep.subr.bf16.mxu1 %v10327_v14  ;;  %v10336_v28 = vld [vmem:[#allocation28_spill] sm:$0xff]  ;;  %v10337_v46 = vld [vmem:[#allocation82_spill] sm:$0xff]  ;;  %v10338_v14 = vld [vmem:[#allocation29_spill] sm:$0xff] }
 0x72e   :  { %5752 = vmatpush1.bf16.msra.mxu0 %v10328_v9  ;;  %5816 = vmatpush1.bf16.msra.mxu1 %v10329_v27  ;;  %v10339_v9 = vld [vmem:[#allocation84_spill] sm:$0xff]  ;;  %v10340_v27 = vld [vmem:[#allocation30_spill] sm:$0xff] }
 0x72f   :  { %5754 = vmatprep.subr.bf16.mxu0 %v10330_v38  ;;  %5818 = vmatprep.subr.bf16.mxu1 %v10331_v6  ;;  %v10341_v38 = vld [vmem:[#allocation86_spill] sm:$0xff]  ;;  %v10342_v6 = vld [vmem:[#allocation31_spill] sm:$0xff] }
 0x732   :  { %5756 = vmatpush1.bf16.msra.mxu0 %v10332_v61  ;;  %5820 = vmatpush1.bf16.msra.mxu1 %v10333_v10  ;;  %v10343_v61 = vld [vmem:[#allocation88_spill] sm:$0xff] }
 0x733   :  { %5758 = vmatprep.subr.bf16.mxu0 %v10334_v37  ;;  %5822 = vmatprep.subr.bf16.mxu1 %v10335_v2  ;;  %v10344_v10 = vld [vmem:[#allocation32_spill] sm:$0xff]  ;;  %v10345_v37 = vld [vmem:[#allocation90_spill] sm:$0xff]  ;;  %v10346_v2 = vld [vmem:[#allocation33_spill] sm:$0xff] }
 0x736   :  { %5760 = vmatpush1.bf16.msra.mxu0 %v10336_v28  ;;  %5824 = vmatpush1.bf16.msra.mxu1 %v10337_v46  ;;  %v10347_v28 = vld [vmem:[#allocation92_spill] sm:$0xff]  ;;  %v10348_v46 = vld [vmem:[#allocation34_spill] sm:$0xff] }
 0x737   :  { %5762 = vmatprep.subr.bf16.mxu0 %v10338_v14  ;;  %5826 = vmatprep.subr.bf16.mxu1 %v10339_v9  ;;  %v10349_v14 = vld [vmem:[#allocation94_spill] sm:$0xff]  ;;  %v10350_v9 = vld [vmem:[#allocation35_spill] sm:$0xff] }
 0x73a   :  { %5764 = vmatpush1.bf16.msra.mxu0 %v10340_v27  ;;  %5828 = vmatpush1.bf16.msra.mxu1 %v10341_v38  ;;  %v10351_v27 = vld [vmem:[#allocation96_spill] sm:$0xff] }
 0x73b   :  { %5766 = vmatprep.subr.bf16.mxu0 %v10342_v6  ;;  %5830 = vmatprep.subr.bf16.mxu1 %v10343_v61  ;;  %v10352_v38 = vld [vmem:[#allocation36_spill] sm:$0xff]  ;;  %v10353_v6 = vld [vmem:[#allocation98_spill] sm:$0xff]  ;;  %v10354_v61 = vld [vmem:[#allocation37_spill] sm:$0xff] }
 0x73e   :  { %5768 = vmatpush1.bf16.msra.mxu0 %v10344_v10  ;;  %5832 = vmatpush1.bf16.msra.mxu1 %v10345_v37  ;;  %v10355_v10 = vld [vmem:[#allocation100_spill] sm:$0xff] }
 0x73f   :  { %5770 = vmatprep.subr.bf16.mxu0 %v10346_v2  ;;  %5834 = vmatprep.subr.bf16.mxu1 %v10347_v28 }
 0x742   :  { %5772 = vmatpush1.bf16.msra.mxu0 %v10348_v46  ;;  %5836 = vmatpush1.bf16.msra.mxu1 %v10349_v14 }
 0x743   :  { %5774 = vmatprep.subr.bf16.mxu0 %v10350_v9  ;;  %5838 = vmatprep.subr.bf16.mxu1 %v10351_v27 }
 0x746   :  { %5776 = vmatpush1.bf16.msra.mxu0 %v10352_v38  ;;  %5840 = vmatpush1.bf16.msra.mxu1 %v10353_v6 }
 0x747   :  { %5842 = vmatprep.subr.bf16.mxu0 %v10354_v61  ;;  %5906 = vmatprep.subr.bf16.mxu1 %v10355_v10 }
 0x79c   :  { %v2766_v37 = vpop.f32.mrb[26].mxu0  ;;  %v2837_v2 = vpop.f32.mrb[68].mxu1 }
 0x79d   :  { %v2987_v28 = vadd.f32 %v2766_v37, %v10356_v58  ;;  %v2989_v46 = vadd.f32 %v2837_v2, %v10357_v12  ;;  %v2768_v52 = vpop.f32.mrb[27].mxu0  ;;  %v2839_v14 = vpop.f32.mrb[69].mxu1 }
 0x79e   :  { %v2988_v9 = vadd.f32 %v2768_v52, %v10358_v42  ;;  %v3011_v27 = vadd.f32 %v2839_v14, %v10359_v59  ;;  %v10360_v52 = vld [vmem:[#allocation156_spill] sm:$0xff] }
 0x79f   :  { %v4070_v39 = vmul.f32 -1.442695, %v2987_v28  ;;  %v4072_v28 = vmul.f32 -1.442695, %v2989_v46 }
 0x7a0   :  { %v4071_v38 = vmul.f32 -1.442695, %v2988_v9  ;;  %v4073_v47 = vmul.f32 -1.442695, %v3011_v27 }
 0x7a1   :  { %6482 = vpow2.f32 %v4070_v39  ;;  %v10361_v39 = vld [vmem:[#allocation151_spill] sm:$0xff] }
 0x7a2   :  { %6484 = vpow2.f32 %v4071_v38 }
 0x7a3   :  { %6486 = vpow2.f32 %v4073_v47 }
 0x7ab   :  { %v6483_v61 = vpop.eup %6482 }
 0x7ac   :  { %v6485_v10 = vpop.eup %6484  ;;  %v2999_v21 = vadd.f32 1.0, %v6483_v61 }
 0x7ad   :  { %v6487_v6 = vpop.eup %6486  ;;  %v3000_v54 = vadd.f32 1.0, %v6485_v10 }
 0x7ae   :  { %v3023_v58 = vadd.f32 1.0, %v6487_v6  ;;  %6488 = vrcp.f32 %v2999_v21 }
 0x7af   :  { %6490 = vrcp.f32 %v3000_v54 }
 0x7b0   :  { %6492 = vrcp.f32 %v3023_v58 }
 0x7b8   :  { %v6489_v6 = vpop.eup %6488 }
 0x7b9   :  { %v6491_v21 = vpop.eup %6490 }
 0x7ba   :  { %v6493_v10 = vpop.eup %6492 }
 0x7dc   :  { %v2908_v2 = vpop.f32.mrb[4].mxu0  ;;  %v2979_v12 = vpop.f32.mrb[70].mxu1 }
 0x7dd   :  { %v6293_v42 = vadd.f32 %v2908_v2, %v8278_v62  ;;  %v3033_v59 = vadd.f32 %v2979_v12, %v10360_v52  ;;  %v2910_v37 = vpop.f32.mrb[5].mxu0  ;;  %v2981_v9 = vpop.f32.mrb[71].mxu1  ;;  %v3038_v2 = vmul.f32 %v6491_v21, %v8912_v8 }
 0x7de   :  { %v3036_v27 = vadd.f32 %v2981_v9, %v10361_v39  ;;  %v6294_v38 = vadd.f32 %v2910_v37, %v8283_v32 }
 0x7df   :  { %v4074_v47 = vmul.f32 -1.442695, %v6293_v42  ;;  %6494 = vtanh.f32 %v3033_v59 }
 0x7e0   :  { %6496 = vtanh.f32 %v3036_v27  ;;  %v4075_v61 = vmul.f32 -1.442695, %v6294_v38 }
 0x7e1   :  { %6498 = vpow2.f32 %v4074_v47 }
 0x7e2   :  { %6500 = vpow2.f32 %v4075_v61 }
 0x7e3   :  { %6502 = vpow2.f32 %v4072_v28  ;;  %v10365_v28 = vld [vmem:[#allocation108_spill] sm:$0xff] }
 0x7e9   :  { %v6495_v54 = vpop.eup %6494 }
 0x7ea   :  { %v6497_v14 = vpop.eup %6496  ;;  %v3039_v12 = vmul.f32 %v6495_v54, %v6489_v6 }
 0x7eb   :  { %v6499_v52 = vpop.eup %6498  ;;  %v3042_v58 = vmul.f32 %v6497_v14, %v6493_v10  ;;  %v10366_v14 = vld [vmem:[#allocation81_spill] sm:$0xff] }
 0x7ec   :  { %v3024_v9 = vadd.f32 1.0, %v6499_v52  ;;  %v9068_v42 = vadd.f32 %v3039_v12, %v3038_v2  ;;  %v6501_v59 = vpop.eup %6500  ;;  %v10367_v2 = vld [vmem:[#allocation109_spill] sm:$0xff]  ;;  %v10368_v12 = vld [vmem:[#allocation83_spill] sm:$0xff]  ;;  %v10369_v52 = vld [vmem:[#allocation110_spill] sm:$0xff] }
 0x7ed   :  { %v6503_v37 = vpop.eup %6502  ;;  %v3025_v27 = vadd.f32 1.0, %v6501_v59  ;;  %v10372_v59 = vld [vmem:[#allocation87_spill] sm:$0xff] }
 0x7ee   :  { %6504 = vrcp.f32 %v3024_v9  ;;  %v3001_v38 = vadd.f32 1.0, %v6503_v37  ;;  %v10371_v9 = vld [vmem:[#allocation111_spill] sm:$0xff]  ;;  %v10373_v37 = vld [vmem:[#allocation112_spill] sm:$0xff] }
 0x7ef   :  { %6506 = vtanh.f32 %v9068_v42 }
 0x7f0   :  { %6508 = vrcp.f32 %v3025_v27  ;;  %v10375_v27 = vld [vmem:[#allocation113_spill] sm:$0xff] }
 0x7f8   :  { %v6505_v39 = vpop.eup %6504 }
 0x7f9   :  { %v3041_v47 = vmul.f32 %v6505_v39, %v8916_v34  ;;  %v6507_v8 = vpop.eup %6506  ;;  %v10364_v34 = vld [vmem:[#allocation79_spill] sm:$0xff]  ;;  %v10374_v39 = vld [vmem:[#allocation89_spill] sm:$0xff] }
 0x7fa   :  { %v6509_v6 = vpop.eup %6508 }
 0x7fb   :  { %v9072_v46 = vadd.f32 %v3042_v58, %v3041_v47  ;;  %v10370_v58 = vld [vmem:[#allocation85_spill] sm:$0xff]  ;;  %v10376_v47 = vld [vmem:[#allocation91_spill] sm:$0xff] }
 0x7fd   :  { %6510 = vtanh.f32 %v9072_v46 }
 0x7fe   :  { %6512 = vrcp.f32 %v3001_v38  ;;  %v10377_v38 = vld [vmem:[#allocation114_spill] sm:$0xff] }
 0x807   :  { %v6511_v21 = vpop.eup %6510 }
 0x808   :  { %v6513_v61 = vpop.eup %6512  ;;  %v9075_v10 = vmul.f32 %v6511_v21, %v6509_v6  ;;  %v10379_v6 = vld [vmem:[#allocation115_spill] sm:$0xff] }
 0x809   :  { %v9077_v54 = vmul.f32 %v6513_v61, %v6507_v8  ;;  %v10378_v8 = vld [vmem:[#allocation93_spill] sm:$0xff]  ;;  %v10380_v21 = vld [vmem:[#allocation95_spill] sm:$0xff]  ;;  %v10381_v61 = vld [vmem:[#allocation116_spill] sm:$0xff] }
 0x80a   :  { %10362 = vst [vmem:[#allocation53_spill] sm:$0xff] %v9075_v10  ;;  %3114 = vmatprep.mubr.f32.mxu0 %v9075_v10  ;;  %3185 = vmatprep.mubr.f32.mxu1 %v9075_v10 }
 0x80b   :  { %10363 = vst [vmem:[#allocation55_spill] sm:$0xff] %v9077_v54  ;;  %3115 = vmatmul.mubr.f32.vlgmr.msra.gmra.mrb[28].mxu0 %v9077_v54  ;;  %3186 = vmatmul.mubr.f32.vlgmr.msra.gmra.mrb[72].mxu1 %v9077_v54 }
 0x80c   :  { %5844 = vmatpush1.bf16.msra.mxu0 %v9882_v48  ;;  %5908 = vmatpush1.bf16.msra.mxu1 %v7765_v3 }
 0x80d   :  { %3256 = vmatprep.mubr.f32.mxu0 %v9075_v10  ;;  %3327 = vmatprep.mubr.f32.mxu1 %v9075_v10  ;;  %v10382_v10 = vld [vmem:[#allocation97_spill] sm:$0xff] }
 0x80e   :  { %5846 = vmatprep.subr.bf16.mxu0 %v9883_v7  ;;  %5910 = vmatprep.subr.bf16.mxu1 %v9884_v45 }
 0x810   :  { %5848 = vmatpush1.bf16.msra.mxu0 %v9885_v51  ;;  %5912 = vmatpush1.bf16.msra.mxu1 %v7787_v26 }
 0x811   :  { %5850 = vmatprep.subr.bf16.mxu0 %v9886_v11  ;;  %5914 = vmatprep.subr.bf16.mxu1 %v7790_v15 }
 0x814   :  { %5852 = vmatpush1.bf16.msra.mxu0 %v9887_v55  ;;  %5916 = vmatpush1.bf16.msra.mxu1 %v7808_v25 }
 0x815   :  { %5854 = vmatprep.subr.bf16.mxu0 %v9888_v23  ;;  %5918 = vmatprep.subr.bf16.mxu1 %v7811_v57 }
 0x818   :  { %5856 = vmatpush1.bf16.msra.mxu0 %v9889_v33  ;;  %5920 = vmatpush1.bf16.msra.mxu1 %v7828_v4 }
 0x819   :  { %5858 = vmatprep.subr.bf16.mxu0 %v9890_v53  ;;  %5922 = vmatprep.subr.bf16.mxu1 %v7831_v5 }
 0x81c   :  { %5860 = vmatpush1.bf16.msra.mxu0 %v9891_v41  ;;  %5924 = vmatpush1.bf16.msra.mxu1 %v7848_v40 }
 0x81d   :  { %5862 = vmatprep.subr.bf16.mxu0 %v9892_v43  ;;  %5926 = vmatprep.subr.bf16.mxu1 %v7851_v16 }
 0x820   :  { %5864 = vmatpush1.bf16.msra.mxu0 %v9893_v44  ;;  %5928 = vmatpush1.bf16.msra.mxu1 %v7868_v49 }
 0x821   :  { %5866 = vmatprep.subr.bf16.mxu0 %v9894_v0  ;;  %5930 = vmatprep.subr.bf16.mxu1 %v7871_v19 }
 0x824   :  { %5868 = vmatpush1.bf16.msra.mxu0 %v9895_v63  ;;  %5932 = vmatpush1.bf16.msra.mxu1 %v7888_v60 }
 0x825   :  { %5870 = vmatprep.subr.bf16.mxu0 %v9896_v35  ;;  %5934 = vmatprep.subr.bf16.mxu1 %v7891_v30 }
 0x828   :  { %5872 = vmatpush1.bf16.msra.mxu0 %v9897_v29  ;;  %5936 = vmatpush1.bf16.msra.mxu1 %v9980_v24 }
 0x829   :  { %5874 = vmatprep.subr.bf16.mxu0 %v9898_v1  ;;  %5938 = vmatprep.subr.bf16.mxu1 %v9981_v17 }
 0x82c   :  { %5876 = vmatpush1.bf16.msra.mxu0 %v9899_v50  ;;  %5940 = vmatpush1.bf16.msra.mxu1 %v9982_v22 }
 0x82d   :  { %5878 = vmatprep.subr.bf16.mxu0 %v9900_v31  ;;  %5942 = vmatprep.subr.bf16.mxu1 %v9983_v20 }
 0x830   :  { %5880 = vmatpush1.bf16.msra.mxu0 %v9901_v36  ;;  %5944 = vmatpush1.bf16.msra.mxu1 %v9984_v18 }
 0x831   :  { %5882 = vmatprep.subr.bf16.mxu0 %v9902_v56  ;;  %5946 = vmatprep.subr.bf16.mxu1 %v9985_v13 }
 0x834   :  { %5884 = vmatpush1.bf16.msra.mxu0 %v10364_v34  ;;  %5948 = vmatpush1.bf16.msra.mxu1 %v10365_v28 }
 0x835   :  { %5886 = vmatprep.subr.bf16.mxu0 %v10366_v14  ;;  %5950 = vmatprep.subr.bf16.mxu1 %v10367_v2 }
 0x838   :  { %5888 = vmatpush1.bf16.msra.mxu0 %v10368_v12  ;;  %5952 = vmatpush1.bf16.msra.mxu1 %v10369_v52  ;;  %v10454_v52 = vld [vmem:[#allocation130_spill] sm:$0xff]  ;;  %v10455_v12 = vld [vmem:[#allocation135_spill] sm:$0xff] }
 0x839   :  { %5890 = vmatprep.subr.bf16.mxu0 %v10370_v58  ;;  %5954 = vmatprep.subr.bf16.mxu1 %v10371_v9  ;;  %v10453_v9 = vld [vmem:[#allocation144_spill] sm:$0xff] }
 0x83c   :  { %5892 = vmatpush1.bf16.msra.mxu0 %v10372_v59  ;;  %5956 = vmatpush1.bf16.msra.mxu1 %v10373_v37  ;;  %v10383_v59 = vld [vmem:[#allocation117_spill] sm:$0xff]  ;;  %v10384_v37 = vld [vmem:[#allocation99_spill] sm:$0xff] }
 0x83d   :  { %5894 = vmatprep.subr.bf16.mxu0 %v10374_v39  ;;  %5958 = vmatprep.subr.bf16.mxu1 %v10375_v27  ;;  %v10385_v39 = vld [vmem:[#allocation118_spill] sm:$0xff]  ;;  %v10386_v27 = vld [vmem:[#allocation4_spill] sm:$0xff] }
 0x840   :  { %5896 = vmatpush1.bf16.msra.mxu0 %v10376_v47  ;;  %5960 = vmatpush1.bf16.msra.mxu1 %v10377_v38  ;;  %v10387_v47 = vld [vmem:[#allocation24_spill] sm:$0xff]  ;;  %v10452_v38 = vld [vmem:[#allocation129_spill] sm:$0xff] }
 0x841   :  { %5898 = vmatprep.subr.bf16.mxu0 %v10378_v8  ;;  %5962 = vmatprep.subr.bf16.mxu1 %v10379_v6  ;;  %v10388_v6 = vld [vmem:[#allocation5_spill] sm:$0xff]  ;;  %v10397_v8 = vld [vmem:[#allocation46_spill] sm:$0xff] }
 0x844   :  { %5900 = vmatpush1.bf16.msra.mxu0 %v10380_v21  ;;  %5964 = vmatpush1.bf16.msra.mxu1 %v10381_v61  ;;  %v10389_v21 = vld [vmem:[#allocation38_spill] sm:$0xff] }
 0x845   :  { %5902 = vmatprep.subr.bf16.mxu0 %v10382_v10  ;;  %5966 = vmatprep.subr.bf16.mxu1 %v10383_v59  ;;  %v10390_v61 = vld [vmem:[#allocation6_spill] sm:$0xff]  ;;  %v10391_v10 = vld [vmem:[#allocation40_spill] sm:$0xff]  ;;  %v10392_v59 = vld [vmem:[#allocation7_spill] sm:$0xff] }
 0x848   :  { %5904 = vmatpush1.bf16.msra.mxu0 %v10384_v37  ;;  %5968 = vmatpush1.bf16.msra.mxu1 %v10385_v39  ;;  %v10393_v37 = vld [vmem:[#allocation42_spill] sm:$0xff]  ;;  %v10394_v39 = vld [vmem:[#allocation8_spill] sm:$0xff] }
 0x849   :  { %5970 = vmatprep.subr.bf16.mxu0 %v10386_v27  ;;  %6034 = vmatprep.subr.bf16.mxu1 %v10387_v47  ;;  %v10395_v27 = vld [vmem:[#allocation44_spill] sm:$0xff]  ;;  %v10396_v47 = vld [vmem:[#allocation9_spill] sm:$0xff] }
 0x84b   :  { %3257 = vmatmul.mubr.f32.vlgmr.msra.gmra.mrb[2].mxu0 %v9077_v54  ;;  %3328 = vmatmul.mubr.f32.vlgmr.msra.gmra.mrb[74].mxu1 %v9077_v54  ;;  %v10398_v54 = vld [vmem:[#allocation10_spill] sm:$0xff] }
 0x84c   :  { %5972 = vmatpush1.bf16.msra.mxu0 %v10388_v6  ;;  %6036 = vmatpush1.bf16.msra.mxu1 %v10389_v21  ;;  %v10399_v6 = vld [vmem:[#allocation48_spill] sm:$0xff]  ;;  %v10400_v21 = vld [vmem:[#allocation11_spill] sm:$0xff] }
 0x84d   :  { %5974 = vmatprep.subr.bf16.mxu0 %v10390_v61  ;;  %6038 = vmatprep.subr.bf16.mxu1 %v10391_v10  ;;  %v10401_v61 = vld [vmem:[#allocation50_spill] sm:$0xff]  ;;  %v10402_v10 = vld [vmem:[#allocation12_spill] sm:$0xff] }
 0x850   :  { %5976 = vmatpush1.bf16.msra.mxu0 %v10392_v59  ;;  %6040 = vmatpush1.bf16.msra.mxu1 %v10393_v37  ;;  %v10403_v59 = vld [vmem:[#allocation52_spill] sm:$0xff]  ;;  %v10404_v37 = vld [vmem:[#allocation13_spill] sm:$0xff] }
 0x851   :  { %5978 = vmatprep.subr.bf16.mxu0 %v10394_v39  ;;  %6042 = vmatprep.subr.bf16.mxu1 %v10395_v27  ;;  %v10405_v39 = vld [vmem:[#allocation54_spill] sm:$0xff] }
 0x852   :  { %v10406_v27 = vld [vmem:[#allocation14_spill] sm:$0xff] }
 0x854   :  { %5980 = vmatpush1.bf16.msra.mxu0 %v10396_v47  ;;  %6044 = vmatpush1.bf16.msra.mxu1 %v10397_v8  ;;  %v10407_v47 = vld [vmem:[#allocation56_spill] sm:$0xff]  ;;  %v10408_v8 = vld [vmem:[#allocation15_spill] sm:$0xff] }
 0x855   :  { %5982 = vmatprep.subr.bf16.mxu0 %v10398_v54  ;;  %6046 = vmatprep.subr.bf16.mxu1 %v10399_v6  ;;  %v10409_v54 = vld [vmem:[#allocation58_spill] sm:$0xff]  ;;  %v10410_v6 = vld [vmem:[#allocation16_spill] sm:$0xff] }
 0x858   :  { %5984 = vmatpush1.bf16.msra.mxu0 %v10400_v21  ;;  %6048 = vmatpush1.bf16.msra.mxu1 %v10401_v61  ;;  %v10411_v21 = vld [vmem:[#allocation60_spill] sm:$0xff]  ;;  %v10412_v61 = vld [vmem:[#allocation17_spill] sm:$0xff] }
 0x859   :  { %5986 = vmatprep.subr.bf16.mxu0 %v10402_v10  ;;  %6050 = vmatprep.subr.bf16.mxu1 %v10403_v59  ;;  %v10413_v10 = vld [vmem:[#allocation62_spill] sm:$0xff] }
 0x85a   :  { %v10414_v59 = vld [vmem:[#allocation18_spill] sm:$0xff] }
 0x85c   :  { %5988 = vmatpush1.bf16.msra.mxu0 %v10404_v37  ;;  %6052 = vmatpush1.bf16.msra.mxu1 %v10405_v39  ;;  %v10415_v37 = vld [vmem:[#allocation64_spill] sm:$0xff]  ;;  %v10416_v39 = vld [vmem:[#allocation19_spill] sm:$0xff] }
 0x85d   :  { %5990 = vmatprep.subr.bf16.mxu0 %v10406_v27  ;;  %6054 = vmatprep.subr.bf16.mxu1 %v10407_v47  ;;  %v10417_v27 = vld [vmem:[#allocation66_spill] sm:$0xff]  ;;  %v10418_v47 = vld [vmem:[#allocation20_spill] sm:$0xff] }
 0x860   :  { %5992 = vmatpush1.bf16.msra.mxu0 %v10408_v8  ;;  %6056 = vmatpush1.bf16.msra.mxu1 %v10409_v54  ;;  %v10419_v8 = vld [vmem:[#allocation68_spill] sm:$0xff]  ;;  %v10420_v54 = vld [vmem:[#allocation21_spill] sm:$0xff] }
 0x861   :  { %5994 = vmatprep.subr.bf16.mxu0 %v10410_v6  ;;  %6058 = vmatprep.subr.bf16.mxu1 %v10411_v21  ;;  %v10421_v6 = vld [vmem:[#allocation70_spill] sm:$0xff] }
 0x862   :  { %v10422_v21 = vld [vmem:[#allocation22_spill] sm:$0xff] }
 0x864   :  { %5996 = vmatpush1.bf16.msra.mxu0 %v10412_v61  ;;  %6060 = vmatpush1.bf16.msra.mxu1 %v10413_v10  ;;  %v10423_v61 = vld [vmem:[#allocation72_spill] sm:$0xff]  ;;  %v10424_v10 = vld [vmem:[#allocation23_spill] sm:$0xff] }
 0x865   :  { %5998 = vmatprep.subr.bf16.mxu0 %v10414_v59  ;;  %6062 = vmatprep.subr.bf16.mxu1 %v10415_v37  ;;  %v10425_v59 = vld [vmem:[#allocation74_spill] sm:$0xff]  ;;  %v10426_v37 = vld [vmem:[#allocation25_spill] sm:$0xff] }
 0x868   :  { %6000 = vmatpush1.bf16.msra.mxu0 %v10416_v39  ;;  %6064 = vmatpush1.bf16.msra.mxu1 %v10417_v27  ;;  %v10427_v39 = vld [vmem:[#allocation76_spill] sm:$0xff]  ;;  %v10428_v27 = vld [vmem:[#allocation26_spill] sm:$0xff] }
 0x869   :  { %6002 = vmatprep.subr.bf16.mxu0 %v10418_v47  ;;  %6066 = vmatprep.subr.bf16.mxu1 %v10419_v8  ;;  %v10429_v47 = vld [vmem:[#allocation78_spill] sm:$0xff]  ;;  %v10430_v8 = vld [vmem:[#allocation27_spill] sm:$0xff] }
 0x86c   :  { %6004 = vmatpush1.bf16.msra.mxu0 %v10420_v54  ;;  %6068 = vmatpush1.bf16.msra.mxu1 %v10421_v6  ;;  %v10431_v54 = vld [vmem:[#allocation80_spill] sm:$0xff] }
 0x86d   :  { %6006 = vmatprep.subr.bf16.mxu0 %v10422_v21  ;;  %6070 = vmatprep.subr.bf16.mxu1 %v10423_v61  ;;  %v10432_v6 = vld [vmem:[#allocation28_spill] sm:$0xff]  ;;  %v10433_v21 = vld [vmem:[#allocation82_spill] sm:$0xff]  ;;  %v10434_v61 = vld [vmem:[#allocation29_spill] sm:$0xff] }
 0x870   :  { %6008 = vmatpush1.bf16.msra.mxu0 %v10424_v10  ;;  %6072 = vmatpush1.bf16.msra.mxu1 %v10425_v59  ;;  %v10435_v10 = vld [vmem:[#allocation84_spill] sm:$0xff]  ;;  %v10436_v59 = vld [vmem:[#allocation30_spill] sm:$0xff] }
 0x871   :  { %6010 = vmatprep.subr.bf16.mxu0 %v10426_v37  ;;  %6074 = vmatprep.subr.bf16.mxu1 %v10427_v39  ;;  %v10437_v37 = vld [vmem:[#allocation86_spill] sm:$0xff]  ;;  %v10438_v39 = vld [vmem:[#allocation31_spill] sm:$0xff] }
 0x874   :  { %6012 = vmatpush1.bf16.msra.mxu0 %v10428_v27  ;;  %6076 = vmatpush1.bf16.msra.mxu1 %v10429_v47  ;;  %v10439_v27 = vld [vmem:[#allocation88_spill] sm:$0xff] }
 0x875   :  { %6014 = vmatprep.subr.bf16.mxu0 %v10430_v8  ;;  %6078 = vmatprep.subr.bf16.mxu1 %v10431_v54  ;;  %v10440_v47 = vld [vmem:[#allocation32_spill] sm:$0xff]  ;;  %v10441_v8 = vld [vmem:[#allocation90_spill] sm:$0xff]  ;;  %v10442_v54 = vld [vmem:[#allocation33_spill] sm:$0xff] }
 0x878   :  { %6016 = vmatpush1.bf16.msra.mxu0 %v10432_v6  ;;  %6080 = vmatpush1.bf16.msra.mxu1 %v10433_v21  ;;  %v10443_v6 = vld [vmem:[#allocation92_spill] sm:$0xff]  ;;  %v10444_v21 = vld [vmem:[#allocation34_spill] sm:$0xff] }
 0x879   :  { %6018 = vmatprep.subr.bf16.mxu0 %v10434_v61  ;;  %6082 = vmatprep.subr.bf16.mxu1 %v10435_v10  ;;  %v10445_v61 = vld [vmem:[#allocation94_spill] sm:$0xff]  ;;  %v10446_v10 = vld [vmem:[#allocation35_spill] sm:$0xff] }
 0x87c   :  { %6020 = vmatpush1.bf16.msra.mxu0 %v10436_v59  ;;  %6084 = vmatpush1.bf16.msra.mxu1 %v10437_v37  ;;  %v10447_v59 = vld [vmem:[#allocation96_spill] sm:$0xff] }
 0x87d   :  { %6022 = vmatprep.subr.bf16.mxu0 %v10438_v39  ;;  %6086 = vmatprep.subr.bf16.mxu1 %v10439_v27  ;;  %v10448_v37 = vld [vmem:[#allocation36_spill] sm:$0xff]  ;;  %v10449_v39 = vld [vmem:[#allocation98_spill] sm:$0xff]  ;;  %v10450_v27 = vld [vmem:[#allocation37_spill] sm:$0xff] }
 0x880   :  { %6024 = vmatpush1.bf16.msra.mxu0 %v10440_v47  ;;  %6088 = vmatpush1.bf16.msra.mxu1 %v10441_v8  ;;  %v10451_v47 = vld [vmem:[#allocation100_spill] sm:$0xff] }
 0x881   :  { %6026 = vmatprep.subr.bf16.mxu0 %v10442_v54  ;;  %6090 = vmatprep.subr.bf16.mxu1 %v10443_v6 }
 0x884   :  { %6028 = vmatpush1.bf16.msra.mxu0 %v10444_v21  ;;  %6092 = vmatpush1.bf16.msra.mxu1 %v10445_v61 }
 0x885   :  { %6030 = vmatprep.subr.bf16.mxu0 %v10446_v10  ;;  %6094 = vmatprep.subr.bf16.mxu1 %v10447_v59 }
 0x888   :  { %6032 = vmatpush1.bf16.msra.mxu0 %v10448_v37  ;;  %6096 = vmatpush1.bf16.msra.mxu1 %v10449_v39 }
 0x889   :  { %6098 = vmatprep.subr.bf16.mxu0 %v10450_v27  ;;  %6162 = vmatprep.subr.bf16.mxu1 %v10451_v47 }
 0x8de   :  { %v3116_v8 = vpop.f32.mrb[28].mxu0  ;;  %v3187_v54 = vpop.f32.mrb[72].mxu1 }
 0x8df   :  { %v3337_v6 = vadd.f32 %v3116_v8, %v10452_v38  ;;  %v3339_v21 = vadd.f32 %v3187_v54, %v10453_v9  ;;  %v3118_v58 = vpop.f32.mrb[29].mxu0  ;;  %v3189_v61 = vpop.f32.mrb[73].mxu1 }
 0x8e0   :  { %v3338_v10 = vadd.f32 %v3118_v58, %v10454_v52  ;;  %v3361_v59 = vadd.f32 %v3189_v61, %v10455_v12  ;;  %v10456_v58 = vld [vmem:[#allocation158_spill] sm:$0xff] }
 0x8e1   :  { %v4076_v2 = vmul.f32 -1.442695, %v3337_v6 }
 0x8e2   :  { %v4077_v37 = vmul.f32 -1.442695, %v3338_v10  ;;  %v4079_v14 = vmul.f32 -1.442695, %v3361_v59 }
 0x8e3   :  { %6514 = vpow2.f32 %v4076_v2  ;;  %v10457_v2 = vld [vmem:[#allocation149_spill] sm:$0xff] }
 0x8e4   :  { %6516 = vpow2.f32 %v4077_v37 }
 0x8e5   :  { %6518 = vpow2.f32 %v4079_v14 }
 0x8ed   :  { %v6515_v39 = vpop.eup %6514 }
 0x8ee   :  { %v6517_v27 = vpop.eup %6516  ;;  %v3349_v28 = vadd.f32 1.0, %v6515_v39 }
 0x8ef   :  { %v6519_v47 = vpop.eup %6518  ;;  %v3350_v34 = vadd.f32 1.0, %v6517_v27  ;;  %v4078_v27 = vmul.f32 -1.442695, %v3339_v21 }
 0x8f0   :  { %v3373_v38 = vadd.f32 1.0, %v6519_v47  ;;  %6520 = vrcp.f32 %v3349_v28 }
 0x8f1   :  { %6522 = vrcp.f32 %v3350_v34 }
 0x8f2   :  { %6524 = vrcp.f32 %v3373_v38 }
 0x8fa   :  { %v6521_v59 = vpop.eup %6520 }
 0x8fb   :  { %v6523_v28 = vpop.eup %6522 }
 0x8fc   :  { %v6525_v39 = vpop.eup %6524 }
 0x91e   :  { %v3258_v9 = vpop.f32.mrb[2].mxu0  ;;  %v3329_v8 = vpop.f32.mrb[74].mxu1 }
 0x91f   :  { %v6291_v52 = vadd.f32 %v3258_v9, %v8278_v62  ;;  %v3383_v12 = vadd.f32 %v3329_v8, %v10456_v58  ;;  %v3260_v54 = vpop.f32.mrb[3].mxu0  ;;  %v3331_v6 = vpop.f32.mrb[75].mxu1  ;;  %v3388_v9 = vmul.f32 %v6523_v28, %v9068_v42 }
 0x920   :  { %v3386_v61 = vadd.f32 %v3331_v6, %v10457_v2  ;;  %v6292_v10 = vadd.f32 %v3260_v54, %v8283_v32 }
 0x921   :  { %v4080_v14 = vmul.f32 -1.442695, %v6291_v52  ;;  %6526 = vtanh.f32 %v3383_v12 }
 0x922   :  { %6528 = vtanh.f32 %v3386_v61  ;;  %v4081_v37 = vmul.f32 -1.442695, %v6292_v10 }
 0x923   :  { %6530 = vpow2.f32 %v4080_v14 }
 0x924   :  { %6532 = vpow2.f32 %v4081_v37 }
 0x925   :  { %6534 = vpow2.f32 %v4078_v27  ;;  %v3789_v27 = vld [vmem:[%s9456_s4 + $0xb8] sm:$0xff] }
 0x92b   :  { %v6527_v34 = vpop.eup %6526 }
 0x92c   :  { %v6529_v47 = vpop.eup %6528  ;;  %v3389_v8 = vmul.f32 %v6527_v34, %v6521_v59 }
 0x92d   :  { %v6531_v58 = vpop.eup %6530  ;;  %v3392_v38 = vmul.f32 %v6529_v47, %v6525_v39 }
 0x92e   :  { %v3374_v6 = vadd.f32 1.0, %v6531_v58  ;;  %v9224_v52 = vadd.f32 %v3389_v8, %v3388_v9  ;;  %v6533_v12 = vpop.eup %6532  ;;  %v3772_v9 = vld [vmem:[%s9456_s4 + $0x30] sm:$0xff]  ;;  %v3773_v8 = vld [vmem:[%s9456_s4 + $0x38] sm:$0xff] }
 0x92f   :  { %v6535_v54 = vpop.eup %6534  ;;  %v3375_v61 = vadd.f32 1.0, %v6533_v12  ;;  %v6239_v58 = vpack.c.bf16 %v3773_v8, %v3772_v9 }
 0x930   :  { %6536 = vrcp.f32 %v3374_v6  ;;  %v3351_v10 = vadd.f32 1.0, %v6535_v54  ;;  %v3791_v6 = vld [vmem:[%s9456_s4 + $0xc8] sm:$0xff]  ;;  %v3774_v54 = vld [vmem:[%s9456_s4 + $0x40] sm:$0xff] }
 0x931   :  { %6538 = vtanh.f32 %v9224_v52 }
 0x932   :  { %6540 = vrcp.f32 %v3375_v61 }
 0x93a   :  { %v6537_v2 = vpop.eup %6536 }
 0x93b   :  { %v3391_v14 = vmul.f32 %v6537_v2, %v9072_v46  ;;  %v6539_v42 = vpop.eup %6538  ;;  %v3788_v46 = vld [vmem:[%s9456_s4 + $0xb0] sm:$0xff]  ;;  %v3775_v2 = vld [vmem:[%s9456_s4 + $0x48] sm:$0xff] }
 0x93c   :  { %v6541_v59 = vpop.eup %6540  ;;  %v6237_v47 = vpack.c.bf16 %v3789_v27, %v3788_v46  ;;  %v6243_v61 = vpack.c.bf16 %v3775_v2, %v3774_v54  ;;  %v10485_v27 = vld [vmem:[#allocation147_spill] sm:$0xff] }
 0x93d   :  { %v9228_v21 = vadd.f32 %v3392_v38, %v3391_v14  ;;  %v3790_v38 = vld [vmem:[%s9456_s4 + $0xc0] sm:$0xff]  ;;  %v3792_v14 = vld [vmem:[%s9456_s4 + $0xd0] sm:$0xff] }
 0x93e   :  { %v6241_v12 = vpack.c.bf16 %v3791_v6, %v3790_v38 }
 0x93f   :  { %6542 = vtanh.f32 %v9228_v21 }
 0x940   :  { %6544 = vrcp.f32 %v3351_v10  ;;  %v3793_v10 = vld [vmem:[%s9456_s4 + $0xd8] sm:$0xff] }
 0x949   :  { %v6543_v28 = vpop.eup %6542 }
 0x94a   :  { %v6545_v37 = vpop.eup %6544  ;;  %v9231_v39 = vmul.f32 %v6543_v28, %v6541_v59  ;;  %v6245_v59 = vpack.c.bf16 %v3793_v10, %v3792_v14  ;;  %v3777_v28 = vld [vmem:[%s9456_s4 + $0x58] sm:$0xff] }
 0x94b   :  { %v9233_v34 = vmul.f32 %v6545_v37, %v6539_v42  ;;  %v3776_v42 = vld [vmem:[%s9456_s4 + $0x50] sm:$0xff]  ;;  %v3794_v37 = vld [vmem:[%s9456_s4 + $0xe0] sm:$0xff] }
 0x94c   :  { %3464 = vmatprep.mubr.f32.mxu0 %v9231_v39  ;;  %3535 = vmatprep.mubr.f32.mxu1 %v9231_v39 }
 0x94d   :  { %3465 = vmatmul.mubr.f32.vlgmr.msra.gmra.mrb[30].mxu0 %v9233_v34  ;;  %3536 = vmatmul.mubr.f32.vlgmr.msra.gmra.mrb[76].mxu1 %v9233_v34 }
 0x94e   :  { %6100 = vmatpush1.bf16.msra.mxu0 %v9882_v48  ;;  %6164 = vmatpush1.bf16.msra.mxu1 %v7765_v3  ;;  %v10458_v3 = vld [vmem:[#allocation79_spill] sm:$0xff]  ;;  %v10472_v48 = vld [vmem:[#allocation93_spill] sm:$0xff] }
 0x94f   :  { %3606 = vmatprep.mubr.f32.mxu0 %v9231_v39  ;;  %3677 = vmatprep.mubr.f32.mxu1 %v9231_v39 }
 0x950   :  { %6102 = vmatprep.subr.bf16.mxu0 %v9883_v7  ;;  %6166 = vmatprep.subr.bf16.mxu1 %v9884_v45  ;;  %v10473_v7 = vld [vmem:[#allocation115_spill] sm:$0xff] }
 0x951   :  { %v10474_v45 = vld [vmem:[#allocation95_spill] sm:$0xff] }
 0x952   :  { %6104 = vmatpush1.bf16.msra.mxu0 %v9885_v51  ;;  %6168 = vmatpush1.bf16.msra.mxu1 %v7787_v26  ;;  %v10459_v26 = vld [vmem:[#allocation108_spill] sm:$0xff] }
 0x953   :  { %6106 = vmatprep.subr.bf16.mxu0 %v9886_v11  ;;  %6170 = vmatprep.subr.bf16.mxu1 %v7790_v15  ;;  %v10460_v15 = vld [vmem:[#allocation81_spill] sm:$0xff]  ;;  %v10475_v51 = vld [vmem:[#allocation116_spill] sm:$0xff] }
 0x954   :  { %v10476_v11 = vld [vmem:[#allocation97_spill] sm:$0xff] }
 0x956   :  { %6108 = vmatpush1.bf16.msra.mxu0 %v9887_v55  ;;  %6172 = vmatpush1.bf16.msra.mxu1 %v7808_v25  ;;  %v10461_v25 = vld [vmem:[#allocation109_spill] sm:$0xff] }
 0x957   :  { %6110 = vmatprep.subr.bf16.mxu0 %v9888_v23  ;;  %6174 = vmatprep.subr.bf16.mxu1 %v7811_v57  ;;  %v10462_v57 = vld [vmem:[#allocation83_spill] sm:$0xff]  ;;  %v10477_v55 = vld [vmem:[#allocation117_spill] sm:$0xff] }
 0x958   :  { %v10478_v23 = vld [vmem:[#allocation99_spill] sm:$0xff] }
 0x95a   :  { %6112 = vmatpush1.bf16.msra.mxu0 %v9889_v33  ;;  %6176 = vmatpush1.bf16.msra.mxu1 %v7828_v4  ;;  %v10463_v4 = vld [vmem:[#allocation110_spill] sm:$0xff] }
 0x95b   :  { %6114 = vmatprep.subr.bf16.mxu0 %v9890_v53  ;;  %6178 = vmatprep.subr.bf16.mxu1 %v7831_v5  ;;  %v10464_v5 = vld [vmem:[#allocation85_spill] sm:$0xff]  ;;  %v10479_v33 = vld [vmem:[#allocation118_spill] sm:$0xff]  ;;  %v3782_v53 = vld [vmem:[%s9456_s4 + $0x80] sm:$0xff] }
 0x95e   :  { %6116 = vmatpush1.bf16.msra.mxu0 %v9891_v41  ;;  %6180 = vmatpush1.bf16.msra.mxu1 %v7848_v40  ;;  %v10465_v40 = vld [vmem:[#allocation111_spill] sm:$0xff]  ;;  %v3783_v41 = vld [vmem:[%s9456_s4 + $0x88] sm:$0xff] }
 0x95f   :  { %6118 = vmatprep.subr.bf16.mxu0 %v9892_v43  ;;  %6182 = vmatprep.subr.bf16.mxu1 %v7851_v16  ;;  %v10466_v16 = vld [vmem:[#allocation87_spill] sm:$0xff]  ;;  %v6225_v43 = vpack.c.bf16 %v3783_v41, %v3782_v53  ;;  %v10483_v53 = vld [vmem:[#allocation133_spill] sm:$0xff] }
 0x962   :  { %6120 = vmatpush1.bf16.msra.mxu0 %v9893_v44  ;;  %6184 = vmatpush1.bf16.msra.mxu1 %v7868_v49  ;;  %v10467_v49 = vld [vmem:[#allocation112_spill] sm:$0xff] }
 0x963   :  { %6122 = vmatprep.subr.bf16.mxu0 %v9894_v0  ;;  %6186 = vmatprep.subr.bf16.mxu1 %v7871_v19  ;;  %v10468_v19 = vld [vmem:[#allocation89_spill] sm:$0xff]  ;;  %v3766_v44 = vld [vmem:[%s9456_s4] sm:$0xff] }
 0x964   :  { %v3767_v0 = vld [vmem:[%s9456_s4 + $0x8] sm:$0xff] }
 0x966   :  { %6124 = vmatpush1.bf16.msra.mxu0 %v9895_v63  ;;  %6188 = vmatpush1.bf16.msra.mxu1 %v7888_v60  ;;  %v10469_v60 = vld [vmem:[#allocation113_spill] sm:$0xff]  ;;  %v6227_v63 = vpack.c.bf16 %v3767_v0, %v3766_v44 }
 0x967   :  { %6126 = vmatprep.subr.bf16.mxu0 %v9896_v35  ;;  %6190 = vmatprep.subr.bf16.mxu1 %v7891_v30  ;;  %v10470_v30 = vld [vmem:[#allocation91_spill] sm:$0xff]  ;;  %v3784_v35 = vld [vmem:[%s9456_s4 + $0x90] sm:$0xff] }
 0x96a   :  { %6128 = vmatpush1.bf16.msra.mxu0 %v9897_v29  ;;  %6192 = vmatpush1.bf16.msra.mxu1 %v9980_v24  ;;  %v3785_v29 = vld [vmem:[%s9456_s4 + $0x98] sm:$0xff]  ;;  %v3786_v24 = vld [vmem:[%s9456_s4 + $0xa0] sm:$0xff] }
 0x96b   :  { %6130 = vmatprep.subr.bf16.mxu0 %v9898_v1  ;;  %6194 = vmatprep.subr.bf16.mxu1 %v9981_v17  ;;  %v6229_v1 = vpack.c.bf16 %v3785_v29, %v3784_v35  ;;  %v3787_v17 = vld [vmem:[%s9456_s4 + $0xa8] sm:$0xff] }
 0x96e   :  { %6132 = vmatpush1.bf16.msra.mxu0 %v9899_v50  ;;  %6196 = vmatpush1.bf16.msra.mxu1 %v9982_v22  ;;  %v3768_v50 = vld [vmem:[%s9456_s4 + $0x10] sm:$0xff]  ;;  %v6233_v22 = vpack.c.bf16 %v3787_v17, %v3786_v24 }
 0x96f   :  { %6134 = vmatprep.subr.bf16.mxu0 %v9900_v31  ;;  %6198 = vmatprep.subr.bf16.mxu1 %v9983_v20  ;;  %v3769_v31 = vld [vmem:[%s9456_s4 + $0x18] sm:$0xff]  ;;  %v3770_v20 = vld [vmem:[%s9456_s4 + $0x20] sm:$0xff] }
 0x972   :  { %6136 = vmatpush1.bf16.msra.mxu0 %v9901_v36  ;;  %6200 = vmatpush1.bf16.msra.mxu1 %v9984_v18  ;;  %v6231_v36 = vpack.c.bf16 %v3769_v31, %v3768_v50  ;;  %v3771_v18 = vld [vmem:[%s9456_s4 + $0x28] sm:$0xff] }
 0x973   :  { %6138 = vmatprep.subr.bf16.mxu0 %v9902_v56  ;;  %6202 = vmatprep.subr.bf16.mxu1 %v9985_v13  ;;  %v10471_v56 = vld [vmem:[#allocation114_spill] sm:$0xff]  ;;  %v6235_v13 = vpack.c.bf16 %v3771_v18, %v3770_v20  ;;  %v10484_v20 = vld [vmem:[#allocation160_spill] sm:$0xff] }
 0x976   :  { %6140 = vmatpush1.bf16.msra.mxu0 %v10458_v3  ;;  %6204 = vmatpush1.bf16.msra.mxu1 %v10459_v26  ;;  %v3795_v3 = vld [vmem:[%s9456_s4 + $0xe8] sm:$0xff]  ;;  %v6247_v26 = vpack.c.bf16 %v3777_v28, %v3776_v42 }
 0x977   :  { %6142 = vmatprep.subr.bf16.mxu0 %v10460_v15  ;;  %6206 = vmatprep.subr.bf16.mxu1 %v10461_v25  ;;  %v6249_v15 = vpack.c.bf16 %v3795_v3, %v3794_v37  ;;  %v3778_v25 = vld [vmem:[%s9456_s4 + $0x60] sm:$0xff] }
 0x97a   :  { %6144 = vmatpush1.bf16.msra.mxu0 %v10462_v57  ;;  %6208 = vmatpush1.bf16.msra.mxu1 %v10463_v4  ;;  %v3779_v57 = vld [vmem:[%s9456_s4 + $0x68] sm:$0xff]  ;;  %v3796_v4 = vld [vmem:[%s9456_s4 + $0xf0] sm:$0xff] }
 0x97b   :  { %6146 = vmatprep.subr.bf16.mxu0 %v10464_v5  ;;  %6210 = vmatprep.subr.bf16.mxu1 %v10465_v40  ;;  %v3797_v5 = vld [vmem:[%s9456_s4 + $0xf8] sm:$0xff]  ;;  %v6251_v40 = vpack.c.bf16 %v3779_v57, %v3778_v25 }
 0x97e   :  { %6148 = vmatpush1.bf16.msra.mxu0 %v10466_v16  ;;  %6212 = vmatpush1.bf16.msra.mxu1 %v10467_v49  ;;  %v6253_v16 = vpack.c.bf16 %v3797_v5, %v3796_v4  ;;  %v3780_v49 = vld [vmem:[%s9456_s4 + $0x70] sm:$0xff] }
 0x97f   :  { %6150 = vmatprep.subr.bf16.mxu0 %v10468_v19  ;;  %6214 = vmatprep.subr.bf16.mxu1 %v10469_v60  ;;  %v3781_v19 = vld [vmem:[%s9456_s4 + $0x78] sm:$0xff] }
 0x980   :  { %v6255_v60 = vpack.c.bf16 %v3781_v19, %v3780_v49  ;;  %v10486_v49 = vld [vmem:[#allocation162_spill] sm:$0xff]  ;;  %v10487_v19 = vld [vmem:[#allocation41_spill] sm:$0xff] }
 0x982   :  { %6152 = vmatpush1.bf16.msra.mxu0 %v10470_v30  ;;  %6216 = vmatpush1.bf16.msra.mxu1 %v10471_v56 }
 0x983   :  { %6154 = vmatprep.subr.bf16.mxu0 %v10472_v48  ;;  %6218 = vmatprep.subr.bf16.mxu1 %v10473_v7  ;;  %v10480_v48 = vld [vmem:[#allocation131_spill] sm:$0xff] }
 0x986   :  { %6156 = vmatpush1.bf16.msra.mxu0 %v10474_v45  ;;  %6220 = vmatpush1.bf16.msra.mxu1 %v10475_v51  ;;  %v10481_v45 = vld [vmem:[#allocation146_spill] sm:$0xff] }
 0x987   :  { %6158 = vmatprep.subr.bf16.mxu0 %v10476_v11  ;;  %6222 = vmatprep.subr.bf16.mxu1 %v10477_v55 }
 0x98a   :  { %6160 = vmatpush1.bf16.msra.mxu0 %v10478_v23  ;;  %6224 = vmatpush1.bf16.msra.mxu1 %v10479_v33  ;;  %v10482_v23 = vld [vmem:[#allocation132_spill] sm:$0xff] }
 0x98b   :  { %6226 = vmatprep.subr.bf16.mxu0 %v6225_v43 }
 0x98d   :  { %3607 = vmatmul.mubr.f32.vlgmr.msra.gmra.mrb[0].mxu0 %v9233_v34  ;;  %3678 = vmatmul.mubr.f32.vlgmr.msra.gmra.mrb[78].mxu1 %v9233_v34 }
 0x98e   :  { %6228 = vmatpush3.bf16.msra.mxu0 %v6227_v63 }
 0x98f   :  { %6230 = vmatprep.subr.bf16.mxu0 %v6229_v1 }
 0x992   :  { %6232 = vmatpush3.bf16.msra.mxu0 %v6231_v36 }
 0x993   :  { %6234 = vmatprep.subr.bf16.mxu0 %v6233_v22 }
 0x996   :  { %6236 = vmatpush3.bf16.msra.mxu0 %v6235_v13 }
 0x997   :  { %6238 = vmatprep.subr.bf16.mxu0 %v6237_v47 }
 0x99a   :  { %6240 = vmatpush3.bf16.msra.mxu0 %v6239_v58 }
 0x99b   :  { %6242 = vmatprep.subr.bf16.mxu0 %v6241_v12 }
 0x99e   :  { %6244 = vmatpush3.bf16.msra.mxu0 %v6243_v61 }
 0x99f   :  { %6246 = vmatprep.subr.bf16.mxu0 %v6245_v59 }
 0x9a2   :  { %6248 = vmatpush3.bf16.msra.mxu0 %v6247_v26 }
 0x9a3   :  { %6250 = vmatprep.subr.bf16.mxu0 %v6249_v15 }
 0x9a6   :  { %6252 = vmatpush3.bf16.msra.mxu0 %v6251_v40 }
 0x9a7   :  { %6254 = vmatprep.subr.bf16.mxu0 %v6253_v16 }
 0x9aa   :  { %6256 = vmatpush3.bf16.msra.mxu0 %v6255_v60  ;;  %v10488_v60 = vld [vmem:[#allocation53_spill] sm:$0xff] }
 0xa20   :  { %v3466_v30 = vpop.f32.mrb[30].mxu0  ;;  %v3537_v56 = vpop.f32.mrb[76].mxu1 }
 0xa21   :  { %v3687_v7 = vadd.f32 %v3466_v30, %v10480_v48  ;;  %v3689_v51 = vadd.f32 %v3537_v56, %v10481_v45  ;;  %v3468_v11 = vpop.f32.mrb[31].mxu0  ;;  %v3539_v55 = vpop.f32.mrb[77].mxu1  ;;  %v10489_v30 = vld [vmem:[#allocation43_spill] sm:$0xff]  ;;  %v10490_v56 = vld [vmem:[#allocation49_spill] sm:$0xff] }
 0xa22   :  { %v3688_v33 = vadd.f32 %v3468_v11, %v10482_v23  ;;  %v3711_v41 = vadd.f32 %v3539_v55, %v10483_v53  ;;  %v10492_v48 = vld [vmem:[#allocation45_spill] sm:$0xff]  ;;  %v10496_v11 = vld [vmem:[#allocation39_spill] sm:$0xff] }
 0xa23   :  { %v4082_v43 = vmul.f32 -1.442695, %v3687_v7  ;;  %v4084_v1 = vmul.f32 -1.442695, %v3689_v51  ;;  %v10493_v7 = vld [vmem:[#allocation51_spill] sm:$0xff]  ;;  %v10494_v45 = vld [vmem:[#allocation101_spill] sm:$0xff] }
 0xa24   :  { %v4083_v44 = vmul.f32 -1.442695, %v3688_v33  ;;  %v4085_v0 = vmul.f32 -1.442695, %v3711_v41  ;;  %v10495_v51 = vld [vmem:[#allocation55_spill] sm:$0xff] }
 0xa25   :  { %6546 = vpow2.f32 %v4082_v43  ;;  %v4088_v33 = vld [vmem:[%s9457_s5] ss:$0 sm:$0xff] }
 0xa26   :  { %6548 = vpow2.f32 %v4083_v44 }
 0xa27   :  { %6550 = vpow2.f32 %v4085_v0 }
 0xa28   :  { %6552 = vpow2.f32 %v4084_v1 }
 0xa2f   :  { %v6547_v63 = vpop.eup %6546 }
 0xa30   :  { %v6549_v35 = vpop.eup %6548  ;;  %v3699_v50 = vadd.f32 1.0, %v6547_v63 }
 0xa31   :  { %v6551_v29 = vpop.eup %6550  ;;  %v3700_v31 = vadd.f32 1.0, %v6549_v35 }
 0xa32   :  { %v3723_v36 = vadd.f32 1.0, %v6551_v29  ;;  %6554 = vrcp.f32 %v3699_v50  ;;  %v6553_v58 = vpop.eup %6552 }
 0xa33   :  { %6556 = vrcp.f32 %v3700_v31 }
 0xa34   :  { %6558 = vrcp.f32 %v3723_v36 }
 0xa3c   :  { %v6555_v38 = vpop.eup %6554 }
 0xa3d   :  { %v6557_v6 = vpop.eup %6556 }
 0xa3e   :  { %v6559_v54 = vpop.eup %6558  ;;  %v3738_v14 = vmul.f32 %v6557_v6, %v9224_v52 }
 0xa60   :  { %v3608_v24 = vpop.f32.mrb[0].mxu0  ;;  %v3679_v17 = vpop.f32.mrb[78].mxu1 }
 0xa61   :  { %v6289_v22 = vadd.f32 %v3608_v24, %v8278_v62  ;;  %v3733_v18 = vadd.f32 %v3679_v17, %v10484_v20  ;;  %v3610_v13 = vpop.f32.mrb[1].mxu0  ;;  %v3681_v46 = vpop.f32.mrb[79].mxu1  ;;  %v3701_v62 = vadd.f32 1.0, %v6553_v58 }
 0xa62   :  { %v3736_v47 = vadd.f32 %v3681_v46, %v10485_v27  ;;  %v6290_v8 = vadd.f32 %v3610_v13, %v8283_v32 }
 0xa63   :  { %v4086_v9 = vmul.f32 -1.442695, %v6289_v22  ;;  %6560 = vtanh.f32 %v3733_v18 }
 0xa64   :  { %6562 = vtanh.f32 %v3736_v47  ;;  %v4087_v12 = vmul.f32 -1.442695, %v6290_v8 }
 0xa65   :  { %6564 = vpow2.f32 %v4086_v9 }
 0xa66   :  { %6566 = vpow2.f32 %v4087_v12 }
 0xa67   :  { %6568 = vrcp.f32 %v3701_v62 }
 0xa6d   :  { %v6561_v2 = vpop.eup %6560 }
 0xa6e   :  { %v6563_v61 = vpop.eup %6562  ;;  %v3739_v10 = vmul.f32 %v6561_v2, %v6555_v38 }
 0xa6f   :  { %v6565_v42 = vpop.eup %6564  ;;  %v3742_v59 = vmul.f32 %v6563_v61, %v6559_v54 }
 0xa70   :  { %v3724_v28 = vadd.f32 1.0, %v6565_v42  ;;  %v3740_v37 = vadd.f32 %v3739_v10, %v3738_v14  ;;  %v6567_v32 = vpop.eup %6566 }
 0xa71   :  { %v6569_v3 = vpop.eup %6568  ;;  %v3725_v15 = vadd.f32 1.0, %v6567_v32 }
 0xa72   :  { %6570 = vrcp.f32 %v3724_v28 }
 0xa73   :  { %6572 = vtanh.f32 %v3740_v37 }
 0xa74   :  { %6574 = vrcp.f32 %v3725_v15 }
 0xa7c   :  { %v6571_v26 = vpop.eup %6570 }
 0xa7d   :  { %v6573_v25 = vpop.eup %6572  ;;  %v3741_v57 = vmul.f32 %v6571_v26, %v9228_v21  ;;  %v10491_v21 = vld [vmem:[#allocation47_spill] sm:$0xff] }
 0xa7e   :  { %v3745_v4 = vmul.f32 %v6573_v25, %v6569_v3  ;;  %v6575_v52 = vpop.eup %6574 }
 0xa7f   :  { %v3743_v5 = vadd.f32 %v3742_v59, %v3741_v57 }
 0xa81   :  { %6576 = vtanh.f32 %v3743_v5 }
 0xa8b   :  { %v6577_v40 = vpop.eup %6576 }
 0xa8c   :  { %v3747_v16 = vmul.f32 %v6577_v40, %v6575_v52 }
 0xa8e   :  { %3869 = vmatprep.mubr.f32.mxu0 %v3747_v16 }
 0xa8f   :  { %3870 = vmatmul.mubr.f32.vlgmr.msra.gmra.mrb[32].mxu0 %v10486_v49 }
 0xa90   :  { %3874 = vmatprep.mubr.f32.mxu0 %v9231_v39  ;;  %v10497_v39 = vld [vmem:[#allocation161_spill] sm:$0xff] }
 0xa93   :  { %3875 = vmatmul.mubr.f32.gmra.mrb[34].mxu0 %v10487_v19 }
 0xa94   :  { %3879 = vmatprep.mubr.f32.mxu0 %v10488_v60 }
 0xa97   :  { %3880 = vmatmul.mubr.f32.gmra.mrb[36].mxu0 %v10489_v30 }
 0xa98   :  { %3884 = vmatprep.mubr.f32.mxu0 %v10490_v56 }
 0xa9b   :  { %3885 = vmatmul.mubr.f32.gmra.mrb[38].mxu0 %v10491_v21 }
 0xa9c   :  { %3889 = vmatprep.mubr.f32.mxu0 %v10492_v48 }
 0xa9f   :  { %3890 = vmatmul.mubr.f32.gmra.mrb[40].mxu0 %v10493_v7 }
 0xaa0   :  { %3894 = vmatprep.mubr.f32.mxu0 %v10494_v45 }
 0xaa3   :  { %3895 = vmatmul.mubr.f32.gmra.mrb[42].mxu0 %v10495_v51 }
 0xaa4   :  { %3899 = vmatprep.mubr.f32.mxu0 %v10496_v11 }
 0xaa7   :  { %3900 = vmatmul.mubr.f32.gmra.mrb[44].mxu0 %v9233_v34 }
 0xaa8   :  { %3904 = vmatprep.mubr.f32.mxu0 %v10497_v39 }
 0xaab   :  { %3905 = vmatmul.mubr.f32.gmra.mrb[46].mxu0 %v3745_v4 }
 0xb62   :  { %v4121_v55 = vpop.f32.mrb[32].mxu0 }
 0xb63   :  { %v4122_v23 = vpop.f32.mrb[33].mxu0 }
 0xb64   :  { %v4123_v53 = vadd.f32 %v4122_v23, %v4121_v55 }
 0xb66   :  { %v4124_v41 = vpop.f32.mrb[34].mxu0  ;;  %v3872_v43 = vadd.f32 %v4123_v53, %v4088_v33 }
 0xb67   :  { %v4125_v44 = vpop.f32.mrb[35].mxu0 }
 0xb68   :  { %v4126_v0 = vadd.f32 %v4125_v44, %v4124_v41  ;;  %3910 = vmax.xlane.f32.xlu0 %v3872_v43 }
 0xb6a   :  { %v4127_v63 = vpop.f32.mrb[36].mxu0  ;;  %v3877_v35 = vadd.f32 %v4126_v0, %v4088_v33 }
 0xb6b   :  { %v4128_v29 = vpop.f32.mrb[37].mxu0 }
 0xb6c   :  { %v4129_v1 = vadd.f32 %v4128_v29, %v4127_v63  ;;  %3912 = vmax.xlane.f32.xlu0 %v3877_v35 }
 0xb6e   :  { %v4130_v34 = vpop.f32.mrb[38].mxu0  ;;  %v3882_v50 = vadd.f32 %v4129_v1, %v4088_v33 }
 0xb6f   :  { %v4131_v31 = vpop.f32.mrb[39].mxu0 }
 0xb70   :  { %v4132_v36 = vadd.f32 %v4131_v31, %v4130_v34  ;;  %3914 = vmax.xlane.f32.xlu1 %v3882_v50 }
 0xb72   :  { %v4133_v24 = vpop.f32.mrb[40].mxu0  ;;  %v3887_v17 = vadd.f32 %v4132_v36, %v4088_v33 }
 0xb73   :  { %v4134_v22 = vpop.f32.mrb[41].mxu0 }
 0xb74   :  { %v4135_v20 = vadd.f32 %v4134_v22, %v4133_v24  ;;  %3916 = vmax.xlane.f32.xlu1 %v3887_v17 }
 0xb76   :  { %v4136_v18 = vpop.f32.mrb[42].mxu0  ;;  %v3892_v13 = vadd.f32 %v4135_v20, %v4088_v33 }
 0xb77   :  { %v4137_v46 = vpop.f32.mrb[43].mxu0 }
 0xb78   :  { %v4138_v27 = vadd.f32 %v4137_v46, %v4136_v18  ;;  %3918 = vmax.xlane.f32.xlu0 %v3892_v13 }
 0xb7a   :  { %v4139_v47 = vpop.f32.mrb[44].mxu0  ;;  %v3897_v9 = vadd.f32 %v4138_v27, %v4088_v33 }
 0xb7b   :  { %v4140_v8 = vpop.f32.mrb[45].mxu0 }
 0xb7c   :  { %v4141_v58 = vadd.f32 %v4140_v8, %v4139_v47  ;;  %3920 = vmax.xlane.f32.xlu1 %v3897_v9 }
 0xb7e   :  { %v4142_v38 = vpop.f32.mrb[46].mxu0  ;;  %v3902_v6 = vadd.f32 %v4141_v58, %v4088_v33 }
 0xb7f   :  { %v4143_v12 = vpop.f32.mrb[47].mxu0 }
 0xb80   :  { %v4144_v54 = vadd.f32 %v4143_v12, %v4142_v38  ;;  %3922 = vmax.xlane.f32.xlu0 %v3902_v6 }
 0xb82   :  { %v3907_v2 = vadd.f32 %v4144_v54, %v4088_v33 }
 0xb84   :  { %3924 = vmax.xlane.f32.xlu1 %v3907_v2 }
 0xbf5   :  { %v3911_v62 = vpop.xlane.xlu0 %3910 }
 0xbf6   :  { %v3926_v61 = vsub.f32 %v3872_v43, %v3911_v62 }
 0xbf8   :  { %v3934_v14 = vmul.f32 1.442695, %v3926_v61 }
 0xbf9   :  { %v3913_v10 = vpop.xlane.xlu0 %3912 }
 0xbfa   :  { %6578 = vpow2.f32 %v3934_v14  ;;  %v3927_v42 = vsub.f32 %v3877_v35, %v3913_v10 }
 0xbfc   :  { %v3936_v59 = vmul.f32 1.442695, %v3927_v42 }
 0xbfd   :  { %v3915_v28 = vpop.xlane.xlu1 %3914 }
 0xbfe   :  { %6580 = vpow2.f32 %v3936_v59  ;;  %v3928_v37 = vsub.f32 %v3882_v50, %v3915_v28 }
 0xc00   :  { %v3938_v32 = vmul.f32 1.442695, %v3928_v37 }
 0xc01   :  { %v3917_v3 = vpop.xlane.xlu1 %3916 }
 0xc02   :  { %6582 = vpow2.f32 %v3938_v32  ;;  %v3929_v26 = vsub.f32 %v3887_v17, %v3917_v3 }
 0xc04   :  { %v6579_v15 = vpop.eup %6578  ;;  %v3940_v25 = vmul.f32 1.442695, %v3929_v26 }
 0xc05   :  { %3950 = vadd.xlane.f32.xlu0 %v6579_v15  ;;  %v3919_v57 = vpop.xlane.xlu0 %3918 }
 0xc06   :  { %6584 = vpow2.f32 %v3940_v25  ;;  %v3930_v4 = vsub.f32 %v3892_v13, %v3919_v57 }
 0xc08   :  { %v6581_v5 = vpop.eup %6580  ;;  %v3942_v52 = vmul.f32 1.442695, %v3930_v4 }
 0xc09   :  { %v3921_v40 = vpop.xlane.xlu1 %3920  ;;  %3952 = vadd.xlane.f32.xlu1 %v6581_v5 }
 0xc0a   :  { %6586 = vpow2.f32 %v3942_v52  ;;  %v3931_v16 = vsub.f32 %v3897_v9, %v3921_v40 }
 0xc0c   :  { %v6583_v49 = vpop.eup %6582  ;;  %v3944_v19 = vmul.f32 1.442695, %v3931_v16 }
 0xc0d   :  { %3954 = vadd.xlane.f32.xlu0 %v6583_v49  ;;  %v3923_v60 = vpop.xlane.xlu0 %3922 }
 0xc0e   :  { %6588 = vpow2.f32 %v3944_v19  ;;  %v3932_v30 = vsub.f32 %v3902_v6, %v3923_v60 }
 0xc10   :  { %v6585_v56 = vpop.eup %6584  ;;  %v3946_v21 = vmul.f32 1.442695, %v3932_v30 }
 0xc11   :  { %v3925_v48 = vpop.xlane.xlu1 %3924  ;;  %3956 = vadd.xlane.f32.xlu1 %v6585_v56 }
 0xc12   :  { %6590 = vpow2.f32 %v3946_v21  ;;  %v3933_v7 = vsub.f32 %v3907_v2, %v3925_v48 }
 0xc14   :  { %v6587_v45 = vpop.eup %6586  ;;  %v3948_v51 = vmul.f32 1.442695, %v3933_v7 }
 0xc15   :  { %3958 = vadd.xlane.f32.xlu0 %v6587_v45 }
 0xc16   :  { %6592 = vpow2.f32 %v3948_v51 }
 0xc18   :  { %v6589_v11 = vpop.eup %6588 }
 0xc19   :  { %3960 = vadd.xlane.f32.xlu1 %v6589_v11 }
 0xc1c   :  { %v6591_v39 = vpop.eup %6590 }
 0xc1d   :  { %3962 = vadd.xlane.f32.xlu0 %v6591_v39 }
 0xc20   :  { %v6593_v55 = vpop.eup %6592 }
 0xc21   :  { %3964 = vadd.xlane.f32.xlu1 %v6593_v55 }
 0xc92   :  { %v3951_v23 = vpop.xlane.xlu0 %3950 }
 0xc93   :  { %6594 = vrcp.f32 %v3951_v23 }
 0xc96   :  { %v3953_v33 = vpop.xlane.xlu1 %3952 }
 0xc97   :  { %6596 = vrcp.f32 %v3953_v33 }
 0xc9a   :  { %v3955_v53 = vpop.xlane.xlu0 %3954 }
 0xc9b   :  { %6598 = vrcp.f32 %v3955_v53 }
 0xc9d   :  { %v6595_v41 = vpop.eup %6594 }
 0xc9e   :  { %v3974_v43 = vmul.f32 %v6595_v41, %v6579_v15  ;;  %v3957_v44 = vpop.xlane.xlu1 %3956 }
 0xc9f   :  { %6600 = vrcp.f32 %v3957_v44 }
 0xca0   :  { %3982 = vst [vmem:[%s9458_s6] sm:$0xff] %v3974_v43 }
 0xca1   :  { %v6597_v0 = vpop.eup %6596 }
 0xca2   :  { %v3975_v63 = vmul.f32 %v6597_v0, %v6581_v5  ;;  %v3959_v35 = vpop.xlane.xlu0 %3958 }
 0xca3   :  { %6602 = vrcp.f32 %v3959_v35 }
 0xca4   :  { %3983 = vst [vmem:[%s9458_s6 + $0x8] sm:$0xff] %v3975_v63 }
 0xca5   :  { %v6599_v29 = vpop.eup %6598 }
 0xca6   :  { %v3976_v1 = vmul.f32 %v6599_v29, %v6583_v49  ;;  %v3961_v34 = vpop.xlane.xlu1 %3960 }
 0xca7   :  { %6604 = vrcp.f32 %v3961_v34 }
 0xca8   :  { %3984 = vst [vmem:[%s9458_s6 + $0x10] sm:$0xff] %v3976_v1 }
 0xca9   :  { %v6601_v50 = vpop.eup %6600 }
 0xcaa   :  { %v3977_v31 = vmul.f32 %v6601_v50, %v6585_v56  ;;  %v3963_v36 = vpop.xlane.xlu0 %3962 }
 0xcab   :  { %6606 = vrcp.f32 %v3963_v36 }
 0xcac   :  { %3985 = vst [vmem:[%s9458_s6 + $0x18] sm:$0xff] %v3977_v31 }
 0xcad   :  { %v6603_v24 = vpop.eup %6602 }
 0xcae   :  { %v3978_v17 = vmul.f32 %v6603_v24, %v6587_v45  ;;  %v3965_v22 = vpop.xlane.xlu1 %3964 }
 0xcaf   :  { %6608 = vrcp.f32 %v3965_v22 }
 0xcb0   :  { %3986 = vst [vmem:[%s9458_s6 + $0x20] sm:$0xff] %v3978_v17 }
 0xcb1   :  { %v6605_v20 = vpop.eup %6604 }
 0xcb2   :  { %v3979_v18 = vmul.f32 %v6605_v20, %v6589_v11 }
 0xcb4   :  { %3987 = vst [vmem:[%s9458_s6 + $0x28] sm:$0xff] %v3979_v18 }
 0xcb5   :  { %v6607_v13 = vpop.eup %6606 }
 0xcb6   :  { %v3980_v46 = vmul.f32 %v6607_v13, %v6591_v39 }
 0xcb8   :  { %3988 = vst [vmem:[%s9458_s6 + $0x30] sm:$0xff] %v3980_v46 }
 0xcb9   :  { %v6609_v27 = vpop.eup %6608 }
 0xcba   :  { %v3981_v47 = vmul.f32 %v6609_v27, %v6593_v55 }
 0xcbc   :  { %3989 = vst [vmem:[%s9458_s6 + $0x38] sm:$0xff] %v3981_v47 }

</bundles_post_ra>
